<compile_context>
chip_gen: v7x
topology: tpu7x:2x2x1
jax: 0.10.0
libtpu: 0.0.40
codegen_flags: <defaults>
</compile_context>

<pallas_src>
import math

import jax
import jax.numpy as jnp
import numpy as np
from jax.experimental import pallas as pl
from jax.experimental.pallas import tpu as pltpu

# ---- small, TPU-friendly stand-in shapes consistent with the module ----
BATCH = 8
INPUT_SIZE = 256      # stands in for input_shape*input_shape (= 2304)
HIDDEN_SIZE = 128     # stands in for 2048
NUM_LAYERS = 3
NUM_CLASSES = 8       # classifier head width (architecture not in the spec)
SRC_SEQ_LEN = 9       # stands in for train_seq_length (=100); encoder sees S-1
TARGET_SEQ_LEN = 5

_VMEM = pl.BlockSpec(memory_space=pltpu.MemorySpace.VMEM)


# --------------------------- shared kernel helper ---------------------------

def _lstm_stack_step(x, ws, bs, h_sc, c_sc):
    """One time step of the NUM_LAYERS-deep LSTM stack.

    x:        (B, D_in) float32 input to layer 0
    ws[l]:    (D_in_l + H, 4H) bfloat16   pre-stacked [W_ih ; W_hh]
    bs[l]:    (1, 4H) float32             b_ih + b_hh
    h_sc/c_sc:(L, B, H) float32 VMEM scratch, updated in place.
    Returns the top-layer hidden output (B, H) float32.
    """
    H = HIDDEN_SIZE
    for l in range(NUM_LAYERS):
        h_prev = h_sc[l]
        c_prev = c_sc[l]
        # merged gate matmul: [x, h] @ W_cat  (bf16 operands, f32 accumulate)
        xh = jnp.concatenate([x, h_prev], axis=-1).astype(jnp.bfloat16)
        gates = (jnp.dot(xh, ws[l][...], preferred_element_type=jnp.float32)
                 + bs[l][...])
        # PyTorch gate order: input, forget, cell(g), output
        i = jax.nn.sigmoid(gates[:, 0 * H:1 * H])
        f = jax.nn.sigmoid(gates[:, 1 * H:2 * H])
        g = jnp.tanh(gates[:, 2 * H:3 * H])
        o = jax.nn.sigmoid(gates[:, 3 * H:4 * H])
        c_new = f * c_prev + i * g
        h_new = o * jnp.tanh(c_new)
        h_sc[l] = h_new
        c_sc[l] = c_new
        x = h_new
        # TODO(synk): nn.LSTM inter-layer dropout applies only in training
        # mode; this inference forward is identity.
    return x


# --------------------------- Pallas kernels ---------------------------

def _encoder_kernel(src_ref, w0, b0, w1, b1, w2, b2,
                    h_out_ref, c_out_ref, h_sc, c_sc):
    """Grid axis t = source time step. h/c carried in VMEM scratch."""
    t = pl.program_id(0)

    @pl.when(t == 0)
    def _init():
        h_sc[...] = jnp.zeros_like(h_sc)
        c_sc[...] = jnp.zeros_like(c_sc)

    _lstm_stack_step(src_ref[...], (w0, w1, w2), (b0, b1, b2), h_sc, c_sc)

    @pl.when(t == pl.num_programs(0) - 1)
    def _fin():
        h_out_ref[...] = h_sc[...]
        c_out_ref[...] = c_sc[...]


def _decoder_loop_kernel(x0_ref, h0_ref, c0_ref,
                         w0, b0, w1, b1, w2, b2, wfc_ref, bfc_ref,
                         outs_ref, h_out_ref, c_out_ref,
                         x_sc, h_sc, c_sc):
    """Grid axis t = decode step. Autoregressive feedback via x_sc scratch."""
    t = pl.program_id(0)

    @pl.when(t == 0)
    def _init():
        x_sc[...] = x0_ref[...]
        h_sc[...] = h0_ref[...]
        c_sc[...] = c0_ref[...]

    top = _lstm_stack_step(x_sc[...], (w0, w1, w2), (b0, b1, b2), h_sc, c_sc)

    pred = jax.nn.sigmoid(
        jnp.dot(top.astype(jnp.bfloat16), wfc_ref[...],
                preferred_element_type=jnp.float32) + bfc_ref[...])

    outs_ref[...] = pred          # this step's output slab (B, I)
    x_sc[...] = pred              # teacher_force_ratio = 0.0 -> feed back

    @pl.when(t == pl.num_programs(0) - 1)
    def _fin():
        h_out_ref[...] = h_sc[...]
        c_out_ref[...] = c_sc[...]


def _classifier_kernel(h_ref, c_ref, w_ref, b_ref, out_ref):
    # TODO(synk): classifier architecture is not defined in the provided spec;
    # stand-in: Linear([h_top ; c_top]) + softmax.
    hc = jnp.concatenate([h_ref[...], c_ref[...]], axis=-1).astype(jnp.bfloat16)
    logits = (jnp.dot(hc, w_ref[...], preferred_element_type=jnp.float32)
              + b_ref[...])
    out_ref[...] = jax.nn.softmax(logits, axis=-1)


# --------------------------- wrappers ---------------------------

def _const2(shape):
    return pl.BlockSpec(shape, lambda t: (0, 0))


def encoder_forward(params, src_tbi):
    """src_tbi: (S_enc, B, I) -> (hidden, cell) each (L, B, H)."""
    S, B, _ = src_tbi.shape
    in_specs = [pl.BlockSpec((None, B, INPUT_SIZE), lambda t: (t, 0, 0))]
    args = [src_tbi]
    for l in range(NUM_LAYERS):
        w, b = params[f"enc_w_{l}"], params[f"enc_b_{l}"]
        in_specs += [_const2(w.shape), _const2(b.shape)]
        args += [w, b]
    state_spec = pl.BlockSpec((NUM_LAYERS, B, HIDDEN_SIZE), lambda t: (0, 0, 0))
    return pl.pallas_call(
        _encoder_kernel,
        out_shape=(jax.ShapeDtypeStruct((NUM_LAYERS, B, HIDDEN_SIZE), jnp.float32),
                   jax.ShapeDtypeStruct((NUM_LAYERS, B, HIDDEN_SIZE), jnp.float32)),
        grid_spec=pltpu.PrefetchScalarGridSpec(
            num_scalar_prefetch=0, grid=(S,),
            in_specs=in_specs, out_specs=(state_spec, state_spec),
            scratch_shapes=[pltpu.VMEM((NUM_LAYERS, B, HIDDEN_SIZE), jnp.float32),
                            pltpu.VMEM((NUM_LAYERS, B, HIDDEN_SIZE), jnp.float32)]),
        compiler_params=pltpu.CompilerParams(dimension_semantics=("arbitrary",)),
    )(*args)


def decoder_loop(params, x0, hidden, cell, target_seq_len):
    """x0: (B, I); hidden/cell: (L, B, H). Returns (outs (T,B,I), h, c)."""
    B = x0.shape[0]
    in_specs = [pl.BlockSpec((B, INPUT_SIZE), lambda t: (0, 0)),
                pl.BlockSpec((NUM_LAYERS, B, HIDDEN_SIZE), lambda t: (0, 0, 0)),
                pl.BlockSpec((NUM_LAYERS, B, HIDDEN_SIZE), lambda t: (0, 0, 0))]
    args = [x0, hidden, cell]
    for l in range(NUM_LAYERS):
        w, b = params[f"dec_w_{l}"], params[f"dec_b_{l}"]
        in_specs += [_const2(w.shape), _const2(b.shape)]
        args += [w, b]
    in_specs += [_const2(params["fc_w"].shape), _const2(params["fc_b"].shape)]
    args += [params["fc_w"], params["fc_b"]]

    state_spec = pl.BlockSpec((NUM_LAYERS, B, HIDDEN_SIZE), lambda t: (0, 0, 0))
    return pl.pallas_call(
        _decoder_loop_kernel,
        out_shape=(jax.ShapeDtypeStruct((target_seq_len, B, INPUT_SIZE), jnp.float32),
                   jax.ShapeDtypeStruct((NUM_LAYERS, B, HIDDEN_SIZE), jnp.float32),
                   jax.ShapeDtypeStruct((NUM_LAYERS, B, HIDDEN_SIZE), jnp.float32)),
        grid_spec=pltpu.PrefetchScalarGridSpec(
            num_scalar_prefetch=0, grid=(target_seq_len,),
            in_specs=in_specs,
            out_specs=(pl.BlockSpec((None, B, INPUT_SIZE), lambda t: (t, 0, 0)),
                       state_spec, state_spec),
            scratch_shapes=[pltpu.VMEM((B, INPUT_SIZE), jnp.float32),
                            pltpu.VMEM((NUM_LAYERS, B, HIDDEN_SIZE), jnp.float32),
                            pltpu.VMEM((NUM_LAYERS, B, HIDDEN_SIZE), jnp.float32)]),
        compiler_params=pltpu.CompilerParams(dimension_semantics=("arbitrary",)),
    )(*args)


def classifier_forward(params, hidden, cell):
    B = hidden.shape[1]
    return pl.pallas_call(
        _classifier_kernel,
        out_shape=jax.ShapeDtypeStruct((B, NUM_CLASSES), jnp.float32),
        in_specs=[_VMEM] * 4,
        out_specs=_VMEM,
    )(hidden[-1], cell[-1], params["cls_w"], params["cls_b"])


def seq2seq_forward(params, source, target_seq_len):
    """source: (B, SRC_SEQ_LEN, INPUT_SIZE) -> (outputs (B,T,I), coa_cla_prob)."""
    assert source.shape[1] == SRC_SEQ_LEN and source.shape[2] == INPUT_SIZE
    src_enc = jnp.transpose(source[:, :-1, :], (1, 0, 2))      # (S-1, B, I)
    hidden, cell = encoder_forward(params, src_enc)
    coa_cla_prob = classifier_forward(params, hidden, cell)
    x0 = source[:, -1, :]
    outs_tbi, _, _ = decoder_loop(params, x0, hidden, cell, target_seq_len)
    outputs = jnp.transpose(outs_tbi, (1, 0, 2))               # (B, T, I)
    return outputs, coa_cla_prob


# --------------------------- parameter init ---------------------------

def _init_lstm_stack(key, input_size, hidden_size, num_layers, prefix, params):
    stdv = 1.0 / math.sqrt(hidden_size)
    for l in range(num_layers):
        d_in = input_size if l == 0 else hidden_size
        key, k1, k2, k3, k4 = jax.random.split(key, 5)
        w_ih = jax.random.uniform(k1, (4 * hidden_size, d_in), jnp.float32, -stdv, stdv)
        w_hh = jax.random.uniform(k2, (4 * hidden_size, hidden_size), jnp.float32, -stdv, stdv)
        b_ih = jax.random.uniform(k3, (4 * hidden_size,), jnp.float32, -stdv, stdv)
        b_hh = jax.random.uniform(k4, (4 * hidden_size,), jnp.float32, -stdv, stdv)
        w_cat = jnp.concatenate([w_ih.T, w_hh.T], axis=0)       # (d_in+H, 4H)
        params[f"{prefix}_w_{l}"] = w_cat.astype(jnp.bfloat16)
        params[f"{prefix}_b_{l}"] = (b_ih + b_hh).reshape(1, -1)
    return key


def init_params(key):
    params = {}
    key = _init_lstm_stack(key, INPUT_SIZE, HIDDEN_SIZE, NUM_LAYERS, "enc", params)
    key = _init_lstm_stack(key, INPUT_SIZE, HIDDEN_SIZE, NUM_LAYERS, "dec", params)
    stdv = 1.0 / math.sqrt(HIDDEN_SIZE)
    key, k1, k2, k3, k4 = jax.random.split(key, 5)
    w_fc = jax.random.uniform(k1, (INPUT_SIZE, HIDDEN_SIZE), jnp.float32, -stdv, stdv)
    b_fc = jax.random.uniform(k2, (INPUT_SIZE,), jnp.float32, -stdv, stdv)
    params["fc_w"] = w_fc.T.astype(jnp.bfloat16)                # (H, I)
    params["fc_b"] = b_fc.reshape(1, -1)
    stdv_c = 1.0 / math.sqrt(2 * HIDDEN_SIZE)
    w_cls = jax.random.uniform(k3, (NUM_CLASSES, 2 * HIDDEN_SIZE), jnp.float32, -stdv_c, stdv_c)
    b_cls = jax.random.uniform(k4, (NUM_CLASSES,), jnp.float32, -stdv_c, stdv_c)
    params["cls_w"] = w_cls.T.astype(jnp.bfloat16)              # (2H, C)
    params["cls_b"] = b_cls.reshape(1, -1)
    return params


# --------------------------- pure-JAX reference ---------------------------

def _lstm_ref_step(x, ws, bs, h, c):
    H = HIDDEN_SIZE
    new_h, new_c = [], []
    for l in range(NUM_LAYERS):
        xh = jnp.concatenate([x, h[l]], axis=-1).astype(jnp.bfloat16)
        gates = jnp.dot(xh, ws[l], preferred_element_type=jnp.float32) + bs[l]
        i = jax.nn.sigmoid(gates[:, 0 * H:1 * H])
        f = jax.nn.sigmoid(gates[:, 1 * H:2 * H])
        g = jnp.tanh(gates[:, 2 * H:3 * H])
        o = jax.nn.sigmoid(gates[:, 3 * H:4 * H])
        c_l = f * c[l] + i * g
        h_l = o * jnp.tanh(c_l)
        new_h.append(h_l)
        new_c.append(c_l)
        x = h_l
    return x, jnp.stack(new_h), jnp.stack(new_c)


def seq2seq_reference(params, source, target_seq_len):
    B = source.shape[0]
    enc_ws = [params[f"enc_w_{l}"] for l in range(NUM_LAYERS)]
    enc_bs = [params[f"enc_b_{l}"] for l in range(NUM_LAYERS)]
    h = jnp.zeros((NUM_LAYERS, B, HIDDEN_SIZE), jnp.float32)
    c = jnp.zeros_like(h)
    for t in range(source.shape[1] - 1):
        _, h, c = _lstm_ref_step(source[:, t, :], enc_ws, enc_bs, h, c)
    hc = jnp.concatenate([h[-1], c[-1]], axis=-1).astype(jnp.bfloat16)
    logits = jnp.dot(hc, params["cls_w"], preferred_element_type=jnp.float32) + params["cls_b"]
    coa = jax.nn.softmax(logits, axis=-1)

    dec_ws = [params[f"dec_w_{l}"] for l in range(NUM_LAYERS)]
    dec_bs = [params[f"dec_b_{l}"] for l in range(NUM_LAYERS)]
    x = source[:, -1, :]
    outs = []
    for t in range(target_seq_len):
        top, h, c = _lstm_ref_step(x, dec_ws, dec_bs, h, c)
        pred = jax.nn.sigmoid(
            jnp.dot(top.astype(jnp.bfloat16), params["fc_w"],
                    preferred_element_type=jnp.float32) + params["fc_b"])
        outs.append(pred)
        x = pred
    return jnp.stack(outs, axis=1), coa


# --------------------------- main ---------------------------

if __name__ == "__main__":
    key = jax.random.PRNGKey(0)
    key, ksrc, kp = jax.random.split(key, 3)

    source = jax.random.normal(ksrc, (BATCH, SRC_SEQ_LEN, INPUT_SIZE), jnp.float32)
    params = init_params(kp)

    fwd = jax.jit(seq2seq_forward, static_argnums=(2,))
    outputs, coa = fwd(params, source, TARGET_SEQ_LEN)
    jax.block_until_ready((outputs, coa))

    outputs_r, coa_r = seq2seq_reference(params, source, TARGET_SEQ_LEN)
    np.testing.assert_allclose(np.asarray(outputs), np.asarray(outputs_r),
                               rtol=2e-3, atol=2e-3)
    np.testing.assert_allclose(np.asarray(coa), np.asarray(coa_r),
                               rtol=2e-3, atol=2e-3)

    assert outputs.shape == (BATCH, TARGET_SEQ_LEN, INPUT_SIZE)
    assert coa.shape == (BATCH, NUM_CLASSES)
    print("KERNEL_OK")
</pallas_src>

<mosaic_0001>
module attributes {stable_mosaic.version = 11 : i64} {
  func.func @_classifier_kernel(%arg0: memref<8x128xf32, #tpu.memory_space<vmem>>, %arg1: memref<8x128xf32, #tpu.memory_space<vmem>>, %arg2: memref<256x8xbf16, #tpu.memory_space<vmem>>, %arg3: memref<1x8xf32, #tpu.memory_space<vmem>>, %arg4: memref<8x8xf32, #tpu.memory_space<vmem>>) attributes {dimension_semantics = [], scalar_prefetch = 0 : i64, scratch_operands = 0 : i64, tpu.core_type = #tpu.core_type<tc>} {
    %c0 = arith.constant 0 : index
    %c0_0 = arith.constant 0 : index
    %0 = vector.load %arg0[%c0, %c0_0] : memref<8x128xf32, #tpu.memory_space<vmem>>, vector<8x128xf32>
    %c0_1 = arith.constant 0 : index
    %c0_2 = arith.constant 0 : index
    %1 = vector.load %arg1[%c0_1, %c0_2] : memref<8x128xf32, #tpu.memory_space<vmem>>, vector<8x128xf32>
    %2 = tpu.concatenate %0, %1 in 1 : vector<8x128xf32>, vector<8x128xf32> -> vector<8x256xf32>
    %3 = arith.truncf %2 : vector<8x256xf32> to vector<8x256xbf16>
    %c0_3 = arith.constant 0 : index
    %c0_4 = arith.constant 0 : index
    %4 = vector.load %arg2[%c0_3, %c0_4] : memref<256x8xbf16, #tpu.memory_space<vmem>>, vector<256x8xbf16>
    %cst = arith.constant dense<0.000000e+00> : vector<8x8xf32>
    %5 = tpu.matmul %3, %4, %cst {dimension_numbers = #tpu.dot_dimension_numbers<[1], [0], [0], [1], [0, 0, 1, 1], [], []>} : vector<8x256xbf16>, vector<256x8xbf16>, vector<8x8xf32> -> vector<8x8xf32>
    %c0_5 = arith.constant 0 : index
    %c0_6 = arith.constant 0 : index
    %6 = vector.load %arg3[%c0_5, %c0_6] : memref<1x8xf32, #tpu.memory_space<vmem>>, vector<1x8xf32>
    %7 = vector.broadcast %6 : vector<1x8xf32> to vector<8x8xf32>
    %8 = arith.addf %5, %7 : vector<8x8xf32>
    %cst_7 = arith.constant dense<0xFF800000> : vector<8xf32>
    %9 = vector.multi_reduction <maximumf>, %8, %cst_7 [1] : vector<8x8xf32> to vector<8xf32>
    %cst_8 = arith.constant 0xFF800000 : f32
    %10 = vector.broadcast %cst_8 : f32 to vector<8xf32>
    %11 = arith.maximumf %10, %9 : vector<8xf32>
    %12 = vector.shape_cast %11 : vector<8xf32> to vector<8x1xf32>
    %13 = vector.broadcast %12 : vector<8x1xf32> to vector<8x8xf32>
    %14 = arith.subf %8, %13 : vector<8x8xf32>
    %15 = math.exp %14 : vector<8x8xf32>
    %cst_9 = arith.constant dense<0.000000e+00> : vector<8xf32>
    %16 = vector.multi_reduction <add>, %15, %cst_9 [1] : vector<8x8xf32> to vector<8xf32>
    %17 = vector.shape_cast %16 : vector<8xf32> to vector<8x1xf32>
    %18 = vector.broadcast %17 : vector<8x1xf32> to vector<8x8xf32>
    %19 = arith.divf %15, %18 : vector<8x8xf32>
    %c0_10 = arith.constant 0 : index
    %c0_11 = arith.constant 0 : index
    %20 = vector.load %arg4[%c0_10, %c0_11] : memref<8x8xf32, #tpu.memory_space<vmem>>, vector<8x8xf32>
    tpu.vector_store %arg4[%c0_10, %c0_11], %19 {strides = array<i32>} : memref<8x8xf32, #tpu.memory_space<vmem>>, vector<8x8xf32>,
    return
  }
}

module attributes {stable_mosaic.version = 11 : i64} {
  func.func @_encoder_kernel(%arg0: i32, %arg1: memref<1x8x256xf32, #tpu.memory_space<vmem>>, %arg2: memref<384x512xbf16, #tpu.memory_space<vmem>>, %arg3: memref<1x512xf32, #tpu.memory_space<vmem>>, %arg4: memref<256x512xbf16, #tpu.memory_space<vmem>>, %arg5: memref<1x512xf32, #tpu.memory_space<vmem>>, %arg6: memref<256x512xbf16, #tpu.memory_space<vmem>>, %arg7: memref<1x512xf32, #tpu.memory_space<vmem>>, %arg8: memref<3x8x128xf32, #tpu.memory_space<vmem>>, %arg9: memref<3x8x128xf32, #tpu.memory_space<vmem>>, %arg10: memref<3x8x128xf32, #tpu.memory_space<vmem>>, %arg11: memref<3x8x128xf32, #tpu.memory_space<vmem>>) attributes {dimension_semantics = [#tpu.dimension_semantics<arbitrary>], iteration_bounds = array<i64: 8>, scalar_prefetch = 0 : i64, scratch_operands = 2 : i64, tpu.core_type = #tpu.core_type<tc>, window_params = [{transform_indices = @transform_0, window_bounds = array<i64: 1, 8, 256>}, {pipeline_mode = #tpu.pipeline_mode<synchronous>, transform_indices = @transform_1, window_bounds = array<i64: 384, 512>}, {pipeline_mode = #tpu.pipeline_mode<synchronous>, transform_indices = @transform_2, window_bounds = array<i64: 1, 512>}, {pipeline_mode = #tpu.pipeline_mode<synchronous>, transform_indices = @transform_3, window_bounds = array<i64: 256, 512>}, {pipeline_mode = #tpu.pipeline_mode<synchronous>, transform_indices = @transform_4, window_bounds = array<i64: 1, 512>}, {pipeline_mode = #tpu.pipeline_mode<synchronous>, transform_indices = @transform_5, window_bounds = array<i64: 256, 512>}, {pipeline_mode = #tpu.pipeline_mode<synchronous>, transform_indices = @transform_6, window_bounds = array<i64: 1, 512>}, {pipeline_mode = #tpu.pipeline_mode<synchronous>, transform_indices = @transform_7, window_bounds = array<i64: 3, 8, 128>}, {pipeline_mode = #tpu.pipeline_mode<synchronous>, transform_indices = @transform_8, window_bounds = array<i64: 3, 8, 128>}]} {
    %c0_i32 = arith.constant 0 : i32
    %0 = arith.cmpi eq, %arg0, %c0_i32 : i32
    %1 = arith.extui %0 : i1 to i32
    %c0_i32_0 = arith.constant 0 : i32
    %2 = arith.cmpi ne, %1, %c0_i32_0 : i32
    scf.if %2 {
      %cst_61 = arith.constant 0.000000e+00 : f32
      %134 = vector.broadcast %cst_61 : f32 to vector<3x8x128xf32>
      %c0_62 = arith.constant 0 : index
      %c0_63 = arith.constant 0 : index
      %c0_64 = arith.constant 0 : index
      %135 = vector.load %arg10[%c0_62, %c0_63, %c0_64] : memref<3x8x128xf32, #tpu.memory_space<vmem>>, vector<3x8x128xf32>
      tpu.vector_store %arg10[%c0_62, %c0_63, %c0_64], %134 {strides = array<i32>} : memref<3x8x128xf32, #tpu.memory_space<vmem>>, vector<3x8x128xf32>,
      %cst_65 = arith.constant 0.000000e+00 : f32
      %136 = vector.broadcast %cst_65 : f32 to vector<3x8x128xf32>
      %c0_66 = arith.constant 0 : index
      %c0_67 = arith.constant 0 : index
      %c0_68 = arith.constant 0 : index
      %137 = vector.load %arg11[%c0_66, %c0_67, %c0_68] : memref<3x8x128xf32, #tpu.memory_space<vmem>>, vector<3x8x128xf32>
      tpu.vector_store %arg11[%c0_66, %c0_67, %c0_68], %136 {strides = array<i32>} : memref<3x8x128xf32, #tpu.memory_space<vmem>>, vector<3x8x128xf32>,
    } else {
    }
    %c0 = arith.constant 0 : index
    %c0_1 = arith.constant 0 : index
    %c0_2 = arith.constant 0 : index
    %3 = vector.load %arg1[%c0, %c0_1, %c0_2] : memref<1x8x256xf32, #tpu.memory_space<vmem>>, vector<1x8x256xf32>
    %4 = vector.shape_cast %3 : vector<1x8x256xf32> to vector<8x256xf32>
    %c0_3 = arith.constant 0 : index
    %c0_4 = arith.constant 0 : index
    %c0_5 = arith.constant 0 : index
    %5 = vector.load %arg10[%c0_3, %c0_4, %c0_5] : memref<3x8x128xf32, #tpu.memory_space<vmem>>, vector<1x8x128xf32>
    %6 = vector.shape_cast %5 : vector<1x8x128xf32> to vector<8x128xf32>
    %c0_6 = arith.constant 0 : index
    %c0_7 = arith.constant 0 : index
    %c0_8 = arith.constant 0 : index
    %7 = vector.load %arg11[%c0_6, %c0_7, %c0_8] : memref<3x8x128xf32, #tpu.memory_space<vmem>>, vector<1x8x128xf32>
    %8 = vector.shape_cast %7 : vector<1x8x128xf32> to vector<8x128xf32>
    %9 = tpu.concatenate %4, %6 in 1 : vector<8x256xf32>, vector<8x128xf32> -> vector<8x384xf32>
    %10 = arith.truncf %9 : vector<8x384xf32> to vector<8x384xbf16>
    %c0_9 = arith.constant 0 : index
    %c0_10 = arith.constant 0 : index
    %11 = vector.load %arg2[%c0_9, %c0_10] : memref<384x512xbf16, #tpu.memory_space<vmem>>, vector<384x512xbf16>
    %cst = arith.constant dense<0.000000e+00> : vector<8x512xf32>
    %12 = tpu.matmul %10, %11, %cst {dimension_numbers = #tpu.dot_dimension_numbers<[1], [0], [0], [1], [0, 0, 1, 1], [], []>} : vector<8x384xbf16>, vector<384x512xbf16>, vector<8x512xf32> -> vector<8x512xf32>
    %c0_11 = arith.constant 0 : index
    %c0_12 = arith.constant 0 : index
    %13 = vector.load %arg3[%c0_11, %c0_12] : memref<1x512xf32, #tpu.memory_space<vmem>>, vector<1x512xf32>
    %14 = vector.broadcast %13 : vector<1x512xf32> to vector<8x512xf32>
    %15 = arith.addf %12, %14 : vector<8x512xf32>
    %16 = vector.extract_strided_slice %15 {offsets = [0, 0], sizes = [8, 128], strides = [1, 1]} : vector<8x512xf32> to vector<8x128xf32>
    %17 = arith.negf %16 : vector<8x128xf32>
    %18 = math.exp %17 : vector<8x128xf32>
    %cst_13 = arith.constant 1.000000e+00 : f32
    %19 = vector.broadcast %cst_13 : f32 to vector<8x128xf32>
    %20 = arith.addf %19, %18 : vector<8x128xf32>
    %21 = arith.divf %19, %20 : vector<8x128xf32>
    %22 = vector.extract_strided_slice %15 {offsets = [0, 128], sizes = [8, 128], strides = [1, 1]} : vector<8x512xf32> to vector<8x128xf32>
    %23 = arith.negf %22 : vector<8x128xf32>
    %24 = math.exp %23 : vector<8x128xf32>
    %cst_14 = arith.constant 1.000000e+00 : f32
    %25 = vector.broadcast %cst_14 : f32 to vector<8x128xf32>
    %26 = arith.addf %25, %24 : vector<8x128xf32>
    %27 = arith.divf %25, %26 : vector<8x128xf32>
    %28 = vector.extract_strided_slice %15 {offsets = [0, 256], sizes = [8, 128], strides = [1, 1]} : vector<8x512xf32> to vector<8x128xf32>
    %29 = math.tanh %28 : vector<8x128xf32>
    %30 = vector.extract_strided_slice %15 {offsets = [0, 384], sizes = [8, 128], strides = [1, 1]} : vector<8x512xf32> to vector<8x128xf32>
    %31 = arith.negf %30 : vector<8x128xf32>
    %32 = math.exp %31 : vector<8x128xf32>
    %cst_15 = arith.constant 1.000000e+00 : f32
    %33 = vector.broadcast %cst_15 : f32 to vector<8x128xf32>
    %34 = arith.addf %33, %32 : vector<8x128xf32>
    %35 = arith.divf %33, %34 : vector<8x128xf32>
    %36 = arith.mulf %27, %8 : vector<8x128xf32>
    %37 = arith.mulf %21, %29 : vector<8x128xf32>
    %38 = arith.addf %36, %37 : vector<8x128xf32>
    %39 = math.tanh %38 : vector<8x128xf32>
    %40 = arith.mulf %35, %39 : vector<8x128xf32>
    %c0_16 = arith.constant 0 : index
    %c0_17 = arith.constant 0 : index
    %c0_18 = arith.constant 0 : index
    %41 = vector.load %arg10[%c0_16, %c0_17, %c0_18] : memref<3x8x128xf32, #tpu.memory_space<vmem>>, vector<1x8x128xf32>
    %42 = vector.shape_cast %41 : vector<1x8x128xf32> to vector<8x128xf32>
    %43 = vector.shape_cast %40 : vector<8x128xf32> to vector<1x8x128xf32>
    tpu.vector_store %arg10[%c0_16, %c0_17, %c0_18], %43 {strides = array<i32>} : memref<3x8x128xf32, #tpu.memory_space<vmem>>, vector<1x8x128xf32>,
    %c0_19 = arith.constant 0 : index
    %c0_20 = arith.constant 0 : index
    %c0_21 = arith.constant 0 : index
    %44 = vector.load %arg11[%c0_19, %c0_20, %c0_21] : memref<3x8x128xf32, #tpu.memory_space<vmem>>, vector<1x8x128xf32>
    %45 = vector.shape_cast %44 : vector<1x8x128xf32> to vector<8x128xf32>
    %46 = vector.shape_cast %38 : vector<8x128xf32> to vector<1x8x128xf32>
    tpu.vector_store %arg11[%c0_19, %c0_20, %c0_21], %46 {strides = array<i32>} : memref<3x8x128xf32, #tpu.memory_space<vmem>>, vector<1x8x128xf32>,
    %c1 = arith.constant 1 : index
    %c0_22 = arith.constant 0 : index
    %c0_23 = arith.constant 0 : index
    %47 = vector.load %arg10[%c1, %c0_22, %c0_23] : memref<3x8x128xf32, #tpu.memory_space<vmem>>, vector<1x8x128xf32>
    %48 = vector.shape_cast %47 : vector<1x8x128xf32> to vector<8x128xf32>
    %c1_24 = arith.constant 1 : index
    %c0_25 = arith.constant 0 : index
    %c0_26 = arith.constant 0 : index
    %49 = vector.load %arg11[%c1_24, %c0_25, %c0_26] : memref<3x8x128xf32, #tpu.memory_space<vmem>>, vector<1x8x128xf32>
    %50 = vector.shape_cast %49 : vector<1x8x128xf32> to vector<8x128xf32>
    %51 = tpu.concatenate %40, %48 in 1 : vector<8x128xf32>, vector<8x128xf32> -> vector<8x256xf32>
    %52 = arith.truncf %51 : vector<8x256xf32> to vector<8x256xbf16>
    %c0_27 = arith.constant 0 : index
    %c0_28 = arith.constant 0 : index
    %53 = vector.load %arg4[%c0_27, %c0_28] : memref<256x512xbf16, #tpu.memory_space<vmem>>, vector<256x512xbf16>
    %cst_29 = arith.constant dense<0.000000e+00> : vector<8x512xf32>
    %54 = tpu.matmul %52, %53, %cst_29 {dimension_numbers = #tpu.dot_dimension_numbers<[1], [0], [0], [1], [0, 0, 1, 1], [], []>} : vector<8x256xbf16>, vector<256x512xbf16>, vector<8x512xf32> -> vector<8x512xf32>
    %c0_30 = arith.constant 0 : index
    %c0_31 = arith.constant 0 : index
    %55 = vector.load %arg5[%c0_30, %c0_31] : memref<1x512xf32, #tpu.memory_space<vmem>>, vector<1x512xf32>
    %56 = vector.broadcast %55 : vector<1x512xf32> to vector<8x512xf32>
    %57 = arith.addf %54, %56 : vector<8x512xf32>
    %58 = vector.extract_strided_slice %57 {offsets = [0, 0], sizes = [8, 128], strides = [1, 1]} : vector<8x512xf32> to vector<8x128xf32>
    %59 = arith.negf %58 : vector<8x128xf32>
    %60 = math.exp %59 : vector<8x128xf32>
    %cst_32 = arith.constant 1.000000e+00 : f32
    %61 = vector.broadcast %cst_32 : f32 to vector<8x128xf32>
    %62 = arith.addf %61, %60 : vector<8x128xf32>
    %63 = arith.divf %61, %62 : vector<8x128xf32>
    %64 = vector.extract_strided_slice %57 {offsets = [0, 128], sizes = [8, 128], strides = [1, 1]} : vector<8x512xf32> to vector<8x128xf32>
    %65 = arith.negf %64 : vector<8x128xf32>
    %66 = math.exp %65 : vector<8x128xf32>
    %cst_33 = arith.constant 1.000000e+00 : f32
    %67 = vector.broadcast %cst_33 : f32 to vector<8x128xf32>
    %68 = arith.addf %67, %66 : vector<8x128xf32>
    %69 = arith.divf %67, %68 : vector<8x128xf32>
    %70 = vector.extract_strided_slice %57 {offsets = [0, 256], sizes = [8, 128], strides = [1, 1]} : vector<8x512xf32> to vector<8x128xf32>
    %71 = math.tanh %70 : vector<8x128xf32>
    %72 = vector.extract_strided_slice %57 {offsets = [0, 384], sizes = [8, 128], strides = [1, 1]} : vector<8x512xf32> to vector<8x128xf32>
    %73 = arith.negf %72 : vector<8x128xf32>
    %74 = math.exp %73 : vector<8x128xf32>
    %cst_34 = arith.constant 1.000000e+00 : f32
    %75 = vector.broadcast %cst_34 : f32 to vector<8x128xf32>
    %76 = arith.addf %75, %74 : vector<8x128xf32>
    %77 = arith.divf %75, %76 : vector<8x128xf32>
    %78 = arith.mulf %69, %50 : vector<8x128xf32>
    %79 = arith.mulf %63, %71 : vector<8x128xf32>
    %80 = arith.addf %78, %79 : vector<8x128xf32>
    %81 = math.tanh %80 : vector<8x128xf32>
    %82 = arith.mulf %77, %81 : vector<8x128xf32>
    %c1_35 = arith.constant 1 : index
    %c0_36 = arith.constant 0 : index
    %c0_37 = arith.constant 0 : index
    %83 = vector.load %arg10[%c1_35, %c0_36, %c0_37] : memref<3x8x128xf32, #tpu.memory_space<vmem>>, vector<1x8x128xf32>
    %84 = vector.shape_cast %83 : vector<1x8x128xf32> to vector<8x128xf32>
    %85 = vector.shape_cast %82 : vector<8x128xf32> to vector<1x8x128xf32>
    tpu.vector_store %arg10[%c1_35, %c0_36, %c0_37], %85 {strides = array<i32>} : memref<3x8x128xf32, #tpu.memory_space<vmem>>, vector<1x8x128xf32>,
    %c1_38 = arith.constant 1 : index
    %c0_39 = arith.constant 0 : index
    %c0_40 = arith.constant 0 : index
    %86 = vector.load %arg11[%c1_38, %c0_39, %c0_40] : memref<3x8x128xf32, #tpu.memory_space<vmem>>, vector<1x8x128xf32>
    %87 = vector.shape_cast %86 : vector<1x8x128xf32> to vector<8x128xf32>
    %88 = vector.shape_cast %80 : vector<8x128xf32> to vector<1x8x128xf32>
    tpu.vector_store %arg11[%c1_38, %c0_39, %c0_40], %88 {strides = array<i32>} : memref<3x8x128xf32, #tpu.memory_space<vmem>>, vector<1x8x128xf32>,
    %c2 = arith.constant 2 : index
    %c0_41 = arith.constant 0 : index
    %c0_42 = arith.constant 0 : index
    %89 = vector.load %arg10[%c2, %c0_41, %c0_42] : memref<3x8x128xf32, #tpu.memory_space<vmem>>, vector<1x8x128xf32>
    %90 = vector.shape_cast %89 : vector<1x8x128xf32> to vector<8x128xf32>
    %c2_43 = arith.constant 2 : index
    %c0_44 = arith.constant 0 : index
    %c0_45 = arith.constant 0 : index
    %91 = vector.load %arg11[%c2_43, %c0_44, %c0_45] : memref<3x8x128xf32, #tpu.memory_space<vmem>>, vector<1x8x128xf32>
    %92 = vector.shape_cast %91 : vector<1x8x128xf32> to vector<8x128xf32>
    %93 = tpu.concatenate %82, %90 in 1 : vector<8x128xf32>, vector<8x128xf32> -> vector<8x256xf32>
    %94 = arith.truncf %93 : vector<8x256xf32> to vector<8x256xbf16>
    %c0_46 = arith.constant 0 : index
    %c0_47 = arith.constant 0 : index
    %95 = vector.load %arg6[%c0_46, %c0_47] : memref<256x512xbf16, #tpu.memory_space<vmem>>, vector<256x512xbf16>
    %cst_48 = arith.constant dense<0.000000e+00> : vector<8x512xf32>
    %96 = tpu.matmul %94, %95, %cst_48 {dimension_numbers = #tpu.dot_dimension_numbers<[1], [0], [0], [1], [0, 0, 1, 1], [], []>} : vector<8x256xbf16>, vector<256x512xbf16>, vector<8x512xf32> -> vector<8x512xf32>
    %c0_49 = arith.constant 0 : index
    %c0_50 = arith.constant 0 : index
    %97 = vector.load %arg7[%c0_49, %c0_50] : memref<1x512xf32, #tpu.memory_space<vmem>>, vector<1x512xf32>
    %98 = vector.broadcast %97 : vector<1x512xf32> to vector<8x512xf32>
    %99 = arith.addf %96, %98 : vector<8x512xf32>
    %100 = vector.extract_strided_slice %99 {offsets = [0, 0], sizes = [8, 128], strides = [1, 1]} : vector<8x512xf32> to vector<8x128xf32>
    %101 = arith.negf %100 : vector<8x128xf32>
    %102 = math.exp %101 : vector<8x128xf32>
    %cst_51 = arith.constant 1.000000e+00 : f32
    %103 = vector.broadcast %cst_51 : f32 to vector<8x128xf32>
    %104 = arith.addf %103, %102 : vector<8x128xf32>
    %105 = arith.divf %103, %104 : vector<8x128xf32>
    %106 = vector.extract_strided_slice %99 {offsets = [0, 128], sizes = [8, 128], strides = [1, 1]} : vector<8x512xf32> to vector<8x128xf32>
    %107 = arith.negf %106 : vector<8x128xf32>
    %108 = math.exp %107 : vector<8x128xf32>
    %cst_52 = arith.constant 1.000000e+00 : f32
    %109 = vector.broadcast %cst_52 : f32 to vector<8x128xf32>
    %110 = arith.addf %109, %108 : vector<8x128xf32>
    %111 = arith.divf %109, %110 : vector<8x128xf32>
    %112 = vector.extract_strided_slice %99 {offsets = [0, 256], sizes = [8, 128], strides = [1, 1]} : vector<8x512xf32> to vector<8x128xf32>
    %113 = math.tanh %112 : vector<8x128xf32>
    %114 = vector.extract_strided_slice %99 {offsets = [0, 384], sizes = [8, 128], strides = [1, 1]} : vector<8x512xf32> to vector<8x128xf32>
    %115 = arith.negf %114 : vector<8x128xf32>
    %116 = math.exp %115 : vector<8x128xf32>
    %cst_53 = arith.constant 1.000000e+00 : f32
    %117 = vector.broadcast %cst_53 : f32 to vector<8x128xf32>
    %118 = arith.addf %117, %116 : vector<8x128xf32>
    %119 = arith.divf %117, %118 : vector<8x128xf32>
    %120 = arith.mulf %111, %92 : vector<8x128xf32>
    %121 = arith.mulf %105, %113 : vector<8x128xf32>
    %122 = arith.addf %120, %121 : vector<8x128xf32>
    %123 = math.tanh %122 : vector<8x128xf32>
    %124 = arith.mulf %119, %123 : vector<8x128xf32>
    %c2_54 = arith.constant 2 : index
    %c0_55 = arith.constant 0 : index
    %c0_56 = arith.constant 0 : index
    %125 = vector.load %arg10[%c2_54, %c0_55, %c0_56] : memref<3x8x128xf32, #tpu.memory_space<vmem>>, vector<1x8x128xf32>
    %126 = vector.shape_cast %125 : vector<1x8x128xf32> to vector<8x128xf32>
    %127 = vector.shape_cast %124 : vector<8x128xf32> to vector<1x8x128xf32>
    tpu.vector_store %arg10[%c2_54, %c0_55, %c0_56], %127 {strides = array<i32>} : memref<3x8x128xf32, #tpu.memory_space<vmem>>, vector<1x8x128xf32>,
    %c2_57 = arith.constant 2 : index
    %c0_58 = arith.constant 0 : index
    %c0_59 = arith.constant 0 : index
    %128 = vector.load %arg11[%c2_57, %c0_58, %c0_59] : memref<3x8x128xf32, #tpu.memory_space<vmem>>, vector<1x8x128xf32>
    %129 = vector.shape_cast %128 : vector<1x8x128xf32> to vector<8x128xf32>
    %130 = vector.shape_cast %122 : vector<8x128xf32> to vector<1x8x128xf32>
    tpu.vector_store %arg11[%c2_57, %c0_58, %c0_59], %130 {strides = array<i32>} : memref<3x8x128xf32, #tpu.memory_space<vmem>>, vector<1x8x128xf32>,
    %c7_i32 = arith.constant 7 : i32
    %131 = arith.cmpi eq, %arg0, %c7_i32 : i32
    %132 = arith.extui %131 : i1 to i32
    %c0_i32_60 = arith.constant 0 : i32
    %133 = arith.cmpi ne, %132, %c0_i32_60 : i32
    scf.if %133 {
      %c0_61 = arith.constant 0 : index
      %c0_62 = arith.constant 0 : index
      %c0_63 = arith.constant 0 : index
      %134 = vector.load %arg10[%c0_61, %c0_62, %c0_63] : memref<3x8x128xf32, #tpu.memory_space<vmem>>, vector<3x8x128xf32>
      %c0_64 = arith.constant 0 : index
      %c0_65 = arith.constant 0 : index
      %c0_66 = arith.constant 0 : index
      %135 = vector.load %arg8[%c0_64, %c0_65, %c0_66] : memref<3x8x128xf32, #tpu.memory_space<vmem>>, vector<3x8x128xf32>
      tpu.vector_store %arg8[%c0_64, %c0_65, %c0_66], %134 {strides = array<i32>} : memref<3x8x128xf32, #tpu.memory_space<vmem>>, vector<3x8x128xf32>,
      %c0_67 = arith.constant 0 : index
      %c0_68 = arith.constant 0 : index
      %c0_69 = arith.constant 0 : index
      %136 = vector.load %arg11[%c0_67, %c0_68, %c0_69] : memref<3x8x128xf32, #tpu.memory_space<vmem>>, vector<3x8x128xf32>
      %c0_70 = arith.constant 0 : index
      %c0_71 = arith.constant 0 : index
      %c0_72 = arith.constant 0 : index
      %137 = vector.load %arg9[%c0_70, %c0_71, %c0_72] : memref<3x8x128xf32, #tpu.memory_space<vmem>>, vector<3x8x128xf32>
      tpu.vector_store %arg9[%c0_70, %c0_71, %c0_72], %136 {strides = array<i32>} : memref<3x8x128xf32, #tpu.memory_space<vmem>>, vector<3x8x128xf32>,
    } else {
    }
    return
  }
  func.func @transform_0(%arg0: i32) -> (i32, i32, i32) {
    %c0_i32 = arith.constant 0 : i32
    %c0_i32_0 = arith.constant 0 : i32
    %c0_i32_1 = arith.constant 0 : i32
    return %arg0, %c0_i32, %c0_i32_0 : i32, i32, i32
  }
  func.func @transform_1(%arg0: i32) -> (i32, i32) {
    %c0_i32 = arith.constant 0 : i32
    %c0_i32_0 = arith.constant 0 : i32
    %c0_i32_1 = arith.constant 0 : i32
    return %c0_i32, %c0_i32_0 : i32, i32
  }
  func.func @transform_2(%arg0: i32) -> (i32, i32) {
    %c0_i32 = arith.constant 0 : i32
    %c0_i32_0 = arith.constant 0 : i32
    %c0_i32_1 = arith.constant 0 : i32
    return %c0_i32, %c0_i32_0 : i32, i32
  }
  func.func @transform_3(%arg0: i32) -> (i32, i32) {
    %c0_i32 = arith.constant 0 : i32
    %c0_i32_0 = arith.constant 0 : i32
    %c0_i32_1 = arith.constant 0 : i32
    return %c0_i32, %c0_i32_0 : i32, i32
  }
  func.func @transform_4(%arg0: i32) -> (i32, i32) {
    %c0_i32 = arith.constant 0 : i32
    %c0_i32_0 = arith.constant 0 : i32
    %c0_i32_1 = arith.constant 0 : i32
    return %c0_i32, %c0_i32_0 : i32, i32
  }
  func.func @transform_5(%arg0: i32) -> (i32, i32) {
    %c0_i32 = arith.constant 0 : i32
    %c0_i32_0 = arith.constant 0 : i32
    %c0_i32_1 = arith.constant 0 : i32
    return %c0_i32, %c0_i32_0 : i32, i32
  }
  func.func @transform_6(%arg0: i32) -> (i32, i32) {
    %c0_i32 = arith.constant 0 : i32
    %c0_i32_0 = arith.constant 0 : i32
    %c0_i32_1 = arith.constant 0 : i32
    return %c0_i32, %c0_i32_0 : i32, i32
  }
  func.func @transform_7(%arg0: i32) -> (i32, i32, i32) {
    %c0_i32 = arith.constant 0 : i32
    %c0_i32_0 = arith.constant 0 : i32
    %c0_i32_1 = arith.constant 0 : i32
    %c0_i32_2 = arith.constant 0 : i32
    return %c0_i32, %c0_i32_0, %c0_i32_1 : i32, i32, i32
  }
  func.func @transform_8(%arg0: i32) -> (i32, i32, i32) {
    %c0_i32 = arith.constant 0 : i32
    %c0_i32_0 = arith.constant 0 : i32
    %c0_i32_1 = arith.constant 0 : i32
    %c0_i32_2 = arith.constant 0 : i32
    return %c0_i32, %c0_i32_0, %c0_i32_1 : i32, i32, i32
  }
}

module attributes {stable_mosaic.version = 11 : i64} {
  func.func @_decoder_loop_kernel(%arg0: i32, %arg1: memref<8x256xf32, #tpu.memory_space<vmem>>, %arg2: memref<3x8x128xf32, #tpu.memory_space<vmem>>, %arg3: memref<3x8x128xf32, #tpu.memory_space<vmem>>, %arg4: memref<384x512xbf16, #tpu.memory_space<vmem>>, %arg5: memref<1x512xf32, #tpu.memory_space<vmem>>, %arg6: memref<256x512xbf16, #tpu.memory_space<vmem>>, %arg7: memref<1x512xf32, #tpu.memory_space<vmem>>, %arg8: memref<256x512xbf16, #tpu.memory_space<vmem>>, %arg9: memref<1x512xf32, #tpu.memory_space<vmem>>, %arg10: memref<128x256xbf16, #tpu.memory_space<vmem>>, %arg11: memref<1x256xf32, #tpu.memory_space<vmem>>, %arg12: memref<1x8x256xf32, #tpu.memory_space<vmem>>, %arg13: memref<3x8x128xf32, #tpu.memory_space<vmem>>, %arg14: memref<3x8x128xf32, #tpu.memory_space<vmem>>, %arg15: memref<8x256xf32, #tpu.memory_space<vmem>>, %arg16: memref<3x8x128xf32, #tpu.memory_space<vmem>>, %arg17: memref<3x8x128xf32, #tpu.memory_space<vmem>>) attributes {dimension_semantics = [#tpu.dimension_semantics<arbitrary>], iteration_bounds = array<i64: 5>, scalar_prefetch = 0 : i64, scratch_operands = 3 : i64, tpu.core_type = #tpu.core_type<tc>, window_params = [{pipeline_mode = #tpu.pipeline_mode<synchronous>, transform_indices = @transform_0, window_bounds = array<i64: 8, 256>}, {pipeline_mode = #tpu.pipeline_mode<synchronous>, transform_indices = @transform_1, window_bounds = array<i64: 3, 8, 128>}, {pipeline_mode = #tpu.pipeline_mode<synchronous>, transform_indices = @transform_2, window_bounds = array<i64: 3, 8, 128>}, {pipeline_mode = #tpu.pipeline_mode<synchronous>, transform_indices = @transform_3, window_bounds = array<i64: 384, 512>}, {pipeline_mode = #tpu.pipeline_mode<synchronous>, transform_indices = @transform_4, window_bounds = array<i64: 1, 512>}, {pipeline_mode = #tpu.pipeline_mode<synchronous>, transform_indices = @transform_5, window_bounds = array<i64: 256, 512>}, {pipeline_mode = #tpu.pipeline_mode<synchronous>, transform_indices = @transform_6, window_bounds = array<i64: 1, 512>}, {pipeline_mode = #tpu.pipeline_mode<synchronous>, transform_indices = @transform_7, window_bounds = array<i64: 256, 512>}, {pipeline_mode = #tpu.pipeline_mode<synchronous>, transform_indices = @transform_8, window_bounds = array<i64: 1, 512>}, {pipeline_mode = #tpu.pipeline_mode<synchronous>, transform_indices = @transform_9, window_bounds = array<i64: 128, 256>}, {pipeline_mode = #tpu.pipeline_mode<synchronous>, transform_indices = @transform_10, window_bounds = array<i64: 1, 256>}, {transform_indices = @transform_11, window_bounds = array<i64: 1, 8, 256>}, {pipeline_mode = #tpu.pipeline_mode<synchronous>, transform_indices = @transform_12, window_bounds = array<i64: 3, 8, 128>}, {pipeline_mode = #tpu.pipeline_mode<synchronous>, transform_indices = @transform_13, window_bounds = array<i64: 3, 8, 128>}]} {
    %c0_i32 = arith.constant 0 : i32
    %0 = arith.cmpi eq, %arg0, %c0_i32 : i32
    %1 = arith.extui %0 : i1 to i32
    %c0_i32_0 = arith.constant 0 : i32
    %2 = arith.cmpi ne, %1, %c0_i32_0 : i32
    scf.if %2 {
      %c0_71 = arith.constant 0 : index
      %c0_72 = arith.constant 0 : index
      %148 = vector.load %arg1[%c0_71, %c0_72] : memref<8x256xf32, #tpu.memory_space<vmem>>, vector<8x256xf32>
      %c0_73 = arith.constant 0 : index
      %c0_74 = arith.constant 0 : index
      %149 = vector.load %arg15[%c0_73, %c0_74] : memref<8x256xf32, #tpu.memory_space<vmem>>, vector<8x256xf32>
      tpu.vector_store %arg15[%c0_73, %c0_74], %148 {strides = array<i32>} : memref<8x256xf32, #tpu.memory_space<vmem>>, vector<8x256xf32>,
      %c0_75 = arith.constant 0 : index
      %c0_76 = arith.constant 0 : index
      %c0_77 = arith.constant 0 : index
      %150 = vector.load %arg2[%c0_75, %c0_76, %c0_77] : memref<3x8x128xf32, #tpu.memory_space<vmem>>, vector<3x8x128xf32>
      %c0_78 = arith.constant 0 : index
      %c0_79 = arith.constant 0 : index
      %c0_80 = arith.constant 0 : index
      %151 = vector.load %arg16[%c0_78, %c0_79, %c0_80] : memref<3x8x128xf32, #tpu.memory_space<vmem>>, vector<3x8x128xf32>
      tpu.vector_store %arg16[%c0_78, %c0_79, %c0_80], %150 {strides = array<i32>} : memref<3x8x128xf32, #tpu.memory_space<vmem>>, vector<3x8x128xf32>,
      %c0_81 = arith.constant 0 : index
      %c0_82 = arith.constant 0 : index
      %c0_83 = arith.constant 0 : index
      %152 = vector.load %arg3[%c0_81, %c0_82, %c0_83] : memref<3x8x128xf32, #tpu.memory_space<vmem>>, vector<3x8x128xf32>
      %c0_84 = arith.constant 0 : index
      %c0_85 = arith.constant 0 : index
      %c0_86 = arith.constant 0 : index
      %153 = vector.load %arg17[%c0_84, %c0_85, %c0_86] : memref<3x8x128xf32, #tpu.memory_space<vmem>>, vector<3x8x128xf32>
      tpu.vector_store %arg17[%c0_84, %c0_85, %c0_86], %152 {strides = array<i32>} : memref<3x8x128xf32, #tpu.memory_space<vmem>>, vector<3x8x128xf32>,
    } else {
    }
    %c0 = arith.constant 0 : index
    %c0_1 = arith.constant 0 : index
    %3 = vector.load %arg15[%c0, %c0_1] : memref<8x256xf32, #tpu.memory_space<vmem>>, vector<8x256xf32>
    %c0_2 = arith.constant 0 : index
    %c0_3 = arith.constant 0 : index
    %c0_4 = arith.constant 0 : index
    %4 = vector.load %arg16[%c0_2, %c0_3, %c0_4] : memref<3x8x128xf32, #tpu.memory_space<vmem>>, vector<1x8x128xf32>
    %5 = vector.shape_cast %4 : vector<1x8x128xf32> to vector<8x128xf32>
    %c0_5 = arith.constant 0 : index
    %c0_6 = arith.constant 0 : index
    %c0_7 = arith.constant 0 : index
    %6 = vector.load %arg17[%c0_5, %c0_6, %c0_7] : memref<3x8x128xf32, #tpu.memory_space<vmem>>, vector<1x8x128xf32>
    %7 = vector.shape_cast %6 : vector<1x8x128xf32> to vector<8x128xf32>
    %8 = tpu.concatenate %3, %5 in 1 : vector<8x256xf32>, vector<8x128xf32> -> vector<8x384xf32>
    %9 = arith.truncf %8 : vector<8x384xf32> to vector<8x384xbf16>
    %c0_8 = arith.constant 0 : index
    %c0_9 = arith.constant 0 : index
    %10 = vector.load %arg4[%c0_8, %c0_9] : memref<384x512xbf16, #tpu.memory_space<vmem>>, vector<384x512xbf16>
    %cst = arith.constant dense<0.000000e+00> : vector<8x512xf32>
    %11 = tpu.matmul %9, %10, %cst {dimension_numbers = #tpu.dot_dimension_numbers<[1], [0], [0], [1], [0, 0, 1, 1], [], []>} : vector<8x384xbf16>, vector<384x512xbf16>, vector<8x512xf32> -> vector<8x512xf32>
    %c0_10 = arith.constant 0 : index
    %c0_11 = arith.constant 0 : index
    %12 = vector.load %arg5[%c0_10, %c0_11] : memref<1x512xf32, #tpu.memory_space<vmem>>, vector<1x512xf32>
    %13 = vector.broadcast %12 : vector<1x512xf32> to vector<8x512xf32>
    %14 = arith.addf %11, %13 : vector<8x512xf32>
    %15 = vector.extract_strided_slice %14 {offsets = [0, 0], sizes = [8, 128], strides = [1, 1]} : vector<8x512xf32> to vector<8x128xf32>
    %16 = arith.negf %15 : vector<8x128xf32>
    %17 = math.exp %16 : vector<8x128xf32>
    %cst_12 = arith.constant 1.000000e+00 : f32
    %18 = vector.broadcast %cst_12 : f32 to vector<8x128xf32>
    %19 = arith.addf %18, %17 : vector<8x128xf32>
    %20 = arith.divf %18, %19 : vector<8x128xf32>
    %21 = vector.extract_strided_slice %14 {offsets = [0, 128], sizes = [8, 128], strides = [1, 1]} : vector<8x512xf32> to vector<8x128xf32>
    %22 = arith.negf %21 : vector<8x128xf32>
    %23 = math.exp %22 : vector<8x128xf32>
    %cst_13 = arith.constant 1.000000e+00 : f32
    %24 = vector.broadcast %cst_13 : f32 to vector<8x128xf32>
    %25 = arith.addf %24, %23 : vector<8x128xf32>
    %26 = arith.divf %24, %25 : vector<8x128xf32>
    %27 = vector.extract_strided_slice %14 {offsets = [0, 256], sizes = [8, 128], strides = [1, 1]} : vector<8x512xf32> to vector<8x128xf32>
    %28 = math.tanh %27 : vector<8x128xf32>
    %29 = vector.extract_strided_slice %14 {offsets = [0, 384], sizes = [8, 128], strides = [1, 1]} : vector<8x512xf32> to vector<8x128xf32>
    %30 = arith.negf %29 : vector<8x128xf32>
    %31 = math.exp %30 : vector<8x128xf32>
    %cst_14 = arith.constant 1.000000e+00 : f32
    %32 = vector.broadcast %cst_14 : f32 to vector<8x128xf32>
    %33 = arith.addf %32, %31 : vector<8x128xf32>
    %34 = arith.divf %32, %33 : vector<8x128xf32>
    %35 = arith.mulf %26, %7 : vector<8x128xf32>
    %36 = arith.mulf %20, %28 : vector<8x128xf32>
    %37 = arith.addf %35, %36 : vector<8x128xf32>
    %38 = math.tanh %37 : vector<8x128xf32>
    %39 = arith.mulf %34, %38 : vector<8x128xf32>
    %c0_15 = arith.constant 0 : index
    %c0_16 = arith.constant 0 : index
    %c0_17 = arith.constant 0 : index
    %40 = vector.load %arg16[%c0_15, %c0_16, %c0_17] : memref<3x8x128xf32, #tpu.memory_space<vmem>>, vector<1x8x128xf32>
    %41 = vector.shape_cast %40 : vector<1x8x128xf32> to vector<8x128xf32>
    %42 = vector.shape_cast %39 : vector<8x128xf32> to vector<1x8x128xf32>
    tpu.vector_store %arg16[%c0_15, %c0_16, %c0_17], %42 {strides = array<i32>} : memref<3x8x128xf32, #tpu.memory_space<vmem>>, vector<1x8x128xf32>,
    %c0_18 = arith.constant 0 : index
    %c0_19 = arith.constant 0 : index
    %c0_20 = arith.constant 0 : index
    %43 = vector.load %arg17[%c0_18, %c0_19, %c0_20] : memref<3x8x128xf32, #tpu.memory_space<vmem>>, vector<1x8x128xf32>
    %44 = vector.shape_cast %43 : vector<1x8x128xf32> to vector<8x128xf32>
    %45 = vector.shape_cast %37 : vector<8x128xf32> to vector<1x8x128xf32>
    tpu.vector_store %arg17[%c0_18, %c0_19, %c0_20], %45 {strides = array<i32>} : memref<3x8x128xf32, #tpu.memory_space<vmem>>, vector<1x8x128xf32>,
    %c1 = arith.constant 1 : index
    %c0_21 = arith.constant 0 : index
    %c0_22 = arith.constant 0 : index
    %46 = vector.load %arg16[%c1, %c0_21, %c0_22] : memref<3x8x128xf32, #tpu.memory_space<vmem>>, vector<1x8x128xf32>
    %47 = vector.shape_cast %46 : vector<1x8x128xf32> to vector<8x128xf32>
    %c1_23 = arith.constant 1 : index
    %c0_24 = arith.constant 0 : index
    %c0_25 = arith.constant 0 : index
    %48 = vector.load %arg17[%c1_23, %c0_24, %c0_25] : memref<3x8x128xf32, #tpu.memory_space<vmem>>, vector<1x8x128xf32>
    %49 = vector.shape_cast %48 : vector<1x8x128xf32> to vector<8x128xf32>
    %50 = tpu.concatenate %39, %47 in 1 : vector<8x128xf32>, vector<8x128xf32> -> vector<8x256xf32>
    %51 = arith.truncf %50 : vector<8x256xf32> to vector<8x256xbf16>
    %c0_26 = arith.constant 0 : index
    %c0_27 = arith.constant 0 : index
    %52 = vector.load %arg6[%c0_26, %c0_27] : memref<256x512xbf16, #tpu.memory_space<vmem>>, vector<256x512xbf16>
    %cst_28 = arith.constant dense<0.000000e+00> : vector<8x512xf32>
    %53 = tpu.matmul %51, %52, %cst_28 {dimension_numbers = #tpu.dot_dimension_numbers<[1], [0], [0], [1], [0, 0, 1, 1], [], []>} : vector<8x256xbf16>, vector<256x512xbf16>, vector<8x512xf32> -> vector<8x512xf32>
    %c0_29 = arith.constant 0 : index
    %c0_30 = arith.constant 0 : index
    %54 = vector.load %arg7[%c0_29, %c0_30] : memref<1x512xf32, #tpu.memory_space<vmem>>, vector<1x512xf32>
    %55 = vector.broadcast %54 : vector<1x512xf32> to vector<8x512xf32>
    %56 = arith.addf %53, %55 : vector<8x512xf32>
    %57 = vector.extract_strided_slice %56 {offsets = [0, 0], sizes = [8, 128], strides = [1, 1]} : vector<8x512xf32> to vector<8x128xf32>
    %58 = arith.negf %57 : vector<8x128xf32>
    %59 = math.exp %58 : vector<8x128xf32>
    %cst_31 = arith.constant 1.000000e+00 : f32
    %60 = vector.broadcast %cst_31 : f32 to vector<8x128xf32>
    %61 = arith.addf %60, %59 : vector<8x128xf32>
    %62 = arith.divf %60, %61 : vector<8x128xf32>
    %63 = vector.extract_strided_slice %56 {offsets = [0, 128], sizes = [8, 128], strides = [1, 1]} : vector<8x512xf32> to vector<8x128xf32>
    %64 = arith.negf %63 : vector<8x128xf32>
    %65 = math.exp %64 : vector<8x128xf32>
    %cst_32 = arith.constant 1.000000e+00 : f32
    %66 = vector.broadcast %cst_32 : f32 to vector<8x128xf32>
    %67 = arith.addf %66, %65 : vector<8x128xf32>
    %68 = arith.divf %66, %67 : vector<8x128xf32>
    %69 = vector.extract_strided_slice %56 {offsets = [0, 256], sizes = [8, 128], strides = [1, 1]} : vector<8x512xf32> to vector<8x128xf32>
    %70 = math.tanh %69 : vector<8x128xf32>
    %71 = vector.extract_strided_slice %56 {offsets = [0, 384], sizes = [8, 128], strides = [1, 1]} : vector<8x512xf32> to vector<8x128xf32>
    %72 = arith.negf %71 : vector<8x128xf32>
    %73 = math.exp %72 : vector<8x128xf32>
    %cst_33 = arith.constant 1.000000e+00 : f32
    %74 = vector.broadcast %cst_33 : f32 to vector<8x128xf32>
    %75 = arith.addf %74, %73 : vector<8x128xf32>
    %76 = arith.divf %74, %75 : vector<8x128xf32>
    %77 = arith.mulf %68, %49 : vector<8x128xf32>
    %78 = arith.mulf %62, %70 : vector<8x128xf32>
    %79 = arith.addf %77, %78 : vector<8x128xf32>
    %80 = math.tanh %79 : vector<8x128xf32>
    %81 = arith.mulf %76, %80 : vector<8x128xf32>
    %c1_34 = arith.constant 1 : index
    %c0_35 = arith.constant 0 : index
    %c0_36 = arith.constant 0 : index
    %82 = vector.load %arg16[%c1_34, %c0_35, %c0_36] : memref<3x8x128xf32, #tpu.memory_space<vmem>>, vector<1x8x128xf32>
    %83 = vector.shape_cast %82 : vector<1x8x128xf32> to vector<8x128xf32>
    %84 = vector.shape_cast %81 : vector<8x128xf32> to vector<1x8x128xf32>
    tpu.vector_store %arg16[%c1_34, %c0_35, %c0_36], %84 {strides = array<i32>} : memref<3x8x128xf32, #tpu.memory_space<vmem>>, vector<1x8x128xf32>,
    %c1_37 = arith.constant 1 : index
    %c0_38 = arith.constant 0 : index
    %c0_39 = arith.constant 0 : index
    %85 = vector.load %arg17[%c1_37, %c0_38, %c0_39] : memref<3x8x128xf32, #tpu.memory_space<vmem>>, vector<1x8x128xf32>
    %86 = vector.shape_cast %85 : vector<1x8x128xf32> to vector<8x128xf32>
    %87 = vector.shape_cast %79 : vector<8x128xf32> to vector<1x8x128xf32>
    tpu.vector_store %arg17[%c1_37, %c0_38, %c0_39], %87 {strides = array<i32>} : memref<3x8x128xf32, #tpu.memory_space<vmem>>, vector<1x8x128xf32>,
    %c2 = arith.constant 2 : index
    %c0_40 = arith.constant 0 : index
    %c0_41 = arith.constant 0 : index
    %88 = vector.load %arg16[%c2, %c0_40, %c0_41] : memref<3x8x128xf32, #tpu.memory_space<vmem>>, vector<1x8x128xf32>
    %89 = vector.shape_cast %88 : vector<1x8x128xf32> to vector<8x128xf32>
    %c2_42 = arith.constant 2 : index
    %c0_43 = arith.constant 0 : index
    %c0_44 = arith.constant 0 : index
    %90 = vector.load %arg17[%c2_42, %c0_43, %c0_44] : memref<3x8x128xf32, #tpu.memory_space<vmem>>, vector<1x8x128xf32>
    %91 = vector.shape_cast %90 : vector<1x8x128xf32> to vector<8x128xf32>
    %92 = tpu.concatenate %81, %89 in 1 : vector<8x128xf32>, vector<8x128xf32> -> vector<8x256xf32>
    %93 = arith.truncf %92 : vector<8x256xf32> to vector<8x256xbf16>
    %c0_45 = arith.constant 0 : index
    %c0_46 = arith.constant 0 : index
    %94 = vector.load %arg8[%c0_45, %c0_46] : memref<256x512xbf16, #tpu.memory_space<vmem>>, vector<256x512xbf16>
    %cst_47 = arith.constant dense<0.000000e+00> : vector<8x512xf32>
    %95 = tpu.matmul %93, %94, %cst_47 {dimension_numbers = #tpu.dot_dimension_numbers<[1], [0], [0], [1], [0, 0, 1, 1], [], []>} : vector<8x256xbf16>, vector<256x512xbf16>, vector<8x512xf32> -> vector<8x512xf32>
    %c0_48 = arith.constant 0 : index
    %c0_49 = arith.constant 0 : index
    %96 = vector.load %arg9[%c0_48, %c0_49] : memref<1x512xf32, #tpu.memory_space<vmem>>, vector<1x512xf32>
    %97 = vector.broadcast %96 : vector<1x512xf32> to vector<8x512xf32>
    %98 = arith.addf %95, %97 : vector<8x512xf32>
    %99 = vector.extract_strided_slice %98 {offsets = [0, 0], sizes = [8, 128], strides = [1, 1]} : vector<8x512xf32> to vector<8x128xf32>
    %100 = arith.negf %99 : vector<8x128xf32>
    %101 = math.exp %100 : vector<8x128xf32>
    %cst_50 = arith.constant 1.000000e+00 : f32
    %102 = vector.broadcast %cst_50 : f32 to vector<8x128xf32>
    %103 = arith.addf %102, %101 : vector<8x128xf32>
    %104 = arith.divf %102, %103 : vector<8x128xf32>
    %105 = vector.extract_strided_slice %98 {offsets = [0, 128], sizes = [8, 128], strides = [1, 1]} : vector<8x512xf32> to vector<8x128xf32>
    %106 = arith.negf %105 : vector<8x128xf32>
    %107 = math.exp %106 : vector<8x128xf32>
    %cst_51 = arith.constant 1.000000e+00 : f32
    %108 = vector.broadcast %cst_51 : f32 to vector<8x128xf32>
    %109 = arith.addf %108, %107 : vector<8x128xf32>
    %110 = arith.divf %108, %109 : vector<8x128xf32>
    %111 = vector.extract_strided_slice %98 {offsets = [0, 256], sizes = [8, 128], strides = [1, 1]} : vector<8x512xf32> to vector<8x128xf32>
    %112 = math.tanh %111 : vector<8x128xf32>
    %113 = vector.extract_strided_slice %98 {offsets = [0, 384], sizes = [8, 128], strides = [1, 1]} : vector<8x512xf32> to vector<8x128xf32>
    %114 = arith.negf %113 : vector<8x128xf32>
    %115 = math.exp %114 : vector<8x128xf32>
    %cst_52 = arith.constant 1.000000e+00 : f32
    %116 = vector.broadcast %cst_52 : f32 to vector<8x128xf32>
    %117 = arith.addf %116, %115 : vector<8x128xf32>
    %118 = arith.divf %116, %117 : vector<8x128xf32>
    %119 = arith.mulf %110, %91 : vector<8x128xf32>
    %120 = arith.mulf %104, %112 : vector<8x128xf32>
    %121 = arith.addf %119, %120 : vector<8x128xf32>
    %122 = math.tanh %121 : vector<8x128xf32>
    %123 = arith.mulf %118, %122 : vector<8x128xf32>
    %c2_53 = arith.constant 2 : index
    %c0_54 = arith.constant 0 : index
    %c0_55 = arith.constant 0 : index
    %124 = vector.load %arg16[%c2_53, %c0_54, %c0_55] : memref<3x8x128xf32, #tpu.memory_space<vmem>>, vector<1x8x128xf32>
    %125 = vector.shape_cast %124 : vector<1x8x128xf32> to vector<8x128xf32>
    %126 = vector.shape_cast %123 : vector<8x128xf32> to vector<1x8x128xf32>
    tpu.vector_store %arg16[%c2_53, %c0_54, %c0_55], %126 {strides = array<i32>} : memref<3x8x128xf32, #tpu.memory_space<vmem>>, vector<1x8x128xf32>,
    %c2_56 = arith.constant 2 : index
    %c0_57 = arith.constant 0 : index
    %c0_58 = arith.constant 0 : index
    %127 = vector.load %arg17[%c2_56, %c0_57, %c0_58] : memref<3x8x128xf32, #tpu.memory_space<vmem>>, vector<1x8x128xf32>
    %128 = vector.shape_cast %127 : vector<1x8x128xf32> to vector<8x128xf32>
    %129 = vector.shape_cast %121 : vector<8x128xf32> to vector<1x8x128xf32>
    tpu.vector_store %arg17[%c2_56, %c0_57, %c0_58], %129 {strides = array<i32>} : memref<3x8x128xf32, #tpu.memory_space<vmem>>, vector<1x8x128xf32>,
    %130 = arith.truncf %123 : vector<8x128xf32> to vector<8x128xbf16>
    %c0_59 = arith.constant 0 : index
    %c0_60 = arith.constant 0 : index
    %131 = vector.load %arg10[%c0_59, %c0_60] : memref<128x256xbf16, #tpu.memory_space<vmem>>, vector<128x256xbf16>
    %cst_61 = arith.constant dense<0.000000e+00> : vector<8x256xf32>
    %132 = tpu.matmul %130, %131, %cst_61 {dimension_numbers = #tpu.dot_dimension_numbers<[1], [0], [0], [1], [0, 0, 1, 1], [], []>} : vector<8x128xbf16>, vector<128x256xbf16>, vector<8x256xf32> -> vector<8x256xf32>
    %c0_62 = arith.constant 0 : index
    %c0_63 = arith.constant 0 : index
    %133 = vector.load %arg11[%c0_62, %c0_63] : memref<1x256xf32, #tpu.memory_space<vmem>>, vector<1x256xf32>
    %134 = vector.broadcast %133 : vector<1x256xf32> to vector<8x256xf32>
    %135 = arith.addf %132, %134 : vector<8x256xf32>
    %136 = arith.negf %135 : vector<8x256xf32>
    %137 = math.exp %136 : vector<8x256xf32>
    %cst_64 = arith.constant 1.000000e+00 : f32
    %138 = vector.broadcast %cst_64 : f32 to vector<8x256xf32>
    %139 = arith.addf %138, %137 : vector<8x256xf32>
    %140 = arith.divf %138, %139 : vector<8x256xf32>
    %c0_65 = arith.constant 0 : index
    %c0_66 = arith.constant 0 : index
    %c0_67 = arith.constant 0 : index
    %141 = vector.load %arg12[%c0_65, %c0_66, %c0_67] : memref<1x8x256xf32, #tpu.memory_space<vmem>>, vector<1x8x256xf32>
    %142 = vector.shape_cast %141 : vector<1x8x256xf32> to vector<8x256xf32>
    %143 = vector.shape_cast %140 : vector<8x256xf32> to vector<1x8x256xf32>
    tpu.vector_store %arg12[%c0_65, %c0_66, %c0_67], %143 {strides = array<i32>} : memref<1x8x256xf32, #tpu.memory_space<vmem>>, vector<1x8x256xf32>,
    %c0_68 = arith.constant 0 : index
    %c0_69 = arith.constant 0 : index
    %144 = vector.load %arg15[%c0_68, %c0_69] : memref<8x256xf32, #tpu.memory_space<vmem>>, vector<8x256xf32>
    tpu.vector_store %arg15[%c0_68, %c0_69], %140 {strides = array<i32>} : memref<8x256xf32, #tpu.memory_space<vmem>>, vector<8x256xf32>,
    %c4_i32 = arith.constant 4 : i32
    %145 = arith.cmpi eq, %arg0, %c4_i32 : i32
    %146 = arith.extui %145 : i1 to i32
    %c0_i32_70 = arith.constant 0 : i32
    %147 = arith.cmpi ne, %146, %c0_i32_70 : i32
    scf.if %147 {
      %c0_71 = arith.constant 0 : index
      %c0_72 = arith.constant 0 : index
      %c0_73 = arith.constant 0 : index
      %148 = vector.load %arg16[%c0_71, %c0_72, %c0_73] : memref<3x8x128xf32, #tpu.memory_space<vmem>>, vector<3x8x128xf32>
      %c0_74 = arith.constant 0 : index
      %c0_75 = arith.constant 0 : index
      %c0_76 = arith.constant 0 : index
      %149 = vector.load %arg13[%c0_74, %c0_75, %c0_76] : memref<3x8x128xf32, #tpu.memory_space<vmem>>, vector<3x8x128xf32>
      tpu.vector_store %arg13[%c0_74, %c0_75, %c0_76], %148 {strides = array<i32>} : memref<3x8x128xf32, #tpu.memory_space<vmem>>, vector<3x8x128xf32>,
      %c0_77 = arith.constant 0 : index
      %c0_78 = arith.constant 0 : index
      %c0_79 = arith.constant 0 : index
      %150 = vector.load %arg17[%c0_77, %c0_78, %c0_79] : memref<3x8x128xf32, #tpu.memory_space<vmem>>, vector<3x8x128xf32>
      %c0_80 = arith.constant 0 : index
      %c0_81 = arith.constant 0 : index
      %c0_82 = arith.constant 0 : index
      %151 = vector.load %arg14[%c0_80, %c0_81, %c0_82] : memref<3x8x128xf32, #tpu.memory_space<vmem>>, vector<3x8x128xf32>
      tpu.vector_store %arg14[%c0_80, %c0_81, %c0_82], %150 {strides = array<i32>} : memref<3x8x128xf32, #tpu.memory_space<vmem>>, vector<3x8x128xf32>,
    } else {
    }
    return
  }
  func.func @transform_0(%arg0: i32) -> (i32, i32) {
    %c0_i32 = arith.constant 0 : i32
    %c0_i32_0 = arith.constant 0 : i32
    %c0_i32_1 = arith.constant 0 : i32
    return %c0_i32, %c0_i32_0 : i32, i32
  }
  func.func @transform_1(%arg0: i32) -> (i32, i32, i32) {
    %c0_i32 = arith.constant 0 : i32
    %c0_i32_0 = arith.constant 0 : i32
    %c0_i32_1 = arith.constant 0 : i32
    %c0_i32_2 = arith.constant 0 : i32
    return %c0_i32, %c0_i32_0, %c0_i32_1 : i32, i32, i32
  }
  func.func @transform_2(%arg0: i32) -> (i32, i32, i32) {
    %c0_i32 = arith.constant 0 : i32
    %c0_i32_0 = arith.constant 0 : i32
    %c0_i32_1 = arith.constant 0 : i32
    %c0_i32_2 = arith.constant 0 : i32
    return %c0_i32, %c0_i32_0, %c0_i32_1 : i32, i32, i32
  }
  func.func @transform_3(%arg0: i32) -> (i32, i32) {
    %c0_i32 = arith.constant 0 : i32
    %c0_i32_0 = arith.constant 0 : i32
    %c0_i32_1 = arith.constant 0 : i32
    return %c0_i32, %c0_i32_0 : i32, i32
  }
  func.func @transform_4(%arg0: i32) -> (i32, i32) {
    %c0_i32 = arith.constant 0 : i32
    %c0_i32_0 = arith.constant 0 : i32
    %c0_i32_1 = arith.constant 0 : i32
    return %c0_i32, %c0_i32_0 : i32, i32
  }
  func.func @transform_5(%arg0: i32) -> (i32, i32) {
    %c0_i32 = arith.constant 0 : i32
    %c0_i32_0 = arith.constant 0 : i32
    %c0_i32_1 = arith.constant 0 : i32
    return %c0_i32, %c0_i32_0 : i32, i32
  }
  func.func @transform_6(%arg0: i32) -> (i32, i32) {
    %c0_i32 = arith.constant 0 : i32
    %c0_i32_0 = arith.constant 0 : i32
    %c0_i32_1 = arith.constant 0 : i32
    return %c0_i32, %c0_i32_0 : i32, i32
  }
  func.func @transform_7(%arg0: i32) -> (i32, i32) {
    %c0_i32 = arith.constant 0 : i32
    %c0_i32_0 = arith.constant 0 : i32
    %c0_i32_1 = arith.constant 0 : i32
    return %c0_i32, %c0_i32_0 : i32, i32
  }
  func.func @transform_8(%arg0: i32) -> (i32, i32) {
    %c0_i32 = arith.constant 0 : i32
    %c0_i32_0 = arith.constant 0 : i32
    %c0_i32_1 = arith.constant 0 : i32
    return %c0_i32, %c0_i32_0 : i32, i32
  }
  func.func @transform_9(%arg0: i32) -> (i32, i32) {
    %c0_i32 = arith.constant 0 : i32
    %c0_i32_0 = arith.constant 0 : i32
    %c0_i32_1 = arith.constant 0 : i32
    return %c0_i32, %c0_i32_0 : i32, i32
  }
  func.func @transform_10(%arg0: i32) -> (i32, i32) {
    %c0_i32 = arith.constant 0 : i32
    %c0_i32_0 = arith.constant 0 : i32
    %c0_i32_1 = arith.constant 0 : i32
    return %c0_i32, %c0_i32_0 : i32, i32
  }
  func.func @transform_11(%arg0: i32) -> (i32, i32, i32) {
    %c0_i32 = arith.constant 0 : i32
    %c0_i32_0 = arith.constant 0 : i32
    %c0_i32_1 = arith.constant 0 : i32
    return %arg0, %c0_i32, %c0_i32_0 : i32, i32, i32
  }
  func.func @transform_12(%arg0: i32) -> (i32, i32, i32) {
    %c0_i32 = arith.constant 0 : i32
    %c0_i32_0 = arith.constant 0 : i32
    %c0_i32_1 = arith.constant 0 : i32
    %c0_i32_2 = arith.constant 0 : i32
    return %c0_i32, %c0_i32_0, %c0_i32_1 : i32, i32, i32
  }
  func.func @transform_13(%arg0: i32) -> (i32, i32, i32) {
    %c0_i32 = arith.constant 0 : i32
    %c0_i32_0 = arith.constant 0 : i32
    %c0_i32_1 = arith.constant 0 : i32
    %c0_i32_2 = arith.constant 0 : i32
    return %c0_i32, %c0_i32_0, %c0_i32_1 : i32, i32, i32
  }
}

</mosaic_0001>

<bundles_post_ra>
// kernel: seq2seq_forward.4
= control target key start
LH: loop header
LB: loop body
LE: loop exit
PB: predicated region body
PF: predicated region fallthrough
CT: control target
= control target key end

     0   :  { %s407_s0 = inlined_call_operand.vmem [shape: f32[8,128], index: 0, kind: input, shape index: {}]   ;;  %s408_s1 = inlined_call_operand.vmem [shape: f32[8,128], index: 1, kind: input, shape index: {}]   ;;  %s409_s2 = inlined_call_operand.vmem [shape: bf16[256,8], index: 2, kind: input, shape index: {}]   ;;  %s410_s3 = inlined_call_operand.vmem [shape: f32[1,8], index: 3, kind: input, shape index: {}]   ;;  %s411_s4 = inlined_call_operand.hbm [shape: f32[8,8], index: 4, kind: output, shape index: {}]  }
   0x1   :  { %v265_v0 = vld [vmem:[%s409_s2 + $0x40] sm:$0xff]   ;;  %v267_v2 = vld [vmem:[%s409_s2 + $0x48] sm:$0xff]   ;;  %v269_v4 = vld [vmem:[%s409_s2 + $0x50] sm:$0xff]  }
   0x2   :  { %v266_v1 = vld [vmem:[%s409_s2] sm:$0xff]   ;;  %242 = vmatprep.subr.bf16.mxu0 %v265_v0  ;;  %v268_v3 = vld [vmem:[%s409_s2 + $0x8] sm:$0xff]   ;;  %v270_v5 = vld [vmem:[%s409_s2 + $0x10] sm:$0xff]  }
   0x3   :  { %243 = vmatpush3.bf16.msra.mxu0 %v266_v1  ;;  %v271_v6 = vld [vmem:[%s409_s2 + $0x58] sm:$0xff]   ;;  %v273_v8 = vld [vmem:[%s409_s2 + $0x60] sm:$0xff]   ;;  %v275_v10 = vld [vmem:[%s409_s2 + $0x68] sm:$0xff]  }
   0x4   :  { %244 = vmatprep.subr.bf16.mxu0 %v267_v2  ;;  %v272_v7 = vld [vmem:[%s409_s2 + $0x18] sm:$0xff]   ;;  %v274_v9 = vld [vmem:[%s409_s2 + $0x20] sm:$0xff]  }
   0x5   :  { %v20_v11 = vld [vmem:[%s408_s1] sm:$0xff] }
   0x7   :  { %245 = vmatpush3.bf16.msra.mxu0 %v268_v3 }
   0x8   :  { %246 = vmatprep.subr.bf16.mxu0 %v269_v4 }
   0xb   :  { %247 = vmatpush3.bf16.msra.mxu0 %v270_v5 }
   0xc   :  { %248 = vmatprep.subr.bf16.mxu0 %v271_v6 }
   0xf   :  { %249 = vmatpush3.bf16.msra.mxu0 %v272_v7 }
  0x10   :  { %250 = vmatprep.subr.bf16.mxu0 %v273_v8 }
  0x11   :  { %9 = vsyncpa [#allocation3], 0  ;;  %v22_v12 = vpack.c.bf16 %v20_v11, %v20_v11  ;;  %v276_v13 = vld [vmem:[%s409_s2 + $0x28] sm:$0xff]   ;;  %v277_v14 = vld [vmem:[%s409_s2 + $0x70] sm:$0xff]   ;;  %vm198_vm0 = vcmask 64512  }
  0x12   :  { %v278_v15 = vld [vmem:[%s409_s2 + $0x30] sm:$0xff]   ;;  %v279_v16 = vld [vmem:[%s409_s2 + $0x78] sm:$0xff]   ;;  %v19_v18 = vld [vmem:[%s407_s0] sm:$0xff]  ;;  %s309_s0 = smov [#allocation2]  }
  0x13   :  { %251 = vmatpush3.bf16.msra.mxu0 %v274_v9  ;;  %190 = vmatprep.mubr.bf16.mxu0 %v22_v12  ;;  %v280_v17 = vld [vmem:[%s409_s2 + $0x38] sm:$0xff]   ;;  %v21_v19 = vpack.c.bf16 %v19_v18, %v19_v18  ;;  %v225_v22 = vld [vmem:[%s410_s3] ss:$0 sm:$0xff]  ;;  %s217_s2 = sshll.u32 %s309_s0, 4  ;;  %s218_s2 = int_to_ptr.vmem [resolvable:$true] %s217_s2 }
  0x14   :  { %252 = vmatprep.subr.bf16.mxu0 %v275_v10  ;;  %s285_s3 = scalar_lea.vmem %s218_s2, 128  ;;  %p290_p1 = scmp.lt.s32.totalorder %s218_s2, %s218_s2 }
  0x15   :  { %p286_p0 = scmp.ne.s32.totalorder %s218_s2, %s285_s3  ;;  %p291_p2 = scmp.lt.s32.totalorder %s285_s3, %s285_s3 }
  0x17   :  { %253 = vmatpush3.bf16.msra.mxu0 %v276_v13  ;;  %p292_p3 = por %p291_p2, %p290_p1 }
  0x18   :  { %254 = vmatprep.subr.bf16.mxu0 %v277_v14 }
  0x19   :  { %p293_p4 = pnand %p292_p3, %p286_p0 }
  0x1b   :  { %255 = vmatpush3.bf16.msra.mxu0 %v278_v15 }
  0x1c   :  { %256 = vmatprep.subr.bf16.mxu0 %v279_v16 }
  0x1f   :  { %257 = vmatpush3.bf16.msra.mxu0 %v280_v17 }
  0x22   :  { %191 = vmatmul.mubr.bf16.vlgmr.msra.gmra.mrb[0].mxu0 %v21_v19 }
  0xf5   :  { %v258_v20 = vpop.f32.mrb[0].mxu0 }
  0xf6   :  { %v259_v21 = vpop.f32.mrb[1].mxu0 }
  0xf7   :  { %v260_v23 = vadd.f32 %v259_v21, %v258_v20  ;;  %v261_v24 = vpop.f32.mrb[2].mxu0 }
  0xf8   :  { %v262_v25 = vpop.f32.mrb[3].mxu0 }
  0xf9   :  { %v193_v26 = vadd.f32 %v260_v23, %v225_v22 }
  0xfb   :  { %v199_v27 = vsel %vm198_vm0, %v193_v26, -inf }
  0xfc   :  { %200 = vmax.xlane.f32.xlu0 %v199_v27 }
 0x189   :  { %v201_v28 = vpop.xlane.xlu0 %200 }
 0x18a   :  { %v202_v29 = vsub.f32 %v193_v26, %v201_v28 }
 0x18c   :  { %v203_v30 = vmul.f32 1.442695, %v202_v29 }
 0x18e   :  { %281 = vpow2.f32 %v203_v30 }
 0x198   :  { %v282_v31 = vpop.eup %281 }
 0x199   :  { %v205_v32 = vsel %vm198_vm0, %v282_v31, 0.0 }
 0x19a   :  { %206 = vadd.xlane.f32.xlu0 %v205_v32 }
 0x227   :  { %v207_v33 = vpop.xlane.xlu0 %206 }
 0x228   :  { %283 = vrcp.f32 %v207_v33 }
 0x232   :  { %v284_v34 = vpop.eup %283 }
 0x233   :  { %v209_v35 = vmul.f32 %v284_v34, %v282_v31 }
 0x235   :  { %210 = vst.msk [vmem:[#allocation2] sm:$0xff] %vm198_vm0, %v209_v35 }
 0x236   :  { %296 = shalt.err (!%p293_p4)
}
 0x237   :  { %s297_s28 = scalar_lea.hbm %s411_s4, 128 }
 0x238   :  { %p298_p5 = scmp.ne.s32.totalorder %s411_s4, %s297_s28  ;;  %p301_p6 = scmp.lt.u32.totalorder %s297_s28, %s411_s4 }
 0x23a   :  { %p303_p7 = pnand %p301_p6, %p298_p5 }
 0x23c   :  { %306 = shalt.err (!%p303_p7)
}
 0x23d   :  { %220 = dma.vmem_to_hbm [thread:$0]  %s218_s2, 128, %s411_s4, [#allocation3]  }
 0x23e   :  { %307 = dma.done.wait [#allocation3], 128  }
 0x23f   :  { %308 = vsyncadd [#allocation3], 4294967168 }
 0x240   :  { %224 = vsyncpa [#allocation3], 1 }

// kernel: seq2seq_forward.3
= control target key start
LH: loop header
LB: loop body
LE: loop exit
PB: predicated region body
PF: predicated region fallthrough
CT: control target
= control target key end

     0   :  { %14 = vsyncpa [#allocation5], 0  ;;  %s3280_s0 = inlined_call_operand.vmem [shape: f32[8,8,256], index: 0, kind: input, shape index: {}]   ;;  %s3281_s1 = inlined_call_operand.hbm [shape: bf16[384,512], index: 1, kind: input, shape index: {}]   ;;  %s3282_s2 = inlined_call_operand.vmem [shape: f32[1,512], index: 2, kind: input, shape index: {}]   ;;  %s3283_s3 = inlined_call_operand.hbm [shape: bf16[256,512], index: 3, kind: input, shape index: {}]   ;;  %s3284_s4 = inlined_call_operand.vmem [shape: f32[1,512], index: 4, kind: input, shape index: {}]   ;;  %s3285_s5 = inlined_call_operand.hbm [shape: bf16[256,512], index: 5, kind: input, shape index: {}]   ;;  %s3286_s6 = inlined_call_operand.vmem [shape: f32[1,512], index: 6, kind: input, shape index: {}]   ;;  %s3287_s7 = inlined_call_operand.vmem [shape: f32[3,8,128], index: 7, kind: output, shape index: {0}]   ;;  %s3288_s8 = inlined_call_operand.vmem [shape: f32[3,8,128], index: 8, kind: output, shape index: {1}]  }
   0x1   :  { %15 = vsyncpa [#allocation7], 0  ;;  %s3101_s27 = smov 0  }
   0x2 LB: > { %s3107_s28 = sadd.s32 4294967295, %s3047_s27   ;;  %p2261_p0 = scmp.ge.s32.totalorder %s3047_s27, 1  ;;  %s3047_s27 = sphi %s3101_s27, %s21_s27  }
   0x3   : > { %p220_p1 = scmp.lt.s32.totalorder %s3047_s27, 9  ;;  %p3289_p3 = scmp.eq.s32.totalorder %s3107_s28, 0 }
   0x4   : > { %s3049_s30 = smov [#allocation6]   ;;  %s3050_s10 = smov [#allocation4]  }
   0x5   : > { %p3113_p4 = pnand %p2261_p0, %p220_p1  ;;  %s248_s9 = sshll.u32 %s3049_s30, 4  ;;  %s249_s9 = int_to_ptr.vmem [resolvable:$true] %s248_s9 }
   0x6   : > { %s232_s11 = sshll.u32 %s3050_s10, 4  ;;  %s3051_s13 = smov [#allocation8]   ;;  %s3125_s11 = int_to_ptr.vmem [resolvable:$true] %s232_s11 }
   0x7   : > { %s3291_s29 = scalar_select %p3113_p4, 1, 0 }
   0x8   : > { %p2534_p5 = pneg %p3113_p4  ;;  %s264_s14 = sshll.u32 %s3051_s13, 4  ;;  %s3127_s14 = int_to_ptr.vmem [resolvable:$true] %s264_s14 }
   0x9   : > { %s2949_s17 = scalar_lea.hbm %s3283_s3, 8192 }
   0xa   : > { %p3121_p6 = pnand %p3289_p3, %p2534_p5  ;;  %p2950_p7 = scmp.ne.s32.totalorder %s3283_s3, %s2949_s17 }
   0xb   : > { %p2956_p11 = scmp.lt.u32.totalorder %s2949_s17, %s3283_s3 }
   0xc   : > { %p3137_p8 = pneg %p3121_p6 }
   0xe   : > { %p2952_p9 = pnand %p3137_p8, %p2950_p7 }
  0x10   : > { %p2953_p10 = pneg %p2952_p9 }
  0x12   : > { %p2958_p12 = pnand %p2956_p11, %p2953_p10 }
  0x14   : > { %2961 = shalt.err (!%p2958_p12)
}
  0x15   : > { %s2962_s23 = scalar_lea.vmem %s249_s9, 8192  ;;  %p2970_p5 = scmp.lt.s32.totalorder %s249_s9, %s249_s9 }
  0x16   : > { %p2963_p13 = scmp.ne.s32.totalorder %s249_s9, %s2962_s23  ;;  %p2971_p2 = scmp.lt.s32.totalorder %s2962_s23, %s2962_s23 }
  0x18   : > { %p2965_p0 = pnand %p2963_p13, %p3137_p8  ;;  %p2972_p3 = por %p2971_p2, %p2970_p5 }
  0x1a   : > { %p2966_p1 = pneg %p2965_p0 }
  0x1c   : > { %p2973_p4 = pnand %p2972_p3, %p2966_p1 }
  0x1e   : > { %2976 = shalt.err (!%p2973_p4)
}
  0x1f   : > { %s3052_s24 = smov 256   ;;  %s3053_s25 = smov 16  }
  0x20   : > { %2540 = dma.hbm_to_vmem [thread:$0]  (!%p3121_p6), %s3283_s3, 8192, %s249_s9, [#allocation7], %s3052_s24, %s3052_s24, %s3053_s25  }
  0x21   : > { %s2977_s15 = scalar_lea.hbm %s3281_s1, 12288 }
  0x22   : > { %p2978_p2 = scmp.ne.s32.totalorder %s3281_s1, %s2977_s15  ;;  %p2984_p7 = scmp.lt.u32.totalorder %s2977_s15, %s3281_s1 }
  0x24   : > { %p2980_p3 = pnand %p2978_p2, %p3137_p8 }
  0x26   : > { %p2981_p4 = pneg %p2980_p3 }
  0x28   : > { %p2986_p9 = pnand %p2984_p7, %p2981_p4 }
  0x2a   : > { %2989 = shalt.err (!%p2986_p9)
}
  0x2b   : > { %s2990_s9 = scalar_lea.vmem %s3125_s11, 12288  ;;  %p2998_p13 = scmp.lt.s32.totalorder %s3125_s11, %s3125_s11 }
  0x2c   : > { %p2991_p10 = scmp.ne.s32.totalorder %s3125_s11, %s2990_s9  ;;  %p2999_p0 = scmp.lt.s32.totalorder %s2990_s9, %s2990_s9 }
  0x2e   : > { %p2993_p11 = pnand %p2991_p10, %p3137_p8  ;;  %p3000_p1 = por %p2999_p0, %p2998_p13 }
  0x30   : > { %p2994_p12 = pneg %p2993_p11 }
  0x32   : > { %p3001_p5 = pnand %p3000_p1, %p2994_p12 }
  0x34   : > { %3004 = shalt.err (!%p3001_p5)
}
  0x35   : > { %2537 = dma.hbm_to_vmem [thread:$0]  (!%p3121_p6), %s3281_s1, 12288, %s3125_s11, [#allocation5], %s3052_s24, %s3052_s24, %s3053_s25  }
  0x36   : > { %s3005_s30 = scalar_lea.hbm %s3285_s5, 8192 }
  0x37   : > { %p3006_p2 = scmp.ne.s32.totalorder %s3285_s5, %s3005_s30  ;;  %p3012_p7 = scmp.lt.u32.totalorder %s3005_s30, %s3285_s5 }
  0x39   : > { %p3008_p3 = pnand %p3006_p2, %p3137_p8 }
  0x3b   : > { %p3009_p4 = pneg %p3008_p3 }
  0x3d   : > { %p3014_p9 = pnand %p3012_p7, %p3009_p4 }
  0x3f   : > { %3017 = shalt.err (!%p3014_p9)
}
  0x40   : > { %s3018_s11 = scalar_lea.vmem %s3127_s14, 8192  ;;  %p3026_p13 = scmp.lt.s32.totalorder %s3127_s14, %s3127_s14 }
  0x41   : > { %p3019_p10 = scmp.ne.s32.totalorder %s3127_s14, %s3018_s11  ;;  %p3027_p0 = scmp.lt.s32.totalorder %s3018_s11, %s3018_s11 }
  0x43   : > { %p3021_p11 = pnand %p3019_p10, %p3137_p8  ;;  %p3028_p1 = por %p3027_p0, %p3026_p13 }
  0x45   : > { %p3022_p12 = pneg %p3021_p11 }
  0x47   : > { %p3029_p5 = pnand %p3028_p1, %p3022_p12 }
  0x49   : > { %3032 = shalt.err (!%p3029_p5)
}
  0x4a   : > { %2543 = dma.hbm_to_vmem [thread:$0]  (!%p3121_p6), %s3285_s5, 8192, %s3127_s14, [#allocation7], %s3052_s24, %s3052_s24, %s3053_s25  }
  0x4b   : > { %p3294_p2 = scmp.ne.s32.totalorder %s3291_s29, 0 }
  0x4c   : > { %p3295_p8 = scmp.eq.s32.totalorder (!%p3294_p2), %s3107_s28, 0 }
  0x4d   : > { %291 = sbr.rel (%p3294_p2) target bundleno = 983 (0x3d7), region = 48 }
  0x54   : > { %3038 = dma.done.wait (%p3295_p8), [#allocation5], 12288   ;;  %p3296_p3 = pmov %p3295_p8 }
  0x56   : > { %3040 = vsyncadd (%p3296_p3), [#allocation5], 4294955008  ;;  %p3297_p4 = pmov %p3296_p3 }
  0x57   : > { %p3298_p7 = pmov %p3296_p3 }
  0x58   : > { %3042 = dma.done.wait (%p3297_p4), [#allocation7], 16384  }
  0x59   : > { %3044 = vsyncadd (%p3298_p7), [#allocation7], 4294950912  ;;  %p328_p9 = scmp.lt.s32.totalorder %s3107_s28, 7  ;;  %p3299_p6 = scmp.ne.s32.totalorder %s3107_s28, 0 }
  0x5a   : > { %v3054_v0 = vmov (!%p3299_p6), 0.0  }
  0x5b   : > { %s329_s12 = scalar_select %p328_p9, %s3107_s28, 7 }
  0x5c   : > { %337 = sbr.rel (%p3299_p6) target bundleno = 99 (0x63), region = 64  ;;  %338 = vst [vmem:[#allocation2] sm:$0xff] (!%p3299_p6), %v3054_v0  ;;  %339 = vst [vmem:[#allocation2 + $0x8] sm:$0xff] (!%p3299_p6), %v3054_v0 }
  0x5d   : > { %s2509_s14 = sshll.u32 %s329_s12, 4  ;;  %340 = vst [vmem:[#allocation2 + $0x10] sm:$0xff] (!%p3299_p6), %v3054_v0  ;;  %341 = vst [vmem:[#allocation3] sm:$0xff] (!%p3299_p6), %v3054_v0 }
  0x5e   : > { %s3223_s24 = scalar_lea.vmem %s3280_s0, %s2509_s14  ;;  %342 = vst [vmem:[#allocation3 + $0x8] sm:$0xff] (!%p3299_p6), %v3054_v0  ;;  %343 = vst [vmem:[#allocation3 + $0x10] sm:$0xff] (!%p3299_p6), %v3054_v0 }
  0x63 PF: > { %v2565_v1 = vld [vmem:[#allocation4 + $0x4] ss:$16 sps:$4 sm:$0xff]   ;;  %v2567_v2 = vld [vmem:[#allocation4 + $0xc] ss:$16 sps:$4 sm:$0xff]   ;;  %v2569_v3 = vld [vmem:[#allocation4] ss:$16 sps:$4 sm:$0xff]  }
  0x64   : > { %949 = vmatprep.subr.bf16.mxu0 %v2565_v1  ;;  %v2570_v4 = vld [vmem:[#allocation4 + $0x8] ss:$16 sps:$4 sm:$0xff]   ;;  %1031 = vmatprep.subr.bf16.mxu1 %v2567_v2  ;;  %v2571_v5 = vld [vmem:[#allocation4 + $0x24] ss:$16 sps:$4 sm:$0xff]   ;;  %v2573_v6 = vld [vmem:[#allocation4 + $0x2c] ss:$16 sps:$4 sm:$0xff]  }
  0x65   : > { %950 = vmatpush1.bf16.msra.mxu0 %v2569_v3  ;;  %1032 = vmatpush1.bf16.msra.mxu1 %v2570_v4  ;;  %v2575_v7 = vld [vmem:[#allocation4 + $0x20] ss:$16 sps:$4 sm:$0xff]   ;;  %v2576_v8 = vld [vmem:[#allocation4 + $0x28] ss:$16 sps:$4 sm:$0xff]   ;;  %v2577_v9 = vld [vmem:[#allocation4 + $0x44] ss:$16 sps:$4 sm:$0xff]  }
  0x66   : > { %951 = vmatprep.subr.bf16.mxu0 %v2571_v5  ;;  %1033 = vmatprep.subr.bf16.mxu1 %v2573_v6  ;;  %v2579_v10 = vld [vmem:[#allocation4 + $0x4c] ss:$16 sps:$4 sm:$0xff]   ;;  %v2581_v11 = vld [vmem:[#allocation4 + $0x40] ss:$16 sps:$4 sm:$0xff]   ;;  %v2582_v12 = vld [vmem:[#allocation4 + $0x48] ss:$16 sps:$4 sm:$0xff]  }
  0x67   : > { %v2583_v13 = vld [vmem:[#allocation4 + $0x64] ss:$16 sps:$4 sm:$0xff]   ;;  %v2585_v14 = vld [vmem:[#allocation4 + $0x6c] ss:$16 sps:$4 sm:$0xff]   ;;  %v2587_v15 = vld [vmem:[#allocation4 + $0x60] ss:$16 sps:$4 sm:$0xff]  }
  0x68   : > { %v2588_v16 = vld [vmem:[#allocation4 + $0x68] ss:$16 sps:$4 sm:$0xff]   ;;  %v2589_v17 = vld [vmem:[#allocation4 + $0x84] ss:$16 sps:$4 sm:$0xff]   ;;  %v2591_v18 = vld [vmem:[#allocation4 + $0x8c] ss:$16 sps:$4 sm:$0xff]  }
  0x69   : > { %952 = vmatpush1.bf16.msra.mxu0 %v2575_v7  ;;  %1034 = vmatpush1.bf16.msra.mxu1 %v2576_v8  ;;  %v2593_v19 = vld [vmem:[#allocation4 + $0x80] ss:$16 sps:$4 sm:$0xff]   ;;  %v2594_v20 = vld [vmem:[#allocation4 + $0x88] ss:$16 sps:$4 sm:$0xff]   ;;  %v2595_v21 = vld [vmem:[#allocation4 + $0xa4] ss:$16 sps:$4 sm:$0xff]  }
  0x6a   : > { %953 = vmatprep.subr.bf16.mxu0 %v2577_v9  ;;  %1035 = vmatprep.subr.bf16.mxu1 %v2579_v10  ;;  %v2597_v22 = vld [vmem:[#allocation4 + $0xac] ss:$16 sps:$4 sm:$0xff]   ;;  %v2599_v23 = vld [vmem:[#allocation4 + $0xa0] ss:$16 sps:$4 sm:$0xff]   ;;  %v2600_v24 = vld [vmem:[#allocation4 + $0xa8] ss:$16 sps:$4 sm:$0xff]  }
  0x6b   : > { %v2601_v25 = vld [vmem:[#allocation4 + $0xc4] ss:$16 sps:$4 sm:$0xff]   ;;  %v2603_v26 = vld [vmem:[#allocation4 + $0xcc] ss:$16 sps:$4 sm:$0xff]   ;;  %v2605_v27 = vld [vmem:[#allocation4 + $0xc0] ss:$16 sps:$4 sm:$0xff]  }
  0x6c   : > { %v2606_v28 = vld [vmem:[#allocation4 + $0xc8] ss:$16 sps:$4 sm:$0xff]   ;;  %v2607_v29 = vld [vmem:[#allocation4 + $0xe4] ss:$16 sps:$4 sm:$0xff]   ;;  %v2609_v30 = vld [vmem:[#allocation4 + $0xec] ss:$16 sps:$4 sm:$0xff]  }
  0x6d   : > { %954 = vmatpush1.bf16.msra.mxu0 %v2581_v11  ;;  %1036 = vmatpush1.bf16.msra.mxu1 %v2582_v12  ;;  %v2611_v31 = vld [vmem:[#allocation4 + $0xe0] ss:$16 sps:$4 sm:$0xff]   ;;  %v2612_v32 = vld [vmem:[#allocation4 + $0xe8] ss:$16 sps:$4 sm:$0xff]   ;;  %v2613_v33 = vld [vmem:[#allocation4 + $0x104] ss:$16 sps:$4 sm:$0xff]  }
  0x6e   : > { %955 = vmatprep.subr.bf16.mxu0 %v2583_v13  ;;  %1037 = vmatprep.subr.bf16.mxu1 %v2585_v14  ;;  %v2615_v34 = vld [vmem:[#allocation4 + $0x10c] ss:$16 sps:$4 sm:$0xff]   ;;  %v2617_v35 = vld [vmem:[#allocation4 + $0x100] ss:$16 sps:$4 sm:$0xff]   ;;  %v2618_v36 = vld [vmem:[#allocation4 + $0x108] ss:$16 sps:$4 sm:$0xff]  }
  0x6f   : > { %v2619_v37 = vld [vmem:[#allocation4 + $0x124] ss:$16 sps:$4 sm:$0xff]   ;;  %v2621_v38 = vld [vmem:[#allocation4 + $0x12c] ss:$16 sps:$4 sm:$0xff]   ;;  %v2623_v39 = vld [vmem:[#allocation4 + $0x120] ss:$16 sps:$4 sm:$0xff]  }
  0x70   : > { %v2624_v40 = vld [vmem:[#allocation4 + $0x128] ss:$16 sps:$4 sm:$0xff]   ;;  %v2625_v41 = vld [vmem:[#allocation4 + $0x144] ss:$16 sps:$4 sm:$0xff]   ;;  %v2627_v42 = vld [vmem:[#allocation4 + $0x14c] ss:$16 sps:$4 sm:$0xff]  }
  0x71   : > { %956 = vmatpush1.bf16.msra.mxu0 %v2587_v15  ;;  %1038 = vmatpush1.bf16.msra.mxu1 %v2588_v16  ;;  %v2629_v43 = vld [vmem:[#allocation4 + $0x140] ss:$16 sps:$4 sm:$0xff]   ;;  %v2630_v44 = vld [vmem:[#allocation4 + $0x148] ss:$16 sps:$4 sm:$0xff]   ;;  %v2631_v45 = vld [vmem:[#allocation4 + $0x164] ss:$16 sps:$4 sm:$0xff]  }
  0x72   : > { %957 = vmatprep.subr.bf16.mxu0 %v2589_v17  ;;  %1039 = vmatprep.subr.bf16.mxu1 %v2591_v18  ;;  %v2633_v46 = vld [vmem:[#allocation4 + $0x16c] ss:$16 sps:$4 sm:$0xff]   ;;  %v2635_v48 = vld [vmem:[#allocation4 + $0x160] ss:$16 sps:$4 sm:$0xff]   ;;  %v2636_v50 = vld [vmem:[#allocation4 + $0x168] ss:$16 sps:$4 sm:$0xff]  }
  0x73   : > { %v345_v47 = vld [vmem:[%s3223_s24 + $0x8] sm:$0xff]  ;;  %v2637_v51 = vld [vmem:[#allocation4 + $0x184] ss:$16 sps:$4 sm:$0xff]   ;;  %v2641_v53 = vld [vmem:[#allocation4 + $0x180] ss:$16 sps:$4 sm:$0xff]   ;;  %v3055_v15 = vmov 0  }
  0x74   : > { %v349_v49 = vpack.c.bf16 %v345_v47, %v345_v47  ;;  %v2639_v52 = vld [vmem:[#allocation4 + $0x18c] ss:$16 sps:$4 sm:$0xff]   ;;  %v2642_v54 = vld [vmem:[#allocation4 + $0x188] ss:$16 sps:$4 sm:$0xff]   ;;  %v2643_v55 = vld [vmem:[#allocation4 + $0x1a4] ss:$16 sps:$4 sm:$0xff]  }
  0x75   : > { %958 = vmatpush1.bf16.msra.mxu0 %v2593_v19  ;;  %1040 = vmatpush1.bf16.msra.mxu1 %v2594_v20  ;;  %v2645_v56 = vld [vmem:[#allocation4 + $0x1ac] ss:$16 sps:$4 sm:$0xff]   ;;  %v2647_v57 = vld [vmem:[#allocation4 + $0x1a0] ss:$16 sps:$4 sm:$0xff]   ;;  %v2648_v58 = vld [vmem:[#allocation4 + $0x1a8] ss:$16 sps:$4 sm:$0xff]  }
  0x76   : > { %959 = vmatprep.subr.bf16.mxu0 %v2595_v21  ;;  %1041 = vmatprep.subr.bf16.mxu1 %v2597_v22  ;;  %v2649_v59 = vld [vmem:[#allocation4 + $0x1c4] ss:$16 sps:$4 sm:$0xff]   ;;  %v2651_v60 = vld [vmem:[#allocation4 + $0x1cc] ss:$16 sps:$4 sm:$0xff]   ;;  %v2653_v61 = vld [vmem:[#allocation4 + $0x1c0] ss:$16 sps:$4 sm:$0xff]  }
  0x77   : > { %981 = vmatprep.mubr.bf16.mxu0 %v349_v49  ;;  %1063 = vmatprep.mubr.bf16.mxu1 %v349_v49  ;;  %v2654_v62 = vld [vmem:[#allocation4 + $0x1c8] ss:$16 sps:$4 sm:$0xff]   ;;  %v2655_v63 = vld [vmem:[#allocation4 + $0x1e4] ss:$16 sps:$4 sm:$0xff]   ;;  %v2657_v0 = vld [vmem:[#allocation4 + $0x1ec] ss:$16 sps:$4 sm:$0xff]  }
  0x78   : > { %v2659_v1 = vld [vmem:[#allocation4 + $0x1e0] ss:$16 sps:$4 sm:$0xff]   ;;  %v2660_v2 = vld [vmem:[#allocation4 + $0x1e8] ss:$16 sps:$4 sm:$0xff]   ;;  %v2663_v4 = vld [vmem:[#allocation4 + $0x204] ss:$16 sps:$4 sm:$0xff]  }
  0x79   : > { %960 = vmatpush1.bf16.msra.mxu0 %v2599_v23  ;;  %1042 = vmatpush1.bf16.msra.mxu1 %v2600_v24  ;;  %v344_v3 = vld [vmem:[%s3223_s24] sm:$0xff]  ;;  %v2666_v5 = vld [vmem:[#allocation4 + $0x20c] ss:$16 sps:$4 sm:$0xff]   ;;  %v2664_v8 = vld [vmem:[#allocation4 + $0x208] ss:$16 sps:$4 sm:$0xff]   ;;  %p2506_p10 = scmp.ne.s32.totalorder %s3107_s28, 7 }
  0x7a   : > { %961 = vmatprep.subr.bf16.mxu0 %v2601_v25  ;;  %1043 = vmatprep.subr.bf16.mxu1 %v2603_v26  ;;  %v348_v6 = vpack.c.bf16 %v344_v3, %v344_v3  ;;  %v2661_v7 = vld [vmem:[#allocation4 + $0x200] ss:$16 sps:$4 sm:$0xff]   ;;  %v2669_v9 = vld [vmem:[#allocation4 + $0x224] ss:$16 sps:$4 sm:$0xff]   ;;  %v2672_v10 = vld [vmem:[#allocation4 + $0x22c] ss:$16 sps:$4 sm:$0xff]  }
  0x7b   : > { %v2667_v11 = vld [vmem:[#allocation4 + $0x220] ss:$16 sps:$4 sm:$0xff]   ;;  %v2670_v12 = vld [vmem:[#allocation4 + $0x228] ss:$16 sps:$4 sm:$0xff]   ;;  %v2675_v13 = vld [vmem:[#allocation4 + $0x244] ss:$16 sps:$4 sm:$0xff]  }
  0x7c   : > { %v2678_v14 = vld [vmem:[#allocation4 + $0x24c] ss:$16 sps:$4 sm:$0xff]   ;;  %v2673_v16 = vld [vmem:[#allocation4 + $0x240] ss:$16 sps:$4 sm:$0xff]   ;;  %v2676_v17 = vld [vmem:[#allocation4 + $0x248] ss:$16 sps:$4 sm:$0xff]  }
  0x7d   : > { %962 = vmatpush1.bf16.msra.mxu0 %v2605_v27  ;;  %1044 = vmatpush1.bf16.msra.mxu1 %v2606_v28  ;;  %v2681_v18 = vld [vmem:[#allocation4 + $0x264] ss:$16 sps:$4 sm:$0xff]   ;;  %v2684_v19 = vld [vmem:[#allocation4 + $0x26c] ss:$16 sps:$4 sm:$0xff]   ;;  %v2679_v20 = vld [vmem:[#allocation4 + $0x260] ss:$16 sps:$4 sm:$0xff]  }
  0x7e   : > { %963 = vmatprep.subr.bf16.mxu0 %v2607_v29  ;;  %1045 = vmatprep.subr.bf16.mxu1 %v2609_v30  ;;  %v2682_v21 = vld [vmem:[#allocation4 + $0x268] ss:$16 sps:$4 sm:$0xff]   ;;  %v2687_v22 = vld [vmem:[#allocation4 + $0x284] ss:$16 sps:$4 sm:$0xff]   ;;  %v2690_v23 = vld [vmem:[#allocation4 + $0x28c] ss:$16 sps:$4 sm:$0xff]  }
  0x7f   : > { %v2685_v24 = vld [vmem:[#allocation4 + $0x280] ss:$16 sps:$4 sm:$0xff]   ;;  %v2688_v25 = vld [vmem:[#allocation4 + $0x288] ss:$16 sps:$4 sm:$0xff]   ;;  %v2693_v26 = vld [vmem:[#allocation4 + $0x2a4] ss:$16 sps:$4 sm:$0xff]  }
  0x80   : > { %v2696_v27 = vld [vmem:[#allocation4 + $0x2ac] ss:$16 sps:$4 sm:$0xff]   ;;  %v2691_v28 = vld [vmem:[#allocation4 + $0x2a0] ss:$16 sps:$4 sm:$0xff]   ;;  %v2694_v29 = vld [vmem:[#allocation4 + $0x2a8] ss:$16 sps:$4 sm:$0xff]  }
  0x81   : > { %964 = vmatpush1.bf16.msra.mxu0 %v2611_v31  ;;  %1046 = vmatpush1.bf16.msra.mxu1 %v2612_v32  ;;  %v2699_v30 = vld [vmem:[#allocation4 + $0x2c4] ss:$16 sps:$4 sm:$0xff]   ;;  %v2702_v31 = vld [vmem:[#allocation4 + $0x2cc] ss:$16 sps:$4 sm:$0xff]   ;;  %v2697_v32 = vld [vmem:[#allocation4 + $0x2c0] ss:$16 sps:$4 sm:$0xff]  }
  0x82   : > { %965 = vmatprep.subr.bf16.mxu0 %v2613_v33  ;;  %1047 = vmatprep.subr.bf16.mxu1 %v2615_v34  ;;  %v2700_v33 = vld [vmem:[#allocation4 + $0x2c8] ss:$16 sps:$4 sm:$0xff]   ;;  %v2705_v34 = vld [vmem:[#allocation4 + $0x2e4] ss:$16 sps:$4 sm:$0xff]   ;;  %v2726_v49 = vld [vmem:[#allocation6 + $0x4c] ss:$16 sps:$4 sm:$0xff]  }
  0x83   : > { %v2718_v47 = vld [vmem:[#allocation6 + $0x28] ss:$16 sps:$4 sm:$0xff]  }
  0x84   : > { %v2748_v3 = vld [vmem:[#allocation6 + $0xc8] ss:$16 sps:$4 sm:$0xff]  }
  0x85   : > { %966 = vmatpush1.bf16.msra.mxu0 %v2617_v35  ;;  %1048 = vmatpush1.bf16.msra.mxu1 %v2618_v36  ;;  %v2708_v35 = vld [vmem:[#allocation4 + $0x2ec] ss:$16 sps:$4 sm:$0xff]   ;;  %v2703_v36 = vld [vmem:[#allocation4 + $0x2e0] ss:$16 sps:$4 sm:$0xff]  }
  0x86   : > { %967 = vmatprep.subr.bf16.mxu0 %v2619_v37  ;;  %1049 = vmatprep.subr.bf16.mxu1 %v2621_v38  ;;  %v2706_v37 = vld [vmem:[#allocation4 + $0x2e8] ss:$16 sps:$4 sm:$0xff]   ;;  %v346_v38 = vld [vmem:[#allocation2] sm:$0xff] }
  0x89   : > { %968 = vmatpush1.bf16.msra.mxu0 %v2623_v39  ;;  %1050 = vmatpush1.bf16.msra.mxu1 %v2624_v40  ;;  %v2711_v39 = vld [vmem:[#allocation6 + $0x4] ss:$16 sps:$4 sm:$0xff]   ;;  %v2714_v40 = vld [vmem:[#allocation6 + $0xc] ss:$16 sps:$4 sm:$0xff]  }
  0x8a   : > { %969 = vmatprep.subr.bf16.mxu0 %v2625_v41  ;;  %1051 = vmatprep.subr.bf16.mxu1 %v2627_v42  ;;  %v2709_v41 = vld [vmem:[#allocation6] ss:$16 sps:$4 sm:$0xff]   ;;  %v2712_v42 = vld [vmem:[#allocation6 + $0x8] ss:$16 sps:$4 sm:$0xff]  }
  0x8d   : > { %970 = vmatpush1.bf16.msra.mxu0 %v2629_v43  ;;  %1052 = vmatpush1.bf16.msra.mxu1 %v2630_v44  ;;  %v350_v43 = vpack.c.bf16 %v346_v38, %v346_v38  ;;  %v2717_v44 = vld [vmem:[#allocation6 + $0x24] ss:$16 sps:$4 sm:$0xff]  }
  0x8e   : > { %971 = vmatprep.subr.bf16.mxu0 %v2631_v45  ;;  %1053 = vmatprep.subr.bf16.mxu1 %v2633_v46  ;;  %v2720_v45 = vld [vmem:[#allocation6 + $0x2c] ss:$16 sps:$4 sm:$0xff]   ;;  %v2715_v46 = vld [vmem:[#allocation6 + $0x20] ss:$16 sps:$4 sm:$0xff]   ;;  %v2801_v38 = vld [vmem:[#allocation6 + $0x1e4] ss:$16 sps:$4 sm:$0xff]  }
  0x91   : > { %972 = vmatpush1.bf16.msra.mxu0 %v2635_v48  ;;  %1054 = vmatpush1.bf16.msra.mxu1 %v2636_v50  ;;  %v2723_v48 = vld [vmem:[#allocation6 + $0x44] ss:$16 sps:$4 sm:$0xff]   ;;  %v2721_v50 = vld [vmem:[#allocation6 + $0x40] ss:$16 sps:$4 sm:$0xff]  }
  0x92   : > { %973 = vmatprep.subr.bf16.mxu0 %v2637_v51  ;;  %1055 = vmatprep.subr.bf16.mxu1 %v2639_v52  ;;  %v2724_v51 = vld [vmem:[#allocation6 + $0x48] ss:$16 sps:$4 sm:$0xff]   ;;  %v2729_v52 = vld [vmem:[#allocation6 + $0x64] ss:$16 sps:$4 sm:$0xff]  }
  0x95   : > { %974 = vmatpush1.bf16.msra.mxu0 %v2641_v53  ;;  %1056 = vmatpush1.bf16.msra.mxu1 %v2642_v54  ;;  %v2732_v53 = vld [vmem:[#allocation6 + $0x6c] ss:$16 sps:$4 sm:$0xff]   ;;  %v2727_v54 = vld [vmem:[#allocation6 + $0x60] ss:$16 sps:$4 sm:$0xff]  }
  0x96   : > { %975 = vmatprep.subr.bf16.mxu0 %v2643_v55  ;;  %1057 = vmatprep.subr.bf16.mxu1 %v2645_v56  ;;  %v2730_v55 = vld [vmem:[#allocation6 + $0x68] ss:$16 sps:$4 sm:$0xff]   ;;  %v2735_v56 = vld [vmem:[#allocation6 + $0x84] ss:$16 sps:$4 sm:$0xff]  }
  0x99   : > { %976 = vmatpush1.bf16.msra.mxu0 %v2647_v57  ;;  %1058 = vmatpush1.bf16.msra.mxu1 %v2648_v58  ;;  %v2738_v57 = vld [vmem:[#allocation6 + $0x8c] ss:$16 sps:$4 sm:$0xff]   ;;  %v2733_v58 = vld [vmem:[#allocation6 + $0x80] ss:$16 sps:$4 sm:$0xff]  }
  0x9a   : > { %977 = vmatprep.subr.bf16.mxu0 %v2649_v59  ;;  %1059 = vmatprep.subr.bf16.mxu1 %v2651_v60  ;;  %v2736_v59 = vld [vmem:[#allocation6 + $0x88] ss:$16 sps:$4 sm:$0xff]   ;;  %v2741_v60 = vld [vmem:[#allocation6 + $0xa4] ss:$16 sps:$4 sm:$0xff]  }
  0x9d   : > { %978 = vmatpush1.bf16.msra.mxu0 %v2653_v61  ;;  %1060 = vmatpush1.bf16.msra.mxu1 %v2654_v62  ;;  %v2744_v61 = vld [vmem:[#allocation6 + $0xac] ss:$16 sps:$4 sm:$0xff]   ;;  %v2739_v62 = vld [vmem:[#allocation6 + $0xa0] ss:$16 sps:$4 sm:$0xff]  }
  0x9e   : > { %979 = vmatprep.subr.bf16.mxu0 %v2655_v63  ;;  %1061 = vmatprep.subr.bf16.mxu1 %v2657_v0  ;;  %v2742_v63 = vld [vmem:[#allocation6 + $0xa8] ss:$16 sps:$4 sm:$0xff]   ;;  %v2747_v0 = vld [vmem:[#allocation6 + $0xc4] ss:$16 sps:$4 sm:$0xff]  }
  0xa1   : > { %980 = vmatpush1.bf16.msra.mxu0 %v2659_v1  ;;  %1062 = vmatpush1.bf16.msra.mxu1 %v2660_v2  ;;  %v2750_v1 = vld [vmem:[#allocation6 + $0xcc] ss:$16 sps:$4 sm:$0xff]   ;;  %v2745_v2 = vld [vmem:[#allocation6 + $0xc0] ss:$16 sps:$4 sm:$0xff]  }
  0xa2   : > { %990 = vmatprep.subr.bf16.mxu0 %v2663_v4  ;;  %1072 = vmatprep.subr.bf16.mxu1 %v2666_v5  ;;  %v2753_v4 = vld [vmem:[#allocation6 + $0xe4] ss:$16 sps:$4 sm:$0xff]   ;;  %v2756_v5 = vld [vmem:[#allocation6 + $0xec] ss:$16 sps:$4 sm:$0xff]  }
  0xa4   : > { %982 = vmatmul.mubr.bf16.vlgmr.msra.gmra.mrb[0].mxu0 %v348_v6  ;;  %1064 = vmatmul.mubr.bf16.vlgmr.msra.gmra.mrb[0].mxu1 %v348_v6  ;;  %v2751_v6 = vld [vmem:[#allocation6 + $0xe0] ss:$16 sps:$4 sm:$0xff]  }
  0xa5   : > { %991 = vmatpush1.bf16.msra.mxu0 %v2661_v7  ;;  %1073 = vmatpush1.bf16.msra.mxu1 %v2664_v8  ;;  %v2754_v7 = vld [vmem:[#allocation6 + $0xe8] ss:$16 sps:$4 sm:$0xff]   ;;  %v2759_v8 = vld [vmem:[#allocation6 + $0x104] ss:$16 sps:$4 sm:$0xff]  }
  0xa6   : > { %992 = vmatprep.subr.bf16.mxu0 %v2669_v9  ;;  %1074 = vmatprep.subr.bf16.mxu1 %v2672_v10  ;;  %v2762_v9 = vld [vmem:[#allocation6 + $0x10c] ss:$16 sps:$4 sm:$0xff]   ;;  %v2757_v10 = vld [vmem:[#allocation6 + $0x100] ss:$16 sps:$4 sm:$0xff]  }
  0xa7   : > { %1022 = vmatprep.mubr.bf16.mxu0 %v3055_v15  ;;  %1104 = vmatprep.mubr.bf16.mxu1 %v3055_v15  ;;  %v2766_v15 = vld [vmem:[#allocation6 + $0x128] ss:$16 sps:$4 sm:$0xff]  }
  0xa9   : > { %993 = vmatpush1.bf16.msra.mxu0 %v2667_v11  ;;  %1075 = vmatpush1.bf16.msra.mxu1 %v2670_v12  ;;  %v2760_v11 = vld [vmem:[#allocation6 + $0x108] ss:$16 sps:$4 sm:$0xff]   ;;  %v2765_v12 = vld [vmem:[#allocation6 + $0x124] ss:$16 sps:$4 sm:$0xff]  }
  0xaa   : > { %994 = vmatprep.subr.bf16.mxu0 %v2675_v13  ;;  %1076 = vmatprep.subr.bf16.mxu1 %v2678_v14  ;;  %v2768_v13 = vld [vmem:[#allocation6 + $0x12c] ss:$16 sps:$4 sm:$0xff]   ;;  %v2763_v14 = vld [vmem:[#allocation6 + $0x120] ss:$16 sps:$4 sm:$0xff]  }
  0xad   : > { %995 = vmatpush1.bf16.msra.mxu0 %v2673_v16  ;;  %1077 = vmatpush1.bf16.msra.mxu1 %v2676_v17  ;;  %v2771_v16 = vld [vmem:[#allocation6 + $0x144] ss:$16 sps:$4 sm:$0xff]   ;;  %v2774_v17 = vld [vmem:[#allocation6 + $0x14c] ss:$16 sps:$4 sm:$0xff]  }
  0xae   : > { %996 = vmatprep.subr.bf16.mxu0 %v2681_v18  ;;  %1078 = vmatprep.subr.bf16.mxu1 %v2684_v19  ;;  %v2769_v18 = vld [vmem:[#allocation6 + $0x140] ss:$16 sps:$4 sm:$0xff]   ;;  %v2772_v19 = vld [vmem:[#allocation6 + $0x148] ss:$16 sps:$4 sm:$0xff]  }
  0xb1   : > { %997 = vmatpush1.bf16.msra.mxu0 %v2679_v20  ;;  %1079 = vmatpush1.bf16.msra.mxu1 %v2682_v21  ;;  %v2777_v20 = vld [vmem:[#allocation6 + $0x164] ss:$16 sps:$4 sm:$0xff]   ;;  %v2780_v21 = vld [vmem:[#allocation6 + $0x16c] ss:$16 sps:$4 sm:$0xff]  }
  0xb2   : > { %998 = vmatprep.subr.bf16.mxu0 %v2687_v22  ;;  %1080 = vmatprep.subr.bf16.mxu1 %v2690_v23  ;;  %v2775_v22 = vld [vmem:[#allocation6 + $0x160] ss:$16 sps:$4 sm:$0xff]   ;;  %v2778_v23 = vld [vmem:[#allocation6 + $0x168] ss:$16 sps:$4 sm:$0xff]  }
  0xb5   : > { %999 = vmatpush1.bf16.msra.mxu0 %v2685_v24  ;;  %1081 = vmatpush1.bf16.msra.mxu1 %v2688_v25  ;;  %v2783_v24 = vld [vmem:[#allocation6 + $0x184] ss:$16 sps:$4 sm:$0xff]   ;;  %v2786_v25 = vld [vmem:[#allocation6 + $0x18c] ss:$16 sps:$4 sm:$0xff]  }
  0xb6   : > { %1000 = vmatprep.subr.bf16.mxu0 %v2693_v26  ;;  %1082 = vmatprep.subr.bf16.mxu1 %v2696_v27  ;;  %v2781_v26 = vld [vmem:[#allocation6 + $0x180] ss:$16 sps:$4 sm:$0xff]   ;;  %v2784_v27 = vld [vmem:[#allocation6 + $0x188] ss:$16 sps:$4 sm:$0xff]  }
  0xb9   : > { %1001 = vmatpush1.bf16.msra.mxu0 %v2691_v28  ;;  %1083 = vmatpush1.bf16.msra.mxu1 %v2694_v29  ;;  %v2789_v28 = vld [vmem:[#allocation6 + $0x1a4] ss:$16 sps:$4 sm:$0xff]   ;;  %v2787_v29 = vld [vmem:[#allocation6 + $0x1a0] ss:$16 sps:$4 sm:$0xff]  }
  0xba   : > { %1002 = vmatprep.subr.bf16.mxu0 %v2699_v30  ;;  %1084 = vmatprep.subr.bf16.mxu1 %v2702_v31  ;;  %v2790_v30 = vld [vmem:[#allocation6 + $0x1a8] ss:$16 sps:$4 sm:$0xff]   ;;  %v2792_v31 = vld [vmem:[#allocation6 + $0x1ac] ss:$16 sps:$4 sm:$0xff]  }
  0xbd   : > { %1003 = vmatpush1.bf16.msra.mxu0 %v2697_v32  ;;  %1085 = vmatpush1.bf16.msra.mxu1 %v2700_v33  ;;  %v2795_v32 = vld [vmem:[#allocation6 + $0x1c4] ss:$16 sps:$4 sm:$0xff]   ;;  %v2798_v33 = vld [vmem:[#allocation6 + $0x1cc] ss:$16 sps:$4 sm:$0xff]  }
  0xbe   : > { %1004 = vmatprep.subr.bf16.mxu0 %v2705_v34  ;;  %1086 = vmatprep.subr.bf16.mxu1 %v2708_v35  ;;  %v1140_v34 = vld [vmem:[#allocation2 + $0x8] sm:$0xff]  ;;  %v2793_v35 = vld [vmem:[#allocation6 + $0x1c0] ss:$16 sps:$4 sm:$0xff]  }
  0xc1   : > { %1005 = vmatpush1.bf16.msra.mxu0 %v2703_v36  ;;  %1087 = vmatpush1.bf16.msra.mxu1 %v2706_v37  ;;  %v2796_v36 = vld [vmem:[#allocation6 + $0x1c8] ss:$16 sps:$4 sm:$0xff]   ;;  %v1144_v37 = vpack.c.bf16 %v1140_v34, %v1140_v34  ;;  %v2828_v34 = vld [vmem:[#allocation8 + $0x6c] ss:$16 sps:$4 sm:$0xff]  }
  0xc2   : > { %1551 = vmatprep.subr.bf16.mxu0 %v2711_v39  ;;  %1592 = vmatprep.subr.bf16.mxu1 %v2714_v40  ;;  %v2804_v39 = vld [vmem:[#allocation6 + $0x1ec] ss:$16 sps:$4 sm:$0xff]   ;;  %v2799_v40 = vld [vmem:[#allocation6 + $0x1e0] ss:$16 sps:$4 sm:$0xff]  }
  0xc4   : > { %1023 = vmatmul.mubr.bf16.vlgmr.msra.gmra.mrb[0].mxu0 %v350_v43  ;;  %1105 = vmatmul.mubr.bf16.vlgmr.msra.gmra.mrb[0].mxu1 %v350_v43  ;;  %v2810_v43 = vld [vmem:[#allocation8 + $0xc] ss:$16 sps:$4 sm:$0xff]  }
  0xc5   : > { %1552 = vmatpush1.bf16.msra.mxu0 %v2709_v41  ;;  %1593 = vmatpush1.bf16.msra.mxu1 %v2712_v42  ;;  %v2802_v41 = vld [vmem:[#allocation6 + $0x1e8] ss:$16 sps:$4 sm:$0xff]   ;;  %v2807_v42 = vld [vmem:[#allocation8 + $0x4] ss:$16 sps:$4 sm:$0xff]  }
  0xc6   : > { %1553 = vmatprep.subr.bf16.mxu0 %v2717_v44  ;;  %1594 = vmatprep.subr.bf16.mxu1 %v2720_v45  ;;  %v449_v44 = vlaneseq }
  0xc7   : > { %1583 = vmatprep.mubr.bf16.mxu0 %v1144_v37  ;;  %1624 = vmatprep.mubr.bf16.mxu1 %v1144_v37  ;;  %v2831_v37 = vld [vmem:[#allocation8 + $0x84] ss:$16 sps:$4 sm:$0xff]  }
  0xc8   : > { %v450_v45 = vshrl.u32 %v449_v44, 7  ;;  %v2838_v44 = vld [vmem:[#allocation8 + $0xa8] ss:$16 sps:$4 sm:$0xff]  }
  0xc9   : > { %1554 = vmatpush1.bf16.msra.mxu0 %v2715_v46  ;;  %1595 = vmatpush1.bf16.msra.mxu1 %v2718_v47  ;;  %v447_v47 = vld [vmem:[%s3282_s2] sm:$0xf] }
  0xca   : > { %1555 = vmatprep.subr.bf16.mxu0 %v2723_v48  ;;  %1596 = vmatprep.subr.bf16.mxu1 %v2726_v49  ;;  %v3229_v46 = vsub.s32 0, %v450_v45  ;;  %v3234_v48 = vsub.s32 1, %v450_v45 }
  0xcc   : > { %v452_v49 = vrot.slane %v447_v47, %v3229_v46 }
  0xcd   : > { %1556 = vmatpush1.bf16.msra.mxu0 %v2721_v50  ;;  %1597 = vmatpush1.bf16.msra.mxu1 %v2724_v51  ;;  %v456_v50 = vrot.slane %v447_v47, %v3234_v48 }
  0xce   : > { %1557 = vmatprep.subr.bf16.mxu0 %v2729_v52  ;;  %1598 = vmatprep.subr.bf16.mxu1 %v2732_v53  ;;  %v3238_v53 = vsub.s32 3, %v450_v45 }
  0xd1   : > { %1558 = vmatpush1.bf16.msra.mxu0 %v2727_v54  ;;  %1599 = vmatpush1.bf16.msra.mxu1 %v2730_v55 }
  0xd2   : > { %1559 = vmatprep.subr.bf16.mxu0 %v2735_v56  ;;  %1600 = vmatprep.subr.bf16.mxu1 %v2738_v57 }
  0xd5   : > { %1560 = vmatpush1.bf16.msra.mxu0 %v2733_v58  ;;  %1601 = vmatpush1.bf16.msra.mxu1 %v2736_v59 }
  0xd6   : > { %1561 = vmatprep.subr.bf16.mxu0 %v2741_v60  ;;  %1602 = vmatprep.subr.bf16.mxu1 %v2744_v61 }
  0xd9   : > { %1562 = vmatpush1.bf16.msra.mxu0 %v2739_v62  ;;  %1603 = vmatpush1.bf16.msra.mxu1 %v2742_v63 }
  0xda   : > { %1563 = vmatprep.subr.bf16.mxu0 %v2747_v0  ;;  %1604 = vmatprep.subr.bf16.mxu1 %v2750_v1  ;;  %v464_v0 = vrot.slane %v447_v47, %v3238_v53  ;;  %v3241_v1 = vsub.s32 2, %v450_v45  ;;  %v2843_v45 = vld [vmem:[#allocation8 + $0xc4] ss:$16 sps:$4 sm:$0xff]  }
  0xdd   : > { %1564 = vmatpush1.bf16.msra.mxu0 %v2745_v2  ;;  %1605 = vmatpush1.bf16.msra.mxu1 %v2748_v3  ;;  %v460_v3 = vrot.slane %v447_v47, %v3241_v1  ;;  %v2846_v47 = vld [vmem:[#allocation8 + $0xcc] ss:$16 sps:$4 sm:$0xff]  }
  0xde   : > { %1565 = vmatprep.subr.bf16.mxu0 %v2753_v4  ;;  %1606 = vmatprep.subr.bf16.mxu1 %v2756_v5 }
  0xe1   : > { %1566 = vmatpush1.bf16.msra.mxu0 %v2751_v6  ;;  %1607 = vmatpush1.bf16.msra.mxu1 %v2754_v7 }
  0xe2   : > { %1567 = vmatprep.subr.bf16.mxu0 %v2759_v8  ;;  %1608 = vmatprep.subr.bf16.mxu1 %v2762_v9 }
  0xe5   : > { %1568 = vmatpush1.bf16.msra.mxu0 %v2757_v10  ;;  %1609 = vmatpush1.bf16.msra.mxu1 %v2760_v11 }
  0xe6   : > { %1569 = vmatprep.subr.bf16.mxu0 %v2765_v12  ;;  %1610 = vmatprep.subr.bf16.mxu1 %v2768_v13  ;;  %v347_v12 = vld [vmem:[#allocation3] sm:$0xff] }
  0xe9   : > { %1570 = vmatpush1.bf16.msra.mxu0 %v2763_v14  ;;  %1611 = vmatpush1.bf16.msra.mxu1 %v2766_v15 }
  0xea   : > { %1571 = vmatprep.subr.bf16.mxu0 %v2771_v16  ;;  %1612 = vmatprep.subr.bf16.mxu1 %v2774_v17 }
  0xed   : > { %1572 = vmatpush1.bf16.msra.mxu0 %v2769_v18  ;;  %1613 = vmatpush1.bf16.msra.mxu1 %v2772_v19 }
  0xee   : > { %1573 = vmatprep.subr.bf16.mxu0 %v2777_v20  ;;  %1614 = vmatprep.subr.bf16.mxu1 %v2780_v21 }
  0xf1   : > { %1574 = vmatpush1.bf16.msra.mxu0 %v2775_v22  ;;  %1615 = vmatpush1.bf16.msra.mxu1 %v2778_v23  ;;  %v2805_v22 = vld [vmem:[#allocation8] ss:$16 sps:$4 sm:$0xff]   ;;  %v2808_v23 = vld [vmem:[#allocation8 + $0x8] ss:$16 sps:$4 sm:$0xff]  }
  0xf2   : > { %1575 = vmatprep.subr.bf16.mxu0 %v2783_v24  ;;  %1616 = vmatprep.subr.bf16.mxu1 %v2786_v25  ;;  %v2813_v25 = vld [vmem:[#allocation8 + $0x24] ss:$16 sps:$4 sm:$0xff]  }
  0xf5   : > { %1576 = vmatpush1.bf16.msra.mxu0 %v2781_v26  ;;  %1617 = vmatpush1.bf16.msra.mxu1 %v2784_v27  ;;  %v2816_v26 = vld [vmem:[#allocation8 + $0x2c] ss:$16 sps:$4 sm:$0xff]   ;;  %v2811_v27 = vld [vmem:[#allocation8 + $0x20] ss:$16 sps:$4 sm:$0xff]  }
  0xf6   : > { %1577 = vmatprep.subr.bf16.mxu0 %v2789_v28  ;;  %1618 = vmatprep.subr.bf16.mxu1 %v2792_v31  ;;  %v2814_v28 = vld [vmem:[#allocation8 + $0x28] ss:$16 sps:$4 sm:$0xff]   ;;  %v2817_v31 = vld [vmem:[#allocation8 + $0x40] ss:$16 sps:$4 sm:$0xff]  }
  0xf9   : > { %1578 = vmatpush1.bf16.msra.mxu0 %v2787_v29  ;;  %1619 = vmatpush1.bf16.msra.mxu1 %v2790_v30  ;;  %v2819_v29 = vld [vmem:[#allocation8 + $0x44] ss:$16 sps:$4 sm:$0xff]   ;;  %v2822_v30 = vld [vmem:[#allocation8 + $0x4c] ss:$16 sps:$4 sm:$0xff]  }
  0xfa   : > { %1579 = vmatprep.subr.bf16.mxu0 %v2795_v32  ;;  %1620 = vmatprep.subr.bf16.mxu1 %v2798_v33  ;;  %v2820_v32 = vld [vmem:[#allocation8 + $0x48] ss:$16 sps:$4 sm:$0xff]   ;;  %v2825_v33 = vld [vmem:[#allocation8 + $0x64] ss:$16 sps:$4 sm:$0xff]  }
  0xfd   : > { %1580 = vmatpush1.bf16.msra.mxu0 %v2793_v35  ;;  %1621 = vmatpush1.bf16.msra.mxu1 %v2796_v36  ;;  %v2823_v35 = vld [vmem:[#allocation8 + $0x60] ss:$16 sps:$4 sm:$0xff]   ;;  %v2826_v36 = vld [vmem:[#allocation8 + $0x68] ss:$16 sps:$4 sm:$0xff]  }
  0xfe   : > { %1581 = vmatprep.subr.bf16.mxu0 %v2801_v38  ;;  %1622 = vmatprep.subr.bf16.mxu1 %v2804_v39  ;;  %v2834_v38 = vld [vmem:[#allocation8 + $0x8c] ss:$16 sps:$4 sm:$0xff]   ;;  %v2829_v39 = vld [vmem:[#allocation8 + $0x80] ss:$16 sps:$4 sm:$0xff]  }
 0x101   : > { %1582 = vmatpush1.bf16.msra.mxu0 %v2799_v40  ;;  %1623 = vmatpush1.bf16.msra.mxu1 %v2802_v41  ;;  %v2832_v40 = vld [vmem:[#allocation8 + $0x88] ss:$16 sps:$4 sm:$0xff]   ;;  %v2837_v41 = vld [vmem:[#allocation8 + $0xa4] ss:$16 sps:$4 sm:$0xff]  }
 0x102   : > { %2071 = vmatprep.subr.bf16.mxu0 %v2807_v42  ;;  %2112 = vmatprep.subr.bf16.mxu1 %v2810_v43  ;;  %v2840_v42 = vld [vmem:[#allocation8 + $0xac] ss:$16 sps:$4 sm:$0xff]   ;;  %v2835_v43 = vld [vmem:[#allocation8 + $0xa0] ss:$16 sps:$4 sm:$0xff]  }
 0x197   : > { %v1024_v51 = vpop.f32.mrb[0].mxu0  ;;  %v1106_v52 = vpop.f32.mrb[0].mxu1 }
 0x198   : > { %v2510_v54 = vadd.f32 %v1024_v51, %v452_v49  ;;  %v1026_v55 = vpop.f32.mrb[1].mxu0  ;;  %v1108_v56 = vpop.f32.mrb[1].mxu1  ;;  %v2512_v5 = vadd.f32 %v1106_v52, %v460_v3  ;;  %v2841_v49 = vld [vmem:[#allocation8 + $0xc0] ss:$16 sps:$4 sm:$0xff]   ;;  %v2849_v51 = vld [vmem:[#allocation8 + $0xe4] ss:$16 sps:$4 sm:$0xff]  }
 0x199   : > { %v2511_v57 = vadd.f32 %v1026_v55, %v456_v50  ;;  %v1028_v58 = vpop.f32.mrb[2].mxu0  ;;  %v1110_v59 = vpop.f32.mrb[2].mxu1  ;;  %v2513_v2 = vadd.f32 %v1108_v56, %v464_v0  ;;  %v2844_v50 = vld [vmem:[#allocation8 + $0xc8] ss:$16 sps:$4 sm:$0xff]   ;;  %v2852_v52 = vld [vmem:[#allocation8 + $0xec] ss:$16 sps:$4 sm:$0xff]  }
 0x19a   : > { %v2369_v60 = vmul.f32 -1.442695, %v2510_v54  ;;  %v1029_v61 = vpop.f32.mrb[3].mxu0  ;;  %v1111_v62 = vpop.f32.mrb[3].mxu1  ;;  %v2847_v54 = vld [vmem:[#allocation8 + $0xe0] ss:$16 sps:$4 sm:$0xff]  }
 0x19b   : > { %v2370_v63 = vmul.f32 -1.442695, %v2511_v57  ;;  %v2371_v4 = vmul.f32 -1.442695, %v2513_v2  ;;  %v2850_v55 = vld [vmem:[#allocation8 + $0xe8] ss:$16 sps:$4 sm:$0xff]  }
 0x19c   : > { %2901 = vpow2.f32 %v2369_v60  ;;  %v2855_v56 = vld [vmem:[#allocation8 + $0x104] ss:$16 sps:$4 sm:$0xff]   ;;  %v2858_v57 = vld [vmem:[#allocation8 + $0x10c] ss:$16 sps:$4 sm:$0xff]   ;;  %v2853_v58 = vld [vmem:[#allocation8 + $0x100] ss:$16 sps:$4 sm:$0xff]  }
 0x19d   : > { %2903 = vpow2.f32 %v2370_v63  ;;  %v2856_v59 = vld [vmem:[#allocation8 + $0x108] ss:$16 sps:$4 sm:$0xff]   ;;  %v2861_v60 = vld [vmem:[#allocation8 + $0x124] ss:$16 sps:$4 sm:$0xff]   ;;  %v2864_v61 = vld [vmem:[#allocation8 + $0x12c] ss:$16 sps:$4 sm:$0xff]  }
 0x19e   : > { %2905 = vpow2.f32 %v2371_v4  ;;  %v2859_v62 = vld [vmem:[#allocation8 + $0x120] ss:$16 sps:$4 sm:$0xff]   ;;  %v2862_v63 = vld [vmem:[#allocation8 + $0x128] ss:$16 sps:$4 sm:$0xff]   ;;  %v2867_v0 = vld [vmem:[#allocation8 + $0x144] ss:$16 sps:$4 sm:$0xff]  }
 0x19f   : > { %2907 = vtanh.f32 %v2512_v5  ;;  %v2870_v2 = vld [vmem:[#allocation8 + $0x14c] ss:$16 sps:$4 sm:$0xff]   ;;  %v2865_v3 = vld [vmem:[#allocation8 + $0x140] ss:$16 sps:$4 sm:$0xff]   ;;  %v2868_v4 = vld [vmem:[#allocation8 + $0x148] ss:$16 sps:$4 sm:$0xff]  }
 0x1a0   : > { %v2873_v5 = vld [vmem:[#allocation8 + $0x164] ss:$16 sps:$4 sm:$0xff]  }
 0x1a6   : > { %v2902_v6 = vpop.eup %2901 }
 0x1a7   : > { %v2904_v7 = vpop.eup %2903  ;;  %v1116_v8 = vadd.f32 1.0, %v2902_v6  ;;  %v2876_v6 = vld [vmem:[#allocation8 + $0x16c] ss:$16 sps:$4 sm:$0xff]  }
 0x1a8   : > { %v1122_v9 = vadd.f32 1.0, %v2904_v7  ;;  %v2906_v10 = vpop.eup %2905  ;;  %v2871_v7 = vld [vmem:[#allocation8 + $0x160] ss:$16 sps:$4 sm:$0xff]  }
 0x1a9   : > { %2909 = vrcp.f32 %v1116_v8  ;;  %v2908_v11 = vpop.eup %2907  ;;  %v1129_v16 = vadd.f32 1.0, %v2906_v10  ;;  %v2874_v8 = vld [vmem:[#allocation8 + $0x168] ss:$16 sps:$4 sm:$0xff]   ;;  %v2882_v10 = vld [vmem:[#allocation8 + $0x18c] ss:$16 sps:$4 sm:$0xff]  }
 0x1aa   : > { %2911 = vrcp.f32 %v1122_v9  ;;  %v2879_v9 = vld [vmem:[#allocation8 + $0x184] ss:$16 sps:$4 sm:$0xff]  }
 0x1ab   : > { %2913 = vrcp.f32 %v1129_v16  ;;  %v2888_v16 = vld [vmem:[#allocation8 + $0x1ac] ss:$16 sps:$4 sm:$0xff]  }
 0x1b3   : > { %v2910_v13 = vpop.eup %2909 }
 0x1b4   : > { %v2912_v14 = vpop.eup %2911  ;;  %v1133_v15 = vmul.f32 %v2910_v13, %v2908_v11  ;;  %v2877_v11 = vld [vmem:[#allocation8 + $0x180] ss:$16 sps:$4 sm:$0xff]   ;;  %v2885_v13 = vld [vmem:[#allocation8 + $0x1a4] ss:$16 sps:$4 sm:$0xff]  }
 0x1b5   : > { %v1132_v17 = vmul.f32 %v2912_v14, %v347_v12  ;;  %v2914_v19 = vpop.eup %2913  ;;  %v2880_v12 = vld [vmem:[#allocation8 + $0x188] ss:$16 sps:$4 sm:$0xff]   ;;  %v2883_v14 = vld [vmem:[#allocation8 + $0x1a0] ss:$16 sps:$4 sm:$0xff]  }
 0x1b7   : > { %v1134_v18 = vadd.f32 %v1133_v15, %v1132_v17  ;;  %v2886_v15 = vld [vmem:[#allocation8 + $0x1a8] ss:$16 sps:$4 sm:$0xff]   ;;  %v2891_v17 = vld [vmem:[#allocation8 + $0x1c4] ss:$16 sps:$4 sm:$0xff]  }
 0x1b9   : > { %2915 = vtanh.f32 %v1134_v18  ;;  %1138 = vst [vmem:[#allocation3] sm:$0xff] %v1134_v18  ;;  %v2894_v18 = vld [vmem:[#allocation8 + $0x1cc] ss:$16 sps:$4 sm:$0xff]  }
 0x1c3   : > { %v2916_v20 = vpop.eup %2915 }
 0x1c4   : > { %v1136_v21 = vmul.f32 %v2916_v20, %v2914_v19  ;;  %v1660_v19 = vld [vmem:[#allocation2 + $0x10] sm:$0xff] }
 0x1c5   : > { %v2889_v20 = vld [vmem:[#allocation8 + $0x1c0] ss:$16 sps:$4 sm:$0xff]  }
 0x1c6   : > { %1137 = vst [vmem:[#allocation2] sm:$0xff] %v1136_v21  ;;  %v1143_v24 = vpack.c.bf16 %v1136_v21, %v1136_v21  ;;  %v2892_v21 = vld [vmem:[#allocation8 + $0x1c8] ss:$16 sps:$4 sm:$0xff]  }
 0x1c8   : > { %1584 = vmatmul.mubr.bf16.vlgmr.msra.gmra.mrb[4].mxu0 %v1143_v24  ;;  %1625 = vmatmul.mubr.bf16.vlgmr.msra.gmra.mrb[4].mxu1 %v1143_v24  ;;  %v2900_v24 = vld [vmem:[#allocation8 + $0x1ec] ss:$16 sps:$4 sm:$0xff]  }
 0x1c9   : > { %2072 = vmatpush1.bf16.msra.mxu0 %v2805_v22  ;;  %2113 = vmatpush1.bf16.msra.mxu1 %v2808_v23  ;;  %v1664_v22 = vpack.c.bf16 %v1660_v19, %v1660_v19  ;;  %v2897_v23 = vld [vmem:[#allocation8 + $0x1e4] ss:$16 sps:$4 sm:$0xff]  }
 0x1ca   : > { %2073 = vmatprep.subr.bf16.mxu0 %v2813_v25  ;;  %2114 = vmatprep.subr.bf16.mxu1 %v2816_v26  ;;  %v2895_v25 = vld [vmem:[#allocation8 + $0x1e0] ss:$16 sps:$4 sm:$0xff]   ;;  %v2898_v26 = vld [vmem:[#allocation8 + $0x1e8] ss:$16 sps:$4 sm:$0xff]  }
 0x1cb   : > { %2103 = vmatprep.mubr.bf16.mxu0 %v1664_v22  ;;  %2144 = vmatprep.mubr.bf16.mxu1 %v1664_v22 }
 0x1cd   : > { %2074 = vmatpush1.bf16.msra.mxu0 %v2811_v27  ;;  %2115 = vmatpush1.bf16.msra.mxu1 %v2814_v28  ;;  %v1209_v27 = vld [vmem:[%s3284_s4] sm:$0xf] }
 0x1ce   : > { %2075 = vmatprep.subr.bf16.mxu0 %v2819_v29  ;;  %2116 = vmatprep.subr.bf16.mxu1 %v2822_v30  ;;  %v1214_v28 = vrot.slane %v1209_v27, %v3229_v46  ;;  %v1218_v29 = vrot.slane %v1209_v27, %v3234_v48 }
 0x1d1   : > { %2076 = vmatpush1.bf16.msra.mxu0 %v2817_v31  ;;  %2117 = vmatpush1.bf16.msra.mxu1 %v2820_v32 }
 0x1d2   : > { %2077 = vmatprep.subr.bf16.mxu0 %v2825_v33  ;;  %2118 = vmatprep.subr.bf16.mxu1 %v2828_v34 }
 0x1d5   : > { %2078 = vmatpush1.bf16.msra.mxu0 %v2823_v35  ;;  %2119 = vmatpush1.bf16.msra.mxu1 %v2826_v36 }
 0x1d6   : > { %2079 = vmatprep.subr.bf16.mxu0 %v2831_v37  ;;  %2120 = vmatprep.subr.bf16.mxu1 %v2834_v38 }
 0x1d9   : > { %2080 = vmatpush1.bf16.msra.mxu0 %v2829_v39  ;;  %2121 = vmatpush1.bf16.msra.mxu1 %v2832_v40 }
 0x1da   : > { %2081 = vmatprep.subr.bf16.mxu0 %v2837_v41  ;;  %2122 = vmatprep.subr.bf16.mxu1 %v2840_v42  ;;  %v1226_v42 = vrot.slane %v1209_v27, %v3238_v53 }
 0x1dd   : > { %2082 = vmatpush1.bf16.msra.mxu0 %v2835_v43  ;;  %2123 = vmatpush1.bf16.msra.mxu1 %v2838_v44  ;;  %v1222_v44 = vrot.slane %v1209_v27, %v3241_v1 }
 0x1de   : > { %2083 = vmatprep.subr.bf16.mxu0 %v2843_v45  ;;  %2124 = vmatprep.subr.bf16.mxu1 %v2846_v47 }
 0x1e1   : > { %2084 = vmatpush1.bf16.msra.mxu0 %v2841_v49  ;;  %2125 = vmatpush1.bf16.msra.mxu1 %v2844_v50 }
 0x1e2   : > { %2085 = vmatprep.subr.bf16.mxu0 %v2849_v51  ;;  %2126 = vmatprep.subr.bf16.mxu1 %v2852_v52 }
 0x1e5   : > { %2086 = vmatpush1.bf16.msra.mxu0 %v2847_v54  ;;  %2127 = vmatpush1.bf16.msra.mxu1 %v2850_v55 }
 0x1e6   : > { %2087 = vmatprep.subr.bf16.mxu0 %v2855_v56  ;;  %2128 = vmatprep.subr.bf16.mxu1 %v2858_v57  ;;  %v1142_v56 = vld [vmem:[#allocation3 + $0x8] sm:$0xff] }
 0x1e9   : > { %2088 = vmatpush1.bf16.msra.mxu0 %v2853_v58  ;;  %2129 = vmatpush1.bf16.msra.mxu1 %v2856_v59 }
 0x1ea   : > { %2089 = vmatprep.subr.bf16.mxu0 %v2861_v60  ;;  %2130 = vmatprep.subr.bf16.mxu1 %v2864_v61 }
 0x1ed   : > { %2090 = vmatpush1.bf16.msra.mxu0 %v2859_v62  ;;  %2131 = vmatpush1.bf16.msra.mxu1 %v2862_v63 }
 0x1ee   : > { %2091 = vmatprep.subr.bf16.mxu0 %v2867_v0  ;;  %2132 = vmatprep.subr.bf16.mxu1 %v2870_v2 }
 0x1f1   : > { %2092 = vmatpush1.bf16.msra.mxu0 %v2865_v3  ;;  %2133 = vmatpush1.bf16.msra.mxu1 %v2868_v4  ;;  %v1729_v4 = vld [vmem:[%s3286_s6] sm:$0xf] }
 0x1f2   : > { %2093 = vmatprep.subr.bf16.mxu0 %v2873_v5  ;;  %2134 = vmatprep.subr.bf16.mxu1 %v2876_v6  ;;  %v1734_v5 = vrot.slane %v1729_v4, %v3229_v46  ;;  %v1738_v6 = vrot.slane %v1729_v4, %v3234_v48  ;;  %v1746_v19 = vrot.slane %v1729_v4, %v3238_v53 }
 0x1f3   : > { %v1742_v46 = vrot.slane %v1729_v4, %v3241_v1 }
 0x1f5   : > { %2094 = vmatpush1.bf16.msra.mxu0 %v2871_v7  ;;  %2135 = vmatpush1.bf16.msra.mxu1 %v2874_v8 }
 0x1f6   : > { %2095 = vmatprep.subr.bf16.mxu0 %v2879_v9  ;;  %2136 = vmatprep.subr.bf16.mxu1 %v2882_v10 }
 0x1f9   : > { %2096 = vmatpush1.bf16.msra.mxu0 %v2877_v11  ;;  %2137 = vmatpush1.bf16.msra.mxu1 %v2880_v12 }
 0x1fa   : > { %2097 = vmatprep.subr.bf16.mxu0 %v2885_v13  ;;  %2138 = vmatprep.subr.bf16.mxu1 %v2888_v16 }
 0x1fd   : > { %2098 = vmatpush1.bf16.msra.mxu0 %v2883_v14  ;;  %2139 = vmatpush1.bf16.msra.mxu1 %v2886_v15 }
 0x1fe   : > { %2099 = vmatprep.subr.bf16.mxu0 %v2891_v17  ;;  %2140 = vmatprep.subr.bf16.mxu1 %v2894_v18 }
 0x201   : > { %2100 = vmatpush1.bf16.msra.mxu0 %v2889_v20  ;;  %2141 = vmatpush1.bf16.msra.mxu1 %v2892_v21 }
 0x202   : > { %2101 = vmatprep.subr.bf16.mxu0 %v2897_v23  ;;  %2142 = vmatprep.subr.bf16.mxu1 %v2900_v24 }
 0x205   : > { %2102 = vmatpush1.bf16.msra.mxu0 %v2895_v25  ;;  %2143 = vmatpush1.bf16.msra.mxu1 %v2898_v26 }
 0x29b   : > { %v1585_v30 = vpop.f32.mrb[4].mxu0  ;;  %v1626_v31 = vpop.f32.mrb[4].mxu1 }
 0x29c   : > { %v1586_v32 = vadd.f32 %v1585_v30, %v1214_v28  ;;  %v1587_v33 = vpop.f32.mrb[5].mxu0  ;;  %v1628_v34 = vpop.f32.mrb[5].mxu1  ;;  %v1627_v47 = vadd.f32 %v1626_v31, %v1222_v44  ;;  %v1662_v28 = vld [vmem:[#allocation3 + $0x10] sm:$0xff] }
 0x29d   : > { %v1588_v35 = vadd.f32 %v1587_v33, %v1218_v29  ;;  %v1589_v36 = vpop.f32.mrb[6].mxu0  ;;  %v1630_v37 = vpop.f32.mrb[6].mxu1  ;;  %v1629_v43 = vadd.f32 %v1628_v34, %v1226_v42 }
 0x29e   : > { %v2436_v38 = vmul.f32 -1.442695, %v1586_v32  ;;  %v1590_v39 = vpop.f32.mrb[7].mxu0  ;;  %v1631_v40 = vpop.f32.mrb[7].mxu1  ;;  %v2183_v36 = vld [vmem:[#allocation2] sm:$0xff] (!%p2506_p10) }
 0x29f   : > { %v2437_v41 = vmul.f32 -1.442695, %v1588_v35  ;;  %v2438_v45 = vmul.f32 -1.442695, %v1629_v43  ;;  %2186 = vst [vmem:[%s3287_s7] sm:$0xff] (!%p2506_p10), %v2183_v36  ;;  %v2189_v39 = vld [vmem:[#allocation3] sm:$0xff] (!%p2506_p10) }
 0x2a0   : > { %2917 = vpow2.f32 %v2436_v38  ;;  %2192 = vst [vmem:[%s3288_s8] sm:$0xff] (!%p2506_p10), %v2189_v39 }
 0x2a1   : > { %2919 = vpow2.f32 %v2437_v41 }
 0x2a2   : > { %2921 = vpow2.f32 %v2438_v45 }
 0x2a3   : > { %2923 = vtanh.f32 %v1627_v47 }
 0x2aa   : > { %v2918_v49 = vpop.eup %2917 }
 0x2ab   : > { %v2920_v50 = vpop.eup %2919  ;;  %v1636_v51 = vadd.f32 1.0, %v2918_v49 }
 0x2ac   : > { %v1642_v52 = vadd.f32 1.0, %v2920_v50  ;;  %v2922_v54 = vpop.eup %2921 }
 0x2ad   : > { %2925 = vrcp.f32 %v1636_v51  ;;  %v2924_v55 = vpop.eup %2923  ;;  %v1649_v60 = vadd.f32 1.0, %v2922_v54 }
 0x2ae   : > { %2927 = vrcp.f32 %v1642_v52 }
 0x2af   : > { %2929 = vrcp.f32 %v1649_v60 }
 0x2b7   : > { %v2926_v57 = vpop.eup %2925 }
 0x2b8   : > { %v2928_v58 = vpop.eup %2927  ;;  %v1653_v59 = vmul.f32 %v2926_v57, %v2924_v55 }
 0x2b9   : > { %v1652_v61 = vmul.f32 %v2928_v58, %v1142_v56  ;;  %v2930_v63 = vpop.eup %2929 }
 0x2bb   : > { %v1654_v62 = vadd.f32 %v1653_v59, %v1652_v61 }
 0x2bd   : > { %2931 = vtanh.f32 %v1654_v62  ;;  %1658 = vst [vmem:[#allocation3 + $0x8] sm:$0xff] %v1654_v62 }
 0x2c4   : > { %v2190_v40 = vld [vmem:[#allocation3 + $0x8] sm:$0xff] (!%p2506_p10) }
 0x2c5   : > { %2193 = vst [vmem:[%s3288_s8 + $0x8] sm:$0xff] (!%p2506_p10), %v2190_v40 }
 0x2c7   : > { %v2932_v0 = vpop.eup %2931 }
 0x2c8   : > { %v1656_v2 = vmul.f32 %v2932_v0, %v2930_v63 }
 0x2ca   : > { %1657 = vst [vmem:[#allocation2 + $0x8] sm:$0xff] %v1656_v2  ;;  %v1663_v3 = vpack.c.bf16 %v1656_v2, %v1656_v2 }
 0x2cc   : > { %2104 = vmatmul.mubr.bf16.vlgmr.msra.gmra.mrb[8].mxu0 %v1663_v3  ;;  %2145 = vmatmul.mubr.bf16.vlgmr.msra.gmra.mrb[8].mxu1 %v1663_v3 }
 0x2d1   : > { %v2184_v37 = vld [vmem:[#allocation2 + $0x8] sm:$0xff] (!%p2506_p10) }
 0x2d2   : > { %2187 = vst [vmem:[%s3287_s7 + $0x8] sm:$0xff] (!%p2506_p10), %v2184_v37 }
 0x39f   : > { %v2105_v7 = vpop.f32.mrb[8].mxu0  ;;  %v2146_v8 = vpop.f32.mrb[8].mxu1 }
 0x3a0   : > { %v2106_v9 = vadd.f32 %v2105_v7, %v1734_v5  ;;  %v2107_v10 = vpop.f32.mrb[9].mxu0  ;;  %v2148_v11 = vpop.f32.mrb[9].mxu1  ;;  %v2147_v21 = vadd.f32 %v2146_v8, %v1742_v46 }
 0x3a1   : > { %v2108_v12 = vadd.f32 %v2107_v10, %v1738_v6  ;;  %v2109_v13 = vpop.f32.mrb[10].mxu0  ;;  %v2150_v14 = vpop.f32.mrb[10].mxu1  ;;  %v2149_v20 = vadd.f32 %v2148_v11, %v1746_v19 }
 0x3a2   : > { %v2503_v15 = vmul.f32 -1.442695, %v2106_v9  ;;  %v2110_v16 = vpop.f32.mrb[11].mxu0  ;;  %v2151_v17 = vpop.f32.mrb[11].mxu1 }
 0x3a3   : > { %v2504_v18 = vmul.f32 -1.442695, %v2108_v12  ;;  %v2505_v48 = vmul.f32 -1.442695, %v2149_v20 }
 0x3a4   : > { %2933 = vpow2.f32 %v2503_v15 }
 0x3a5   : > { %2935 = vpow2.f32 %v2504_v18 }
 0x3a6   : > { %2937 = vpow2.f32 %v2505_v48 }
 0x3a7   : > { %2939 = vtanh.f32 %v2147_v21 }
 0x3ae   : > { %v2934_v22 = vpop.eup %2933 }
 0x3af   : > { %v2936_v23 = vpop.eup %2935  ;;  %v2156_v24 = vadd.f32 1.0, %v2934_v22 }
 0x3b0   : > { %v2162_v25 = vadd.f32 1.0, %v2936_v23  ;;  %v2938_v26 = vpop.eup %2937 }
 0x3b1   : > { %2941 = vrcp.f32 %v2156_v24  ;;  %v2940_v27 = vpop.eup %2939  ;;  %v2169_v31 = vadd.f32 1.0, %v2938_v26 }
 0x3b2   : > { %2943 = vrcp.f32 %v2162_v25 }
 0x3b3   : > { %2945 = vrcp.f32 %v2169_v31 }
 0x3bb   : > { %v2942_v29 = vpop.eup %2941 }
 0x3bc   : > { %v2944_v53 = vpop.eup %2943  ;;  %v2173_v30 = vmul.f32 %v2942_v29, %v2940_v27 }
 0x3bd   : > { %v2172_v32 = vmul.f32 %v2944_v53, %v1662_v28  ;;  %v2946_v1 = vpop.eup %2945 }
 0x3bf   : > { %v2174_v33 = vadd.f32 %v2173_v30, %v2172_v32 }
 0x3c1   : > { %2947 = vtanh.f32 %v2174_v33  ;;  %2178 = vst [vmem:[#allocation3 + $0x10] sm:$0xff] %v2174_v33 }
 0x3c8   : > { %2182 = sbr.rel (%p2506_p10) target bundleno = 983 (0x3d7), region = 68  ;;  %v2191_v41 = vld [vmem:[#allocation3 + $0x10] sm:$0xff] (!%p2506_p10) }
 0x3c9   : > { %2194 = vst [vmem:[%s3288_s8 + $0x10] sm:$0xff] (!%p2506_p10), %v2191_v41 }
 0x3cb   : > { %v2948_v34 = vpop.eup %2947 }
 0x3cc   : > { %v2176_v35 = vmul.f32 %v2948_v34, %v2946_v1 }
 0x3ce   : > { %2177 = vst [vmem:[#allocation2 + $0x10] sm:$0xff] %v2176_v35 }
 0x3d5   : > { %v2185_v38 = vld [vmem:[#allocation2 + $0x10] sm:$0xff] }
 0x3d6   : > { %2188 = vst [vmem:[%s3287_s7 + $0x10] sm:$0xff] %v2185_v38 }
 0x3d7 PF: > { %s21_s27 = sadd.s32 1, %s3047_s27  }
 0x3d8   : > { %p18_p11 = scmp.ge.s32.totalorder %s21_s27, 10  }
 0x3da   :  { %20 = sbr.rel (!%p18_p11) target bundleno = 2 (0x2), region = 107 }
 0x3e1   :  { %2212 = vsyncpa [#allocation5], 1 }
 0x3e2   :  { %2214 = vsyncpa [#allocation5 + $0x1], 1 }
 0x3e3   :  { %2215 = vsyncpa [#allocation7], 1 }

// kernel: seq2seq_forward.5
= control target key start
LH: loop header
LB: loop body
LE: loop exit
PB: predicated region body
PF: predicated region fallthrough
CT: control target
= control target key end

     0   :  { %s4438_s0 = inlined_call_operand.vmem [shape: f32[8,256], index: 0, kind: input, shape index: {}]   ;;  %s4439_s1 = inlined_call_operand.vmem [shape: f32[3,8,128], index: 1, kind: input, shape index: {}]   ;;  %s4440_s2 = inlined_call_operand.vmem [shape: f32[3,8,128], index: 2, kind: input, shape index: {}]   ;;  %s4441_s3 = inlined_call_operand.vmem [shape: bf16[384,512], index: 3, kind: input, shape index: {}]   ;;  %s4442_s4 = inlined_call_operand.vmem [shape: f32[1,512], index: 4, kind: input, shape index: {}]   ;;  %s4443_s5 = inlined_call_operand.vmem [shape: bf16[256,512], index: 5, kind: input, shape index: {}]   ;;  %s4444_s6 = inlined_call_operand.vmem [shape: f32[1,512], index: 6, kind: input, shape index: {}]   ;;  %s4445_s7 = inlined_call_operand.vmem [shape: bf16[256,512], index: 7, kind: input, shape index: {}]   ;;  %s4446_s8 = inlined_call_operand.vmem [shape: f32[1,512], index: 8, kind: input, shape index: {}]   ;;  %s4447_s9 = inlined_call_operand.vmem [shape: bf16[128,256], index: 9, kind: input, shape index: {}]   ;;  %s4448_s10 = inlined_call_operand.vmem [shape: f32[1,256], index: 10, kind: input, shape index: {}]   ;;  %s4449_s11 = inlined_call_operand.hbm [shape: f32[5,8,256], index: 11, kind: output, shape index: {0}]   ;;  %s4450_s12 = inlined_call_operand.hbm [shape: f32[3,8,128], index: 12, kind: output, shape index: {1}]   ;;  %s4451_s13 = inlined_call_operand.hbm [shape: f32[3,8,128], index: 13, kind: output, shape index: {2}]  }
   0x1   :  { %4456 = sst [smem:[#allocation15_spill]] %s4438_s0 }
   0x2   :  { %4457 = sst [smem:[#allocation16_spill]] %s4439_s1 }
   0x3   :  { %4458 = sst [smem:[#allocation17_spill]] %s4440_s2 }
   0x4   :  { %4459 = sst [smem:[#allocation18_spill]] %s4441_s3 }
   0x5   :  { %4460 = sst [smem:[#allocation19_spill]] %s4442_s4 }
   0x6   :  { %19 = vsyncpa [#allocation6], 0 }
   0x7   :  { %21 = vsyncpa [#allocation6 + $0x1], 0 }
   0x8   :  { %22 = vsyncpa [#allocation8], 0  ;;  %s3509_s25 = smov 0   ;;  %s3511_s26 = smov 0  }
   0x9   :  { %s3513_s27 = smov 0   ;;  %s3515_s28 = smov 0  }
   0xa LB: > { %4461 = sst [smem:[#allocation12_spill]] %s3427_s27  ;;  %s3530_s29 = sadd.s32 4294967295, %s3431_s28   ;;  %s3431_s28 = sphi %s3515_s28, %s4473_s28   ;;  %s3427_s27 = sphi %s3513_s27, %s4475_s27   ;;  %s3423_s26 = sphi %s3511_s26, %s4477_s26   ;;  %s3419_s25 = sphi %s3509_s25, %s4476_s25  }
   0xb   : > { %s2562_s30 = sadd.s32 4294967294, %s3431_s28   ;;  %s3534_s14 = sadd.s32 1, %s3431_s28  }
   0xc   : > { %4462 = sst [smem:[#allocation13_spill]] %s3534_s14  ;;  %s266_s15 = sadd.s32 1, %s3427_s27 }
   0xd   : > { %s263_s16 = ssub.s32 %s3431_s28, %s3534_s14  ;;  %p276_p0 = scmp.ne.s32.totalorder %s3427_s27, %s3423_s26 }
   0xe   : > { %p264_p1 = scmp.eq.s32.totalorder %s263_s16, 0  ;;  %p277_p2 = scmp.eq.s32.totalorder %s3530_s29, 4 }
   0xf   : > { %p282_p3 = scmp.ne.s32.totalorder %s3423_s26, %s3419_s25  ;;  %p283_p4 = scmp.eq.s32.totalorder %s2562_s30, 4 }
  0x10   : > { %s3545_s17 = scalar_select %p264_p1, %s3427_s27, %s266_s15  }
  0x11   : > { %p3549_p5 = por %p277_p2, %p276_p0  ;;  %p3553_p6 = por %p283_p4, %p282_p3 }
  0x12   : > { %4463 = sst [smem:[#allocation14_spill]] %s3545_s17  ;;  %p2564_p7 = scmp.ge.s32.totalorder %s3431_s28, 1 }
  0x13   : > { %s4465_s19 = scalar_select %p3553_p6, 1, 0 }
  0x14   : > { %p376_p8 = scmp.lt.s32.totalorder %s3431_s28, 6 }
  0x16   : > { %p377_p9 = pnand %p2564_p7, %p376_p8 }
  0x17   : > { %s4452_s20 = sand.u32 (!%p377_p9), 1, %s3423_s26   ;;  %p2566_p10 = scmp.ne.s32.totalorder (!%p377_p9), %s3530_s29, 0 }
  0x18   : > { %380 = sbr.rel (%p377_p9) target bundleno = 1241 (0x4d9), region = 64  ;;  %s2565_s21 = sshll.u32 (!%p377_p9), %s4452_s20, 4 }
  0x19   : > { %s3562_s22 = scalar_lea.vmem (!%p377_p9), [#allocation5], %s2565_s21 }
  0x1f   : > { %419 = sbr.rel (%p2566_p10) target bundleno = 42 (0x2a), region = 68  ;;  %s4466_s0 = sld [smem:[#allocation15_spill]] (!%p2566_p10) }
  0x20   : > { %s4467_s1 = sld [smem:[#allocation16_spill]] (!%p2566_p10)  ;;  %s4468_s2 = sld [smem:[#allocation17_spill]] (!%p2566_p10) }
  0x25   : > { %v420_v0 = vld [vmem:[%s4466_s0] sm:$0xff] (!%p2566_p10)  ;;  %v421_v1 = vld [vmem:[%s4466_s0 + $0x8] sm:$0xff] (!%p2566_p10) }
  0x26   : > { %v424_v2 = vld [vmem:[%s4467_s1] sm:$0xff]  ;;  %422 = vst [vmem:[#allocation2] sm:$0xff] %v420_v0  ;;  %423 = vst [vmem:[#allocation2 + $0x8] sm:$0xff] %v421_v1  ;;  %v425_v3 = vld [vmem:[%s4467_s1 + $0x8] sm:$0xff] }
  0x27   : > { %427 = vst [vmem:[#allocation3] sm:$0xff] %v424_v2  ;;  %v426_v4 = vld [vmem:[%s4467_s1 + $0x10] sm:$0xff]  ;;  %v430_v5 = vld [vmem:[%s4468_s2] sm:$0xff]  ;;  %428 = vst [vmem:[#allocation3 + $0x8] sm:$0xff] %v425_v3 }
  0x28   : > { %429 = vst [vmem:[#allocation3 + $0x10] sm:$0xff] %v426_v4  ;;  %433 = vst [vmem:[#allocation4] sm:$0xff] %v430_v5  ;;  %v431_v6 = vld [vmem:[%s4468_s2 + $0x8] sm:$0xff]  ;;  %v432_v7 = vld [vmem:[%s4468_s2 + $0x10] sm:$0xff] }
  0x29   : > { %434 = vst [vmem:[#allocation4 + $0x8] sm:$0xff] %v431_v6  ;;  %435 = vst [vmem:[#allocation4 + $0x10] sm:$0xff] %v432_v7 }
  0x2a PF: > { %s4469_s3 = sld [smem:[#allocation18_spill]]  ;;  %s4470_s4 = sld [smem:[#allocation19_spill]] }
  0x2b   : > { %p2818_p11 = scmp.ne.s32.totalorder %s3530_s29, 4 }
  0x30   : > { %v2897_v8 = vld [vmem:[%s4469_s3 + $0x4] ss:$16 sps:$4 sm:$0xff]   ;;  %v2899_v9 = vld [vmem:[%s4469_s3 + $0xc] ss:$16 sps:$4 sm:$0xff]   ;;  %v2901_v10 = vld [vmem:[%s4469_s3] ss:$16 sps:$4 sm:$0xff]  }
  0x31   : > { %1041 = vmatprep.subr.bf16.mxu0 %v2897_v8  ;;  %v2902_v11 = vld [vmem:[%s4469_s3 + $0x8] ss:$16 sps:$4 sm:$0xff]   ;;  %1123 = vmatprep.subr.bf16.mxu1 %v2899_v9  ;;  %v2903_v12 = vld [vmem:[%s4469_s3 + $0x24] ss:$16 sps:$4 sm:$0xff]   ;;  %v2905_v13 = vld [vmem:[%s4469_s3 + $0x2c] ss:$16 sps:$4 sm:$0xff]  }
  0x32   : > { %1042 = vmatpush1.bf16.msra.mxu0 %v2901_v10  ;;  %1124 = vmatpush1.bf16.msra.mxu1 %v2902_v11  ;;  %v2907_v14 = vld [vmem:[%s4469_s3 + $0x20] ss:$16 sps:$4 sm:$0xff]   ;;  %v2908_v15 = vld [vmem:[%s4469_s3 + $0x28] ss:$16 sps:$4 sm:$0xff]   ;;  %v2909_v16 = vld [vmem:[%s4469_s3 + $0x44] ss:$16 sps:$4 sm:$0xff]  }
  0x33   : > { %1043 = vmatprep.subr.bf16.mxu0 %v2903_v12  ;;  %1125 = vmatprep.subr.bf16.mxu1 %v2905_v13  ;;  %v2911_v17 = vld [vmem:[%s4469_s3 + $0x4c] ss:$16 sps:$4 sm:$0xff]   ;;  %v2913_v18 = vld [vmem:[%s4469_s3 + $0x40] ss:$16 sps:$4 sm:$0xff]   ;;  %v2914_v19 = vld [vmem:[%s4469_s3 + $0x48] ss:$16 sps:$4 sm:$0xff]  }
  0x34   : > { %v2915_v20 = vld [vmem:[%s4469_s3 + $0x64] ss:$16 sps:$4 sm:$0xff]   ;;  %v2917_v21 = vld [vmem:[%s4469_s3 + $0x6c] ss:$16 sps:$4 sm:$0xff]   ;;  %v2919_v22 = vld [vmem:[%s4469_s3 + $0x60] ss:$16 sps:$4 sm:$0xff]  }
  0x35   : > { %v2920_v23 = vld [vmem:[%s4469_s3 + $0x68] ss:$16 sps:$4 sm:$0xff]   ;;  %v2921_v24 = vld [vmem:[%s4469_s3 + $0x84] ss:$16 sps:$4 sm:$0xff]   ;;  %v2923_v25 = vld [vmem:[%s4469_s3 + $0x8c] ss:$16 sps:$4 sm:$0xff]  }
  0x36   : > { %1044 = vmatpush1.bf16.msra.mxu0 %v2907_v14  ;;  %1126 = vmatpush1.bf16.msra.mxu1 %v2908_v15  ;;  %v2925_v26 = vld [vmem:[%s4469_s3 + $0x80] ss:$16 sps:$4 sm:$0xff]   ;;  %v2926_v27 = vld [vmem:[%s4469_s3 + $0x88] ss:$16 sps:$4 sm:$0xff]   ;;  %v2927_v28 = vld [vmem:[%s4469_s3 + $0xa4] ss:$16 sps:$4 sm:$0xff]  }
  0x37   : > { %1045 = vmatprep.subr.bf16.mxu0 %v2909_v16  ;;  %1127 = vmatprep.subr.bf16.mxu1 %v2911_v17  ;;  %v2929_v29 = vld [vmem:[%s4469_s3 + $0xac] ss:$16 sps:$4 sm:$0xff]   ;;  %v2931_v30 = vld [vmem:[%s4469_s3 + $0xa0] ss:$16 sps:$4 sm:$0xff]   ;;  %v2932_v31 = vld [vmem:[%s4469_s3 + $0xa8] ss:$16 sps:$4 sm:$0xff]  }
  0x38   : > { %v2933_v32 = vld [vmem:[%s4469_s3 + $0xc4] ss:$16 sps:$4 sm:$0xff]   ;;  %v2935_v33 = vld [vmem:[%s4469_s3 + $0xcc] ss:$16 sps:$4 sm:$0xff]   ;;  %v2937_v34 = vld [vmem:[%s4469_s3 + $0xc0] ss:$16 sps:$4 sm:$0xff]  }
  0x39   : > { %v2938_v35 = vld [vmem:[%s4469_s3 + $0xc8] ss:$16 sps:$4 sm:$0xff]   ;;  %v2939_v36 = vld [vmem:[%s4469_s3 + $0xe4] ss:$16 sps:$4 sm:$0xff]   ;;  %v2941_v37 = vld [vmem:[%s4469_s3 + $0xec] ss:$16 sps:$4 sm:$0xff]  }
  0x3a   : > { %1046 = vmatpush1.bf16.msra.mxu0 %v2913_v18  ;;  %1128 = vmatpush1.bf16.msra.mxu1 %v2914_v19  ;;  %v2943_v38 = vld [vmem:[%s4469_s3 + $0xe0] ss:$16 sps:$4 sm:$0xff]   ;;  %v2944_v39 = vld [vmem:[%s4469_s3 + $0xe8] ss:$16 sps:$4 sm:$0xff]   ;;  %v2945_v40 = vld [vmem:[%s4469_s3 + $0x104] ss:$16 sps:$4 sm:$0xff]  }
  0x3b   : > { %1047 = vmatprep.subr.bf16.mxu0 %v2915_v20  ;;  %1129 = vmatprep.subr.bf16.mxu1 %v2917_v21  ;;  %v2947_v41 = vld [vmem:[%s4469_s3 + $0x10c] ss:$16 sps:$4 sm:$0xff]   ;;  %v2949_v42 = vld [vmem:[%s4469_s3 + $0x100] ss:$16 sps:$4 sm:$0xff]   ;;  %v2950_v43 = vld [vmem:[%s4469_s3 + $0x108] ss:$16 sps:$4 sm:$0xff]  }
  0x3c   : > { %v2951_v44 = vld [vmem:[%s4469_s3 + $0x124] ss:$16 sps:$4 sm:$0xff]   ;;  %v2953_v45 = vld [vmem:[%s4469_s3 + $0x12c] ss:$16 sps:$4 sm:$0xff]   ;;  %v2955_v46 = vld [vmem:[%s4469_s3 + $0x120] ss:$16 sps:$4 sm:$0xff]  }
  0x3d   : > { %v2956_v47 = vld [vmem:[%s4469_s3 + $0x128] ss:$16 sps:$4 sm:$0xff]   ;;  %v2957_v48 = vld [vmem:[%s4469_s3 + $0x144] ss:$16 sps:$4 sm:$0xff]   ;;  %v2959_v49 = vld [vmem:[%s4469_s3 + $0x14c] ss:$16 sps:$4 sm:$0xff]  }
  0x3e   : > { %1048 = vmatpush1.bf16.msra.mxu0 %v2919_v22  ;;  %1130 = vmatpush1.bf16.msra.mxu1 %v2920_v23  ;;  %v2961_v50 = vld [vmem:[%s4469_s3 + $0x140] ss:$16 sps:$4 sm:$0xff]   ;;  %v2962_v51 = vld [vmem:[%s4469_s3 + $0x148] ss:$16 sps:$4 sm:$0xff]   ;;  %v2963_v52 = vld [vmem:[%s4469_s3 + $0x164] ss:$16 sps:$4 sm:$0xff]  }
  0x3f   : > { %1049 = vmatprep.subr.bf16.mxu0 %v2921_v24  ;;  %1131 = vmatprep.subr.bf16.mxu1 %v2923_v25  ;;  %v2965_v53 = vld [vmem:[%s4469_s3 + $0x16c] ss:$16 sps:$4 sm:$0xff]   ;;  %v2967_v55 = vld [vmem:[%s4469_s3 + $0x160] ss:$16 sps:$4 sm:$0xff]   ;;  %v2968_v57 = vld [vmem:[%s4469_s3 + $0x168] ss:$16 sps:$4 sm:$0xff]  }
  0x40   : > { %v437_v54 = vld [vmem:[#allocation2 + $0x8] sm:$0xff]  ;;  %v2969_v58 = vld [vmem:[%s4469_s3 + $0x184] ss:$16 sps:$4 sm:$0xff]   ;;  %v2973_v60 = vld [vmem:[%s4469_s3 + $0x180] ss:$16 sps:$4 sm:$0xff]   ;;  %v3433_v22 = vmov 0  }
  0x41   : > { %v441_v56 = vpack.c.bf16 %v437_v54, %v437_v54  ;;  %v2971_v59 = vld [vmem:[%s4469_s3 + $0x18c] ss:$16 sps:$4 sm:$0xff]   ;;  %v2974_v61 = vld [vmem:[%s4469_s3 + $0x188] ss:$16 sps:$4 sm:$0xff]   ;;  %v2975_v62 = vld [vmem:[%s4469_s3 + $0x1a4] ss:$16 sps:$4 sm:$0xff]  }
  0x42   : > { %1050 = vmatpush1.bf16.msra.mxu0 %v2925_v26  ;;  %1132 = vmatpush1.bf16.msra.mxu1 %v2926_v27  ;;  %v2977_v63 = vld [vmem:[%s4469_s3 + $0x1ac] ss:$16 sps:$4 sm:$0xff]   ;;  %v2979_v0 = vld [vmem:[%s4469_s3 + $0x1a0] ss:$16 sps:$4 sm:$0xff]   ;;  %v2980_v1 = vld [vmem:[%s4469_s3 + $0x1a8] ss:$16 sps:$4 sm:$0xff]  }
  0x43   : > { %1051 = vmatprep.subr.bf16.mxu0 %v2927_v28  ;;  %1133 = vmatprep.subr.bf16.mxu1 %v2929_v29  ;;  %v2981_v2 = vld [vmem:[%s4469_s3 + $0x1c4] ss:$16 sps:$4 sm:$0xff]   ;;  %v2983_v3 = vld [vmem:[%s4469_s3 + $0x1cc] ss:$16 sps:$4 sm:$0xff]   ;;  %v2985_v4 = vld [vmem:[%s4469_s3 + $0x1c0] ss:$16 sps:$4 sm:$0xff]  }
  0x44   : > { %1073 = vmatprep.mubr.bf16.mxu0 %v441_v56  ;;  %1155 = vmatprep.mubr.bf16.mxu1 %v441_v56  ;;  %v2986_v5 = vld [vmem:[%s4469_s3 + $0x1c8] ss:$16 sps:$4 sm:$0xff]   ;;  %v2987_v6 = vld [vmem:[%s4469_s3 + $0x1e4] ss:$16 sps:$4 sm:$0xff]   ;;  %v2989_v7 = vld [vmem:[%s4469_s3 + $0x1ec] ss:$16 sps:$4 sm:$0xff]  }
  0x45   : > { %v2991_v8 = vld [vmem:[%s4469_s3 + $0x1e0] ss:$16 sps:$4 sm:$0xff]   ;;  %v2992_v9 = vld [vmem:[%s4469_s3 + $0x1e8] ss:$16 sps:$4 sm:$0xff]   ;;  %v2995_v11 = vld [vmem:[%s4469_s3 + $0x204] ss:$16 sps:$4 sm:$0xff]  }
  0x46   : > { %1052 = vmatpush1.bf16.msra.mxu0 %v2931_v30  ;;  %1134 = vmatpush1.bf16.msra.mxu1 %v2932_v31  ;;  %v436_v10 = vld [vmem:[#allocation2] sm:$0xff]  ;;  %v2998_v12 = vld [vmem:[%s4469_s3 + $0x20c] ss:$16 sps:$4 sm:$0xff]   ;;  %v2996_v15 = vld [vmem:[%s4469_s3 + $0x208] ss:$16 sps:$4 sm:$0xff]  }
  0x47   : > { %1053 = vmatprep.subr.bf16.mxu0 %v2933_v32  ;;  %1135 = vmatprep.subr.bf16.mxu1 %v2935_v33  ;;  %v440_v13 = vpack.c.bf16 %v436_v10, %v436_v10  ;;  %v2993_v14 = vld [vmem:[%s4469_s3 + $0x200] ss:$16 sps:$4 sm:$0xff]   ;;  %v3001_v16 = vld [vmem:[%s4469_s3 + $0x224] ss:$16 sps:$4 sm:$0xff]   ;;  %v3004_v17 = vld [vmem:[%s4469_s3 + $0x22c] ss:$16 sps:$4 sm:$0xff]  }
  0x48   : > { %v2999_v18 = vld [vmem:[%s4469_s3 + $0x220] ss:$16 sps:$4 sm:$0xff]   ;;  %v3002_v19 = vld [vmem:[%s4469_s3 + $0x228] ss:$16 sps:$4 sm:$0xff]   ;;  %v3007_v20 = vld [vmem:[%s4469_s3 + $0x244] ss:$16 sps:$4 sm:$0xff]  }
  0x49   : > { %v3010_v21 = vld [vmem:[%s4469_s3 + $0x24c] ss:$16 sps:$4 sm:$0xff]   ;;  %v3005_v23 = vld [vmem:[%s4469_s3 + $0x240] ss:$16 sps:$4 sm:$0xff]   ;;  %v3008_v24 = vld [vmem:[%s4469_s3 + $0x248] ss:$16 sps:$4 sm:$0xff]  }
  0x4a   : > { %1054 = vmatpush1.bf16.msra.mxu0 %v2937_v34  ;;  %1136 = vmatpush1.bf16.msra.mxu1 %v2938_v35  ;;  %v3013_v25 = vld [vmem:[%s4469_s3 + $0x264] ss:$16 sps:$4 sm:$0xff]   ;;  %v3016_v26 = vld [vmem:[%s4469_s3 + $0x26c] ss:$16 sps:$4 sm:$0xff]   ;;  %v3011_v27 = vld [vmem:[%s4469_s3 + $0x260] ss:$16 sps:$4 sm:$0xff]  }
  0x4b   : > { %1055 = vmatprep.subr.bf16.mxu0 %v2939_v36  ;;  %1137 = vmatprep.subr.bf16.mxu1 %v2941_v37  ;;  %v3014_v28 = vld [vmem:[%s4469_s3 + $0x268] ss:$16 sps:$4 sm:$0xff]   ;;  %v3019_v29 = vld [vmem:[%s4469_s3 + $0x284] ss:$16 sps:$4 sm:$0xff]   ;;  %v3022_v30 = vld [vmem:[%s4469_s3 + $0x28c] ss:$16 sps:$4 sm:$0xff]  }
  0x4c   : > { %v3017_v31 = vld [vmem:[%s4469_s3 + $0x280] ss:$16 sps:$4 sm:$0xff]   ;;  %v3020_v32 = vld [vmem:[%s4469_s3 + $0x288] ss:$16 sps:$4 sm:$0xff]   ;;  %v3025_v33 = vld [vmem:[%s4469_s3 + $0x2a4] ss:$16 sps:$4 sm:$0xff]  }
  0x4d   : > { %v3028_v34 = vld [vmem:[%s4469_s3 + $0x2ac] ss:$16 sps:$4 sm:$0xff]   ;;  %v3023_v35 = vld [vmem:[%s4469_s3 + $0x2a0] ss:$16 sps:$4 sm:$0xff]   ;;  %v3026_v36 = vld [vmem:[%s4469_s3 + $0x2a8] ss:$16 sps:$4 sm:$0xff]  }
  0x4e   : > { %1056 = vmatpush1.bf16.msra.mxu0 %v2943_v38  ;;  %1138 = vmatpush1.bf16.msra.mxu1 %v2944_v39  ;;  %v3031_v37 = vld [vmem:[%s4469_s3 + $0x2c4] ss:$16 sps:$4 sm:$0xff]   ;;  %v3034_v38 = vld [vmem:[%s4469_s3 + $0x2cc] ss:$16 sps:$4 sm:$0xff]   ;;  %v3029_v39 = vld [vmem:[%s4469_s3 + $0x2c0] ss:$16 sps:$4 sm:$0xff]  }
  0x4f   : > { %1057 = vmatprep.subr.bf16.mxu0 %v2945_v40  ;;  %1139 = vmatprep.subr.bf16.mxu1 %v2947_v41  ;;  %v3032_v40 = vld [vmem:[%s4469_s3 + $0x2c8] ss:$16 sps:$4 sm:$0xff]   ;;  %v3037_v41 = vld [vmem:[%s4469_s3 + $0x2e4] ss:$16 sps:$4 sm:$0xff]   ;;  %v3058_v56 = vld [vmem:[%s4443_s5 + $0x4c] ss:$16 sps:$4 sm:$0xff]  }
  0x50   : > { %v3050_v54 = vld [vmem:[%s4443_s5 + $0x28] ss:$16 sps:$4 sm:$0xff]  }
  0x51   : > { %v3080_v10 = vld [vmem:[%s4443_s5 + $0xc8] ss:$16 sps:$4 sm:$0xff]  }
  0x52   : > { %1058 = vmatpush1.bf16.msra.mxu0 %v2949_v42  ;;  %1140 = vmatpush1.bf16.msra.mxu1 %v2950_v43  ;;  %v3040_v42 = vld [vmem:[%s4469_s3 + $0x2ec] ss:$16 sps:$4 sm:$0xff]   ;;  %v3035_v43 = vld [vmem:[%s4469_s3 + $0x2e0] ss:$16 sps:$4 sm:$0xff]  }
  0x53   : > { %1059 = vmatprep.subr.bf16.mxu0 %v2951_v44  ;;  %1141 = vmatprep.subr.bf16.mxu1 %v2953_v45  ;;  %v3038_v44 = vld [vmem:[%s4469_s3 + $0x2e8] ss:$16 sps:$4 sm:$0xff]   ;;  %v438_v45 = vld [vmem:[#allocation3] sm:$0xff] }
  0x56   : > { %1060 = vmatpush1.bf16.msra.mxu0 %v2955_v46  ;;  %1142 = vmatpush1.bf16.msra.mxu1 %v2956_v47  ;;  %v3043_v46 = vld [vmem:[%s4443_s5 + $0x4] ss:$16 sps:$4 sm:$0xff]   ;;  %v3046_v47 = vld [vmem:[%s4443_s5 + $0xc] ss:$16 sps:$4 sm:$0xff]  }
  0x57   : > { %1061 = vmatprep.subr.bf16.mxu0 %v2957_v48  ;;  %1143 = vmatprep.subr.bf16.mxu1 %v2959_v49  ;;  %v3041_v48 = vld [vmem:[%s4443_s5] ss:$16 sps:$4 sm:$0xff]   ;;  %v3044_v49 = vld [vmem:[%s4443_s5 + $0x8] ss:$16 sps:$4 sm:$0xff]  }
  0x5a   : > { %1062 = vmatpush1.bf16.msra.mxu0 %v2961_v50  ;;  %1144 = vmatpush1.bf16.msra.mxu1 %v2962_v51  ;;  %v442_v50 = vpack.c.bf16 %v438_v45, %v438_v45  ;;  %v3049_v51 = vld [vmem:[%s4443_s5 + $0x24] ss:$16 sps:$4 sm:$0xff]  }
  0x5b   : > { %1063 = vmatprep.subr.bf16.mxu0 %v2963_v52  ;;  %1145 = vmatprep.subr.bf16.mxu1 %v2965_v53  ;;  %v3052_v52 = vld [vmem:[%s4443_s5 + $0x2c] ss:$16 sps:$4 sm:$0xff]   ;;  %v3047_v53 = vld [vmem:[%s4443_s5 + $0x20] ss:$16 sps:$4 sm:$0xff]  }
  0x5e   : > { %1064 = vmatpush1.bf16.msra.mxu0 %v2967_v55  ;;  %1146 = vmatpush1.bf16.msra.mxu1 %v2968_v57  ;;  %v3055_v55 = vld [vmem:[%s4443_s5 + $0x44] ss:$16 sps:$4 sm:$0xff]   ;;  %v3053_v57 = vld [vmem:[%s4443_s5 + $0x40] ss:$16 sps:$4 sm:$0xff]  }
  0x5f   : > { %1065 = vmatprep.subr.bf16.mxu0 %v2969_v58  ;;  %1147 = vmatprep.subr.bf16.mxu1 %v2971_v59  ;;  %v3056_v58 = vld [vmem:[%s4443_s5 + $0x48] ss:$16 sps:$4 sm:$0xff]   ;;  %v3061_v59 = vld [vmem:[%s4443_s5 + $0x64] ss:$16 sps:$4 sm:$0xff]  }
  0x62   : > { %1066 = vmatpush1.bf16.msra.mxu0 %v2973_v60  ;;  %1148 = vmatpush1.bf16.msra.mxu1 %v2974_v61  ;;  %v3064_v60 = vld [vmem:[%s4443_s5 + $0x6c] ss:$16 sps:$4 sm:$0xff]   ;;  %v3059_v61 = vld [vmem:[%s4443_s5 + $0x60] ss:$16 sps:$4 sm:$0xff]  }
  0x63   : > { %1067 = vmatprep.subr.bf16.mxu0 %v2975_v62  ;;  %1149 = vmatprep.subr.bf16.mxu1 %v2977_v63  ;;  %v3062_v62 = vld [vmem:[%s4443_s5 + $0x68] ss:$16 sps:$4 sm:$0xff]   ;;  %v3067_v63 = vld [vmem:[%s4443_s5 + $0x84] ss:$16 sps:$4 sm:$0xff]  }
  0x66   : > { %1068 = vmatpush1.bf16.msra.mxu0 %v2979_v0  ;;  %1150 = vmatpush1.bf16.msra.mxu1 %v2980_v1  ;;  %v3070_v0 = vld [vmem:[%s4443_s5 + $0x8c] ss:$16 sps:$4 sm:$0xff]   ;;  %v3065_v1 = vld [vmem:[%s4443_s5 + $0x80] ss:$16 sps:$4 sm:$0xff]  }
  0x67   : > { %1069 = vmatprep.subr.bf16.mxu0 %v2981_v2  ;;  %1151 = vmatprep.subr.bf16.mxu1 %v2983_v3  ;;  %v3068_v2 = vld [vmem:[%s4443_s5 + $0x88] ss:$16 sps:$4 sm:$0xff]   ;;  %v3073_v3 = vld [vmem:[%s4443_s5 + $0xa4] ss:$16 sps:$4 sm:$0xff]  }
  0x6a   : > { %1070 = vmatpush1.bf16.msra.mxu0 %v2985_v4  ;;  %1152 = vmatpush1.bf16.msra.mxu1 %v2986_v5  ;;  %v3076_v4 = vld [vmem:[%s4443_s5 + $0xac] ss:$16 sps:$4 sm:$0xff]   ;;  %v3071_v5 = vld [vmem:[%s4443_s5 + $0xa0] ss:$16 sps:$4 sm:$0xff]  }
  0x6b   : > { %1071 = vmatprep.subr.bf16.mxu0 %v2987_v6  ;;  %1153 = vmatprep.subr.bf16.mxu1 %v2989_v7  ;;  %v3074_v6 = vld [vmem:[%s4443_s5 + $0xa8] ss:$16 sps:$4 sm:$0xff]   ;;  %v3079_v7 = vld [vmem:[%s4443_s5 + $0xc4] ss:$16 sps:$4 sm:$0xff]  }
  0x6e   : > { %1072 = vmatpush1.bf16.msra.mxu0 %v2991_v8  ;;  %1154 = vmatpush1.bf16.msra.mxu1 %v2992_v9  ;;  %v3082_v8 = vld [vmem:[%s4443_s5 + $0xcc] ss:$16 sps:$4 sm:$0xff]   ;;  %v3077_v9 = vld [vmem:[%s4443_s5 + $0xc0] ss:$16 sps:$4 sm:$0xff]  }
  0x6f   : > { %1082 = vmatprep.subr.bf16.mxu0 %v2995_v11  ;;  %1164 = vmatprep.subr.bf16.mxu1 %v2998_v12  ;;  %v3085_v11 = vld [vmem:[%s4443_s5 + $0xe4] ss:$16 sps:$4 sm:$0xff]   ;;  %v3088_v12 = vld [vmem:[%s4443_s5 + $0xec] ss:$16 sps:$4 sm:$0xff]  }
  0x71   : > { %1074 = vmatmul.mubr.bf16.vlgmr.msra.gmra.mrb[0].mxu0 %v440_v13  ;;  %1156 = vmatmul.mubr.bf16.vlgmr.msra.gmra.mrb[0].mxu1 %v440_v13  ;;  %v3083_v13 = vld [vmem:[%s4443_s5 + $0xe0] ss:$16 sps:$4 sm:$0xff]  }
  0x72   : > { %1083 = vmatpush1.bf16.msra.mxu0 %v2993_v14  ;;  %1165 = vmatpush1.bf16.msra.mxu1 %v2996_v15  ;;  %v3086_v14 = vld [vmem:[%s4443_s5 + $0xe8] ss:$16 sps:$4 sm:$0xff]   ;;  %v3091_v15 = vld [vmem:[%s4443_s5 + $0x104] ss:$16 sps:$4 sm:$0xff]  }
  0x73   : > { %1084 = vmatprep.subr.bf16.mxu0 %v3001_v16  ;;  %1166 = vmatprep.subr.bf16.mxu1 %v3004_v17  ;;  %v3094_v16 = vld [vmem:[%s4443_s5 + $0x10c] ss:$16 sps:$4 sm:$0xff]   ;;  %v3089_v17 = vld [vmem:[%s4443_s5 + $0x100] ss:$16 sps:$4 sm:$0xff]  }
  0x74   : > { %1114 = vmatprep.mubr.bf16.mxu0 %v3433_v22  ;;  %1196 = vmatprep.mubr.bf16.mxu1 %v3433_v22 }
  0x76   : > { %1085 = vmatpush1.bf16.msra.mxu0 %v2999_v18  ;;  %1167 = vmatpush1.bf16.msra.mxu1 %v3002_v19  ;;  %v3092_v18 = vld [vmem:[%s4443_s5 + $0x108] ss:$16 sps:$4 sm:$0xff]   ;;  %v3097_v19 = vld [vmem:[%s4443_s5 + $0x124] ss:$16 sps:$4 sm:$0xff]  }
  0x77   : > { %1086 = vmatprep.subr.bf16.mxu0 %v3007_v20  ;;  %1168 = vmatprep.subr.bf16.mxu1 %v3010_v21  ;;  %v3100_v20 = vld [vmem:[%s4443_s5 + $0x12c] ss:$16 sps:$4 sm:$0xff]   ;;  %v3095_v21 = vld [vmem:[%s4443_s5 + $0x120] ss:$16 sps:$4 sm:$0xff]  }
  0x7a   : > { %1087 = vmatpush1.bf16.msra.mxu0 %v3005_v23  ;;  %1169 = vmatpush1.bf16.msra.mxu1 %v3008_v24  ;;  %v3098_v23 = vld [vmem:[%s4443_s5 + $0x128] ss:$16 sps:$4 sm:$0xff]   ;;  %v3103_v24 = vld [vmem:[%s4443_s5 + $0x144] ss:$16 sps:$4 sm:$0xff]  }
  0x7b   : > { %1088 = vmatprep.subr.bf16.mxu0 %v3013_v25  ;;  %1170 = vmatprep.subr.bf16.mxu1 %v3016_v26  ;;  %v3106_v25 = vld [vmem:[%s4443_s5 + $0x14c] ss:$16 sps:$4 sm:$0xff]   ;;  %v3101_v26 = vld [vmem:[%s4443_s5 + $0x140] ss:$16 sps:$4 sm:$0xff]  }
  0x7e   : > { %1089 = vmatpush1.bf16.msra.mxu0 %v3011_v27  ;;  %1171 = vmatpush1.bf16.msra.mxu1 %v3014_v28  ;;  %v3104_v27 = vld [vmem:[%s4443_s5 + $0x148] ss:$16 sps:$4 sm:$0xff]   ;;  %v3109_v28 = vld [vmem:[%s4443_s5 + $0x164] ss:$16 sps:$4 sm:$0xff]  }
  0x7f   : > { %1090 = vmatprep.subr.bf16.mxu0 %v3019_v29  ;;  %1172 = vmatprep.subr.bf16.mxu1 %v3022_v30  ;;  %v3112_v29 = vld [vmem:[%s4443_s5 + $0x16c] ss:$16 sps:$4 sm:$0xff]   ;;  %v3107_v30 = vld [vmem:[%s4443_s5 + $0x160] ss:$16 sps:$4 sm:$0xff]  }
  0x82   : > { %1091 = vmatpush1.bf16.msra.mxu0 %v3017_v31  ;;  %1173 = vmatpush1.bf16.msra.mxu1 %v3020_v32  ;;  %v3110_v31 = vld [vmem:[%s4443_s5 + $0x168] ss:$16 sps:$4 sm:$0xff]   ;;  %v3115_v32 = vld [vmem:[%s4443_s5 + $0x184] ss:$16 sps:$4 sm:$0xff]  }
  0x83   : > { %1092 = vmatprep.subr.bf16.mxu0 %v3025_v33  ;;  %1174 = vmatprep.subr.bf16.mxu1 %v3028_v34  ;;  %v3118_v33 = vld [vmem:[%s4443_s5 + $0x18c] ss:$16 sps:$4 sm:$0xff]   ;;  %v3113_v34 = vld [vmem:[%s4443_s5 + $0x180] ss:$16 sps:$4 sm:$0xff]  }
  0x86   : > { %1093 = vmatpush1.bf16.msra.mxu0 %v3023_v35  ;;  %1175 = vmatpush1.bf16.msra.mxu1 %v3026_v36  ;;  %v3116_v35 = vld [vmem:[%s4443_s5 + $0x188] ss:$16 sps:$4 sm:$0xff]   ;;  %v3121_v36 = vld [vmem:[%s4443_s5 + $0x1a4] ss:$16 sps:$4 sm:$0xff]  }
  0x87   : > { %1094 = vmatprep.subr.bf16.mxu0 %v3031_v37  ;;  %1176 = vmatprep.subr.bf16.mxu1 %v3034_v38  ;;  %v3119_v37 = vld [vmem:[%s4443_s5 + $0x1a0] ss:$16 sps:$4 sm:$0xff]   ;;  %v3122_v38 = vld [vmem:[%s4443_s5 + $0x1a8] ss:$16 sps:$4 sm:$0xff]  }
  0x8a   : > { %1095 = vmatpush1.bf16.msra.mxu0 %v3029_v39  ;;  %1177 = vmatpush1.bf16.msra.mxu1 %v3032_v40  ;;  %v3124_v39 = vld [vmem:[%s4443_s5 + $0x1ac] ss:$16 sps:$4 sm:$0xff]   ;;  %v3127_v40 = vld [vmem:[%s4443_s5 + $0x1c4] ss:$16 sps:$4 sm:$0xff]  }
  0x8b   : > { %1096 = vmatprep.subr.bf16.mxu0 %v3037_v41  ;;  %1178 = vmatprep.subr.bf16.mxu1 %v3040_v42  ;;  %v3130_v41 = vld [vmem:[%s4443_s5 + $0x1cc] ss:$16 sps:$4 sm:$0xff]  }
  0x8c   : > { %v1232_v42 = vld [vmem:[#allocation3 + $0x8] sm:$0xff] }
  0x8d   : > { %v1236_v45 = vpack.c.bf16 %v1232_v42, %v1232_v42  ;;  %v3157_v42 = vld [vmem:[%s4445_s7 + $0x64] ss:$16 sps:$4 sm:$0xff]  }
  0x8e   : > { %1097 = vmatpush1.bf16.msra.mxu0 %v3035_v43  ;;  %1179 = vmatpush1.bf16.msra.mxu1 %v3038_v44  ;;  %v3125_v43 = vld [vmem:[%s4443_s5 + $0x1c0] ss:$16 sps:$4 sm:$0xff]   ;;  %v3128_v44 = vld [vmem:[%s4443_s5 + $0x1c8] ss:$16 sps:$4 sm:$0xff]  }
  0x8f   : > { %1643 = vmatprep.subr.bf16.mxu0 %v3043_v46  ;;  %1684 = vmatprep.subr.bf16.mxu1 %v3046_v47  ;;  %v3133_v46 = vld [vmem:[%s4443_s5 + $0x1e4] ss:$16 sps:$4 sm:$0xff]   ;;  %v3136_v47 = vld [vmem:[%s4443_s5 + $0x1ec] ss:$16 sps:$4 sm:$0xff]  }
  0x91   : > { %1115 = vmatmul.mubr.bf16.vlgmr.msra.gmra.mrb[0].mxu0 %v442_v50  ;;  %1197 = vmatmul.mubr.bf16.vlgmr.msra.gmra.mrb[0].mxu1 %v442_v50  ;;  %v3139_v50 = vld [vmem:[%s4445_s7 + $0x4] ss:$16 sps:$4 sm:$0xff]  }
  0x92   : > { %1644 = vmatpush1.bf16.msra.mxu0 %v3041_v48  ;;  %1685 = vmatpush1.bf16.msra.mxu1 %v3044_v49  ;;  %v3131_v48 = vld [vmem:[%s4443_s5 + $0x1e0] ss:$16 sps:$4 sm:$0xff]   ;;  %v3134_v49 = vld [vmem:[%s4443_s5 + $0x1e8] ss:$16 sps:$4 sm:$0xff]  }
  0x93   : > { %1645 = vmatprep.subr.bf16.mxu0 %v3049_v51  ;;  %1686 = vmatprep.subr.bf16.mxu1 %v3052_v52  ;;  %v3142_v51 = vld [vmem:[%s4445_s7 + $0xc] ss:$16 sps:$4 sm:$0xff]   ;;  %v541_v52 = vlaneseq }
  0x94   : > { %1675 = vmatprep.mubr.bf16.mxu0 %v1236_v45  ;;  %1716 = vmatprep.mubr.bf16.mxu1 %v1236_v45  ;;  %v3158_v45 = vld [vmem:[%s4445_s7 + $0x68] ss:$16 sps:$4 sm:$0xff]  }
  0x96   : > { %1646 = vmatpush1.bf16.msra.mxu0 %v3047_v53  ;;  %1687 = vmatpush1.bf16.msra.mxu1 %v3050_v54  ;;  %v542_v53 = vshrl.u32 %v541_v52, 7  ;;  %v3167_v52 = vld [vmem:[%s4445_s7 + $0xa0] ss:$16 sps:$4 sm:$0xff]  }
  0x97   : > { %1647 = vmatprep.subr.bf16.mxu0 %v3055_v55  ;;  %1688 = vmatprep.subr.bf16.mxu1 %v3058_v56  ;;  %v539_v55 = vld [vmem:[%s4470_s4] sm:$0xf] }
  0x98   : > { %v4077_v54 = vsub.s32 0, %v542_v53  ;;  %v4082_v56 = vsub.s32 1, %v542_v53 }
  0x9a   : > { %1648 = vmatpush1.bf16.msra.mxu0 %v3053_v57  ;;  %1689 = vmatpush1.bf16.msra.mxu1 %v3056_v58  ;;  %v544_v57 = vrot.slane %v539_v55, %v4077_v54  ;;  %v548_v58 = vrot.slane %v539_v55, %v4082_v56 }
  0x9b   : > { %1649 = vmatprep.subr.bf16.mxu0 %v3061_v59  ;;  %1690 = vmatprep.subr.bf16.mxu1 %v3064_v60 }
  0x9e   : > { %1650 = vmatpush1.bf16.msra.mxu0 %v3059_v61  ;;  %1691 = vmatpush1.bf16.msra.mxu1 %v3062_v62  ;;  %v4086_v61 = vsub.s32 3, %v542_v53 }
  0x9f   : > { %1651 = vmatprep.subr.bf16.mxu0 %v3067_v63  ;;  %1692 = vmatprep.subr.bf16.mxu1 %v3070_v0 }
  0xa2   : > { %1652 = vmatpush1.bf16.msra.mxu0 %v3065_v1  ;;  %1693 = vmatpush1.bf16.msra.mxu1 %v3068_v2 }
  0xa3   : > { %1653 = vmatprep.subr.bf16.mxu0 %v3073_v3  ;;  %1694 = vmatprep.subr.bf16.mxu1 %v3076_v4 }
  0xa6   : > { %1654 = vmatpush1.bf16.msra.mxu0 %v3071_v5  ;;  %1695 = vmatpush1.bf16.msra.mxu1 %v3074_v6 }
  0xa7   : > { %1655 = vmatprep.subr.bf16.mxu0 %v3079_v7  ;;  %1696 = vmatprep.subr.bf16.mxu1 %v3082_v8  ;;  %v556_v8 = vrot.slane %v539_v55, %v4086_v61 }
  0xaa   : > { %1656 = vmatpush1.bf16.msra.mxu0 %v3077_v9  ;;  %1697 = vmatpush1.bf16.msra.mxu1 %v3080_v10  ;;  %v4089_v9 = vsub.s32 2, %v542_v53  ;;  %v3170_v53 = vld [vmem:[%s4445_s7 + $0xa8] ss:$16 sps:$4 sm:$0xff]  }
  0xab   : > { %1657 = vmatprep.subr.bf16.mxu0 %v3085_v11  ;;  %1698 = vmatprep.subr.bf16.mxu1 %v3088_v12 }
  0xac   : > { %v552_v11 = vrot.slane %v539_v55, %v4089_v9  ;;  %v3175_v55 = vld [vmem:[%s4445_s7 + $0xc4] ss:$16 sps:$4 sm:$0xff]  }
  0xae   : > { %1658 = vmatpush1.bf16.msra.mxu0 %v3083_v13  ;;  %1699 = vmatpush1.bf16.msra.mxu1 %v3086_v14 }
  0xaf   : > { %1659 = vmatprep.subr.bf16.mxu0 %v3091_v15  ;;  %1700 = vmatprep.subr.bf16.mxu1 %v3094_v16 }
  0xb2   : > { %1660 = vmatpush1.bf16.msra.mxu0 %v3089_v17  ;;  %1701 = vmatpush1.bf16.msra.mxu1 %v3092_v18 }
  0xb3   : > { %1661 = vmatprep.subr.bf16.mxu0 %v3097_v19  ;;  %1702 = vmatprep.subr.bf16.mxu1 %v3100_v20  ;;  %v439_v20 = vld [vmem:[#allocation4] sm:$0xff] }
  0xb6   : > { %1662 = vmatpush1.bf16.msra.mxu0 %v3095_v21  ;;  %1703 = vmatpush1.bf16.msra.mxu1 %v3098_v23 }
  0xb7   : > { %1663 = vmatprep.subr.bf16.mxu0 %v3103_v24  ;;  %1704 = vmatprep.subr.bf16.mxu1 %v3106_v25 }
  0xba   : > { %1664 = vmatpush1.bf16.msra.mxu0 %v3101_v26  ;;  %1705 = vmatpush1.bf16.msra.mxu1 %v3104_v27 }
  0xbb   : > { %1665 = vmatprep.subr.bf16.mxu0 %v3109_v28  ;;  %1706 = vmatprep.subr.bf16.mxu1 %v3112_v29 }
  0xbe   : > { %1666 = vmatpush1.bf16.msra.mxu0 %v3107_v30  ;;  %1707 = vmatpush1.bf16.msra.mxu1 %v3110_v31  ;;  %v3137_v31 = vld [vmem:[%s4445_s7] ss:$16 sps:$4 sm:$0xff]  }
  0xbf   : > { %1667 = vmatprep.subr.bf16.mxu0 %v3115_v32  ;;  %1708 = vmatprep.subr.bf16.mxu1 %v3118_v33  ;;  %v3140_v32 = vld [vmem:[%s4445_s7 + $0x8] ss:$16 sps:$4 sm:$0xff]  }
  0xc2   : > { %1668 = vmatpush1.bf16.msra.mxu0 %v3113_v34  ;;  %1709 = vmatpush1.bf16.msra.mxu1 %v3116_v35  ;;  %v3145_v34 = vld [vmem:[%s4445_s7 + $0x24] ss:$16 sps:$4 sm:$0xff]   ;;  %v3148_v35 = vld [vmem:[%s4445_s7 + $0x2c] ss:$16 sps:$4 sm:$0xff]  }
  0xc3   : > { %1669 = vmatprep.subr.bf16.mxu0 %v3121_v36  ;;  %1710 = vmatprep.subr.bf16.mxu1 %v3124_v39  ;;  %v3143_v36 = vld [vmem:[%s4445_s7 + $0x20] ss:$16 sps:$4 sm:$0xff]   ;;  %v3154_v39 = vld [vmem:[%s4445_s7 + $0x4c] ss:$16 sps:$4 sm:$0xff]  }
  0xc6   : > { %1670 = vmatpush1.bf16.msra.mxu0 %v3119_v37  ;;  %1711 = vmatpush1.bf16.msra.mxu1 %v3122_v38  ;;  %v3146_v37 = vld [vmem:[%s4445_s7 + $0x28] ss:$16 sps:$4 sm:$0xff]   ;;  %v3151_v38 = vld [vmem:[%s4445_s7 + $0x44] ss:$16 sps:$4 sm:$0xff]  }
  0xc7   : > { %1671 = vmatprep.subr.bf16.mxu0 %v3127_v40  ;;  %1712 = vmatprep.subr.bf16.mxu1 %v3130_v41  ;;  %v3149_v40 = vld [vmem:[%s4445_s7 + $0x40] ss:$16 sps:$4 sm:$0xff]   ;;  %v3152_v41 = vld [vmem:[%s4445_s7 + $0x48] ss:$16 sps:$4 sm:$0xff]  }
  0xca   : > { %1672 = vmatpush1.bf16.msra.mxu0 %v3125_v43  ;;  %1713 = vmatpush1.bf16.msra.mxu1 %v3128_v44  ;;  %v3160_v43 = vld [vmem:[%s4445_s7 + $0x6c] ss:$16 sps:$4 sm:$0xff]   ;;  %v3155_v44 = vld [vmem:[%s4445_s7 + $0x60] ss:$16 sps:$4 sm:$0xff]  }
  0xcb   : > { %1673 = vmatprep.subr.bf16.mxu0 %v3133_v46  ;;  %1714 = vmatprep.subr.bf16.mxu1 %v3136_v47  ;;  %v3163_v46 = vld [vmem:[%s4445_s7 + $0x84] ss:$16 sps:$4 sm:$0xff]   ;;  %v3166_v47 = vld [vmem:[%s4445_s7 + $0x8c] ss:$16 sps:$4 sm:$0xff]  }
  0xce   : > { %1674 = vmatpush1.bf16.msra.mxu0 %v3131_v48  ;;  %1715 = vmatpush1.bf16.msra.mxu1 %v3134_v49  ;;  %v3161_v48 = vld [vmem:[%s4445_s7 + $0x80] ss:$16 sps:$4 sm:$0xff]   ;;  %v3164_v49 = vld [vmem:[%s4445_s7 + $0x88] ss:$16 sps:$4 sm:$0xff]  }
  0xcf   : > { %2163 = vmatprep.subr.bf16.mxu0 %v3139_v50  ;;  %2204 = vmatprep.subr.bf16.mxu1 %v3142_v51  ;;  %v3169_v50 = vld [vmem:[%s4445_s7 + $0xa4] ss:$16 sps:$4 sm:$0xff]   ;;  %v3172_v51 = vld [vmem:[%s4445_s7 + $0xac] ss:$16 sps:$4 sm:$0xff]  }
 0x164   : > { %v1116_v59 = vpop.f32.mrb[0].mxu0  ;;  %v1198_v60 = vpop.f32.mrb[0].mxu1 }
 0x165   : > { %v2829_v62 = vadd.f32 %v1116_v59, %v544_v57  ;;  %v1118_v63 = vpop.f32.mrb[1].mxu0  ;;  %v1200_v0 = vpop.f32.mrb[1].mxu1  ;;  %v2831_v13 = vadd.f32 %v1198_v60, %v552_v11  ;;  %v3178_v57 = vld [vmem:[%s4445_s7 + $0xcc] ss:$16 sps:$4 sm:$0xff]   ;;  %v3176_v59 = vld [vmem:[%s4445_s7 + $0xc8] ss:$16 sps:$4 sm:$0xff]  }
 0x166   : > { %v2830_v1 = vadd.f32 %v1118_v63, %v548_v58  ;;  %v1120_v2 = vpop.f32.mrb[2].mxu0  ;;  %v1202_v3 = vpop.f32.mrb[2].mxu1  ;;  %v2832_v10 = vadd.f32 %v1200_v0, %v556_v8  ;;  %v3173_v58 = vld [vmem:[%s4445_s7 + $0xc0] ss:$16 sps:$4 sm:$0xff]   ;;  %v3181_v60 = vld [vmem:[%s4445_s7 + $0xe4] ss:$16 sps:$4 sm:$0xff]  }
 0x167   : > { %v2663_v4 = vmul.f32 -1.442695, %v2829_v62  ;;  %v1121_v5 = vpop.f32.mrb[3].mxu0  ;;  %v1203_v6 = vpop.f32.mrb[3].mxu1  ;;  %v3184_v62 = vld [vmem:[%s4445_s7 + $0xec] ss:$16 sps:$4 sm:$0xff]  }
 0x168   : > { %v2664_v7 = vmul.f32 -1.442695, %v2830_v1  ;;  %v2665_v12 = vmul.f32 -1.442695, %v2832_v10  ;;  %v3179_v63 = vld [vmem:[%s4445_s7 + $0xe0] ss:$16 sps:$4 sm:$0xff]  }
 0x169   : > { %3257 = vpow2.f32 %v2663_v4  ;;  %v3182_v0 = vld [vmem:[%s4445_s7 + $0xe8] ss:$16 sps:$4 sm:$0xff]   ;;  %v3187_v1 = vld [vmem:[%s4445_s7 + $0x104] ss:$16 sps:$4 sm:$0xff]   ;;  %v3190_v2 = vld [vmem:[%s4445_s7 + $0x10c] ss:$16 sps:$4 sm:$0xff]  }
 0x16a   : > { %3259 = vpow2.f32 %v2664_v7  ;;  %v3185_v3 = vld [vmem:[%s4445_s7 + $0x100] ss:$16 sps:$4 sm:$0xff]   ;;  %v3188_v4 = vld [vmem:[%s4445_s7 + $0x108] ss:$16 sps:$4 sm:$0xff]   ;;  %v3193_v5 = vld [vmem:[%s4445_s7 + $0x124] ss:$16 sps:$4 sm:$0xff]  }
 0x16b   : > { %3261 = vpow2.f32 %v2665_v12  ;;  %v3196_v6 = vld [vmem:[%s4445_s7 + $0x12c] ss:$16 sps:$4 sm:$0xff]   ;;  %v3191_v7 = vld [vmem:[%s4445_s7 + $0x120] ss:$16 sps:$4 sm:$0xff]   ;;  %v3194_v8 = vld [vmem:[%s4445_s7 + $0x128] ss:$16 sps:$4 sm:$0xff]  }
 0x16c   : > { %3263 = vtanh.f32 %v2831_v13  ;;  %v3199_v10 = vld [vmem:[%s4445_s7 + $0x144] ss:$16 sps:$4 sm:$0xff]   ;;  %v3202_v11 = vld [vmem:[%s4445_s7 + $0x14c] ss:$16 sps:$4 sm:$0xff]   ;;  %v3197_v12 = vld [vmem:[%s4445_s7 + $0x140] ss:$16 sps:$4 sm:$0xff]  }
 0x16d   : > { %v3200_v13 = vld [vmem:[%s4445_s7 + $0x148] ss:$16 sps:$4 sm:$0xff]  }
 0x173   : > { %v3258_v14 = vpop.eup %3257 }
 0x174   : > { %v3260_v15 = vpop.eup %3259  ;;  %v1208_v16 = vadd.f32 1.0, %v3258_v14  ;;  %v3205_v14 = vld [vmem:[%s4445_s7 + $0x164] ss:$16 sps:$4 sm:$0xff]  }
 0x175   : > { %v1214_v17 = vadd.f32 1.0, %v3260_v15  ;;  %v3262_v18 = vpop.eup %3261  ;;  %v3208_v15 = vld [vmem:[%s4445_s7 + $0x16c] ss:$16 sps:$4 sm:$0xff]  }
 0x176   : > { %3265 = vrcp.f32 %v1208_v16  ;;  %v3264_v19 = vpop.eup %3263  ;;  %v1221_v25 = vadd.f32 1.0, %v3262_v18  ;;  %v3203_v16 = vld [vmem:[%s4445_s7 + $0x160] ss:$16 sps:$4 sm:$0xff]   ;;  %v3211_v18 = vld [vmem:[%s4445_s7 + $0x184] ss:$16 sps:$4 sm:$0xff]  }
 0x177   : > { %3267 = vrcp.f32 %v1214_v17  ;;  %v3206_v17 = vld [vmem:[%s4445_s7 + $0x168] ss:$16 sps:$4 sm:$0xff]  }
 0x178   : > { %3269 = vrcp.f32 %v1221_v25  ;;  %v3218_v25 = vld [vmem:[%s4445_s7 + $0x1a8] ss:$16 sps:$4 sm:$0xff]  }
 0x180   : > { %v3266_v21 = vpop.eup %3265 }
 0x181   : > { %v3268_v23 = vpop.eup %3267  ;;  %v1225_v24 = vmul.f32 %v3266_v21, %v3264_v19  ;;  %v3214_v19 = vld [vmem:[%s4445_s7 + $0x18c] ss:$16 sps:$4 sm:$0xff]   ;;  %v3212_v21 = vld [vmem:[%s4445_s7 + $0x188] ss:$16 sps:$4 sm:$0xff]  }
 0x182   : > { %v1224_v26 = vmul.f32 %v3268_v23, %v439_v20  ;;  %v3270_v28 = vpop.eup %3269  ;;  %v3209_v20 = vld [vmem:[%s4445_s7 + $0x180] ss:$16 sps:$4 sm:$0xff]   ;;  %v3217_v23 = vld [vmem:[%s4445_s7 + $0x1a4] ss:$16 sps:$4 sm:$0xff]  }
 0x184   : > { %v1226_v27 = vadd.f32 %v1225_v24, %v1224_v26  ;;  %v3215_v24 = vld [vmem:[%s4445_s7 + $0x1a0] ss:$16 sps:$4 sm:$0xff]   ;;  %v3220_v26 = vld [vmem:[%s4445_s7 + $0x1ac] ss:$16 sps:$4 sm:$0xff]  }
 0x186   : > { %3271 = vtanh.f32 %v1226_v27  ;;  %1230 = vst [vmem:[#allocation4] sm:$0xff] %v1226_v27  ;;  %v3223_v27 = vld [vmem:[%s4445_s7 + $0x1c4] ss:$16 sps:$4 sm:$0xff]  }
 0x190   : > { %v3272_v29 = vpop.eup %3271 }
 0x191   : > { %v1228_v30 = vmul.f32 %v3272_v29, %v3270_v28  ;;  %v3226_v28 = vld [vmem:[%s4445_s7 + $0x1cc] ss:$16 sps:$4 sm:$0xff]   ;;  %v1752_v29 = vld [vmem:[#allocation3 + $0x10] sm:$0xff] }
 0x193   : > { %1229 = vst [vmem:[#allocation3] sm:$0xff] %v1228_v30  ;;  %v1235_v33 = vpack.c.bf16 %v1228_v30, %v1228_v30  ;;  %v3221_v30 = vld [vmem:[%s4445_s7 + $0x1c0] ss:$16 sps:$4 sm:$0xff]  }
 0x195   : > { %1676 = vmatmul.mubr.bf16.vlgmr.msra.gmra.mrb[4].mxu0 %v1235_v33  ;;  %1717 = vmatmul.mubr.bf16.vlgmr.msra.gmra.mrb[4].mxu1 %v1235_v33  ;;  %v3229_v33 = vld [vmem:[%s4445_s7 + $0x1e4] ss:$16 sps:$4 sm:$0xff]  }
 0x196   : > { %2164 = vmatpush1.bf16.msra.mxu0 %v3137_v31  ;;  %2205 = vmatpush1.bf16.msra.mxu1 %v3140_v32  ;;  %v3224_v31 = vld [vmem:[%s4445_s7 + $0x1c8] ss:$16 sps:$4 sm:$0xff]   ;;  %v1756_v32 = vpack.c.bf16 %v1752_v29, %v1752_v29 }
 0x197   : > { %2165 = vmatprep.subr.bf16.mxu0 %v3145_v34  ;;  %2206 = vmatprep.subr.bf16.mxu1 %v3148_v35  ;;  %v3232_v34 = vld [vmem:[%s4445_s7 + $0x1ec] ss:$16 sps:$4 sm:$0xff]   ;;  %v3227_v35 = vld [vmem:[%s4445_s7 + $0x1e0] ss:$16 sps:$4 sm:$0xff]  }
 0x198   : > { %2195 = vmatprep.mubr.bf16.mxu0 %v1756_v32  ;;  %2236 = vmatprep.mubr.bf16.mxu1 %v1756_v32  ;;  %v3254_v29 = vld [vmem:[%s4447_s9 + $0x70] ss:$8 sps:$4 sm:$0xff]  }
 0x19a   : > { %2166 = vmatpush1.bf16.msra.mxu0 %v3143_v36  ;;  %2207 = vmatpush1.bf16.msra.mxu1 %v3146_v37  ;;  %v3230_v36 = vld [vmem:[%s4445_s7 + $0x1e8] ss:$16 sps:$4 sm:$0xff]   ;;  %v1301_v37 = vld [vmem:[%s4444_s6] sm:$0xf] }
 0x19b   : > { %2167 = vmatprep.subr.bf16.mxu0 %v3151_v38  ;;  %2208 = vmatprep.subr.bf16.mxu1 %v3154_v39  ;;  %v1306_v38 = vrot.slane %v1301_v37, %v4077_v54  ;;  %v1310_v39 = vrot.slane %v1301_v37, %v4082_v56 }
 0x19e   : > { %2168 = vmatpush1.bf16.msra.mxu0 %v3149_v40  ;;  %2209 = vmatpush1.bf16.msra.mxu1 %v3152_v41 }
 0x19f   : > { %2169 = vmatprep.subr.bf16.mxu0 %v3157_v42  ;;  %2210 = vmatprep.subr.bf16.mxu1 %v3160_v43 }
 0x1a2   : > { %2170 = vmatpush1.bf16.msra.mxu0 %v3155_v44  ;;  %2211 = vmatpush1.bf16.msra.mxu1 %v3158_v45 }
 0x1a3   : > { %2171 = vmatprep.subr.bf16.mxu0 %v3163_v46  ;;  %2212 = vmatprep.subr.bf16.mxu1 %v3166_v47 }
 0x1a6   : > { %2172 = vmatpush1.bf16.msra.mxu0 %v3161_v48  ;;  %2213 = vmatpush1.bf16.msra.mxu1 %v3164_v49 }
 0x1a7   : > { %2173 = vmatprep.subr.bf16.mxu0 %v3169_v50  ;;  %2214 = vmatprep.subr.bf16.mxu1 %v3172_v51 }
 0x1aa   : > { %2174 = vmatpush1.bf16.msra.mxu0 %v3167_v52  ;;  %2215 = vmatpush1.bf16.msra.mxu1 %v3170_v53  ;;  %v1318_v52 = vrot.slane %v1301_v37, %v4086_v61 }
 0x1ab   : > { %2175 = vmatprep.subr.bf16.mxu0 %v3175_v55  ;;  %2216 = vmatprep.subr.bf16.mxu1 %v3178_v57  ;;  %v1314_v55 = vrot.slane %v1301_v37, %v4089_v9 }
 0x1ae   : > { %2176 = vmatpush1.bf16.msra.mxu0 %v3173_v58  ;;  %2217 = vmatpush1.bf16.msra.mxu1 %v3176_v59 }
 0x1af   : > { %2177 = vmatprep.subr.bf16.mxu0 %v3181_v60  ;;  %2218 = vmatprep.subr.bf16.mxu1 %v3184_v62 }
 0x1b2   : > { %2178 = vmatpush1.bf16.msra.mxu0 %v3179_v63  ;;  %2219 = vmatpush1.bf16.msra.mxu1 %v3182_v0 }
 0x1b3   : > { %2179 = vmatprep.subr.bf16.mxu0 %v3187_v1  ;;  %2220 = vmatprep.subr.bf16.mxu1 %v3190_v2  ;;  %v1234_v2 = vld [vmem:[#allocation4 + $0x8] sm:$0xff] }
 0x1b6   : > { %2180 = vmatpush1.bf16.msra.mxu0 %v3185_v3  ;;  %2221 = vmatpush1.bf16.msra.mxu1 %v3188_v4 }
 0x1b7   : > { %2181 = vmatprep.subr.bf16.mxu0 %v3193_v5  ;;  %2222 = vmatprep.subr.bf16.mxu1 %v3196_v6 }
 0x1ba   : > { %2182 = vmatpush1.bf16.msra.mxu0 %v3191_v7  ;;  %2223 = vmatpush1.bf16.msra.mxu1 %v3194_v8 }
 0x1bb   : > { %2183 = vmatprep.subr.bf16.mxu0 %v3199_v10  ;;  %2224 = vmatprep.subr.bf16.mxu1 %v3202_v11 }
 0x1be   : > { %2184 = vmatpush1.bf16.msra.mxu0 %v3197_v12  ;;  %2225 = vmatpush1.bf16.msra.mxu1 %v3200_v13 }
 0x1bf   : > { %2185 = vmatprep.subr.bf16.mxu0 %v3205_v14  ;;  %2226 = vmatprep.subr.bf16.mxu1 %v3208_v15  ;;  %v3235_v14 = vld [vmem:[%s4447_s9 + $0x4] ss:$8 sps:$4 sm:$0xff]   ;;  %v3233_v15 = vld [vmem:[%s4447_s9] ss:$8 sps:$4 sm:$0xff]  }
 0x1c2   : > { %2186 = vmatpush1.bf16.msra.mxu0 %v3203_v16  ;;  %2227 = vmatpush1.bf16.msra.mxu1 %v3206_v17  ;;  %v3238_v16 = vld [vmem:[%s4447_s9 + $0x14] ss:$8 sps:$4 sm:$0xff]   ;;  %v3236_v17 = vld [vmem:[%s4447_s9 + $0x10] ss:$8 sps:$4 sm:$0xff]  }
 0x1c3   : > { %2187 = vmatprep.subr.bf16.mxu0 %v3211_v18  ;;  %2228 = vmatprep.subr.bf16.mxu1 %v3214_v19  ;;  %v3239_v18 = vld [vmem:[%s4447_s9 + $0x20] ss:$8 sps:$4 sm:$0xff]   ;;  %v3244_v19 = vld [vmem:[%s4447_s9 + $0x34] ss:$8 sps:$4 sm:$0xff]  }
 0x1c6   : > { %2188 = vmatpush1.bf16.msra.mxu0 %v3209_v20  ;;  %2229 = vmatpush1.bf16.msra.mxu1 %v3212_v21  ;;  %v3242_v20 = vld [vmem:[%s4447_s9 + $0x30] ss:$8 sps:$4 sm:$0xff]   ;;  %v3247_v21 = vld [vmem:[%s4447_s9 + $0x44] ss:$8 sps:$4 sm:$0xff]  }
 0x1c7   : > { %2189 = vmatprep.subr.bf16.mxu0 %v3217_v23  ;;  %2230 = vmatprep.subr.bf16.mxu1 %v3220_v26  ;;  %v3245_v23 = vld [vmem:[%s4447_s9 + $0x40] ss:$8 sps:$4 sm:$0xff]   ;;  %v3253_v26 = vld [vmem:[%s4447_s9 + $0x64] ss:$8 sps:$4 sm:$0xff]  }
 0x1ca   : > { %2190 = vmatpush1.bf16.msra.mxu0 %v3215_v24  ;;  %2231 = vmatpush1.bf16.msra.mxu1 %v3218_v25  ;;  %v3250_v24 = vld [vmem:[%s4447_s9 + $0x54] ss:$8 sps:$4 sm:$0xff]   ;;  %v3248_v25 = vld [vmem:[%s4447_s9 + $0x50] ss:$8 sps:$4 sm:$0xff]  }
 0x1cb   : > { %2191 = vmatprep.subr.bf16.mxu0 %v3223_v27  ;;  %2232 = vmatprep.subr.bf16.mxu1 %v3226_v28  ;;  %v3251_v27 = vld [vmem:[%s4447_s9 + $0x60] ss:$8 sps:$4 sm:$0xff]   ;;  %v3256_v28 = vld [vmem:[%s4447_s9 + $0x74] ss:$8 sps:$4 sm:$0xff]  }
 0x1ce   : > { %2192 = vmatpush1.bf16.msra.mxu0 %v3221_v30  ;;  %2233 = vmatpush1.bf16.msra.mxu1 %v3224_v31  ;;  %v1821_v30 = vld [vmem:[%s4446_s8] sm:$0xf] }
 0x1cf   : > { %2193 = vmatprep.subr.bf16.mxu0 %v3229_v33  ;;  %2234 = vmatprep.subr.bf16.mxu1 %v3232_v34  ;;  %v1826_v31 = vrot.slane %v1821_v30, %v4077_v54  ;;  %v1830_v32 = vrot.slane %v1821_v30, %v4082_v56 }
 0x1d2   : > { %2194 = vmatpush1.bf16.msra.mxu0 %v3227_v35  ;;  %2235 = vmatpush1.bf16.msra.mxu1 %v3230_v36 }
 0x1d3   : > { %2380 = vmatprep.subr.bf16.mxu0 %v3235_v14 }
 0x268   : > { %v1677_v40 = vpop.f32.mrb[4].mxu0  ;;  %v1718_v41 = vpop.f32.mrb[4].mxu1 }
 0x269   : > { %v1678_v42 = vadd.f32 %v1677_v40, %v1306_v38  ;;  %v1679_v43 = vpop.f32.mrb[5].mxu0  ;;  %v1720_v44 = vpop.f32.mrb[5].mxu1  ;;  %v1719_v58 = vadd.f32 %v1718_v41, %v1314_v55 }
 0x26a   : > { %v1680_v45 = vadd.f32 %v1679_v43, %v1310_v39  ;;  %v1681_v46 = vpop.f32.mrb[6].mxu0  ;;  %v1722_v47 = vpop.f32.mrb[6].mxu1  ;;  %v1721_v53 = vadd.f32 %v1720_v44, %v1318_v52 }
 0x26b   : > { %v2730_v48 = vmul.f32 -1.442695, %v1678_v42  ;;  %v1682_v49 = vpop.f32.mrb[7].mxu0  ;;  %v1723_v50 = vpop.f32.mrb[7].mxu1  ;;  %v1834_v47 = vrot.slane %v1821_v30, %v4089_v9 }
 0x26c   : > { %v2731_v51 = vmul.f32 -1.442695, %v1680_v45  ;;  %v2732_v57 = vmul.f32 -1.442695, %v1721_v53  ;;  %v1838_v45 = vrot.slane %v1821_v30, %v4086_v61 }
 0x26d   : > { %3273 = vpow2.f32 %v2730_v48 }
 0x26e   : > { %3275 = vpow2.f32 %v2731_v51 }
 0x26f   : > { %3277 = vpow2.f32 %v2732_v57 }
 0x270   : > { %3279 = vtanh.f32 %v1719_v58  ;;  %v1754_v58 = vld [vmem:[#allocation4 + $0x10] sm:$0xff] }
 0x277   : > { %v3274_v59 = vpop.eup %3273 }
 0x278   : > { %v3276_v60 = vpop.eup %3275  ;;  %v1728_v62 = vadd.f32 1.0, %v3274_v59 }
 0x279   : > { %v1734_v63 = vadd.f32 1.0, %v3276_v60  ;;  %v3278_v0 = vpop.eup %3277 }
 0x27a   : > { %3281 = vrcp.f32 %v1728_v62  ;;  %v3280_v1 = vpop.eup %3279  ;;  %v1741_v6 = vadd.f32 1.0, %v3278_v0 }
 0x27b   : > { %3283 = vrcp.f32 %v1734_v63 }
 0x27c   : > { %3285 = vrcp.f32 %v1741_v6 }
 0x284   : > { %v3282_v3 = vpop.eup %3281 }
 0x285   : > { %v3284_v4 = vpop.eup %3283  ;;  %v1745_v5 = vmul.f32 %v3282_v3, %v3280_v1 }
 0x286   : > { %v1744_v7 = vmul.f32 %v3284_v4, %v1234_v2  ;;  %v3286_v10 = vpop.eup %3285  ;;  %v2288_v4 = vld [vmem:[%s4448_s10] sm:$0x3] }
 0x287   : > { %v2297_v6 = vrot.slane %v2288_v4, %v4082_v56 }
 0x288   : > { %v1746_v8 = vadd.f32 %v1745_v5, %v1744_v7  ;;  %v2293_v5 = vrot.slane %v2288_v4, %v4077_v54 }
 0x28a   : > { %3287 = vtanh.f32 %v1746_v8  ;;  %1750 = vst [vmem:[#allocation4 + $0x8] sm:$0xff] %v1746_v8 }
 0x294   : > { %v3288_v11 = vpop.eup %3287 }
 0x295   : > { %v1748_v12 = vmul.f32 %v3288_v11, %v3286_v10 }
 0x297   : > { %1749 = vst [vmem:[#allocation3 + $0x8] sm:$0xff] %v1748_v12  ;;  %v1755_v13 = vpack.c.bf16 %v1748_v12, %v1748_v12 }
 0x299   : > { %2196 = vmatmul.mubr.bf16.vlgmr.msra.gmra.mrb[8].mxu0 %v1755_v13  ;;  %2237 = vmatmul.mubr.bf16.vlgmr.msra.gmra.mrb[8].mxu1 %v1755_v13 }
 0x29a   : > { %2412 = vmatprep.mubr.bf16.mxu0 %v3433_v22  ;;  %2381 = vmatpush1.bf16.msra.mxu0 %v3233_v15  ;;  %v3241_v22 = vld [vmem:[%s4447_s9 + $0x24] ss:$8 sps:$4 sm:$0xff]  }
 0x29b   : > { %2382 = vmatprep.subr.bf16.mxu0 %v3238_v16 }
 0x29e   : > { %2383 = vmatpush1.bf16.msra.mxu0 %v3236_v17 }
 0x29f   : > { %2384 = vmatprep.subr.bf16.mxu0 %v3241_v22 }
 0x2a2   : > { %2385 = vmatpush1.bf16.msra.mxu0 %v3239_v18 }
 0x2a3   : > { %2386 = vmatprep.subr.bf16.mxu0 %v3244_v19  ;;  %v2441_v19 = vld [vmem:[#allocation3] sm:$0xff] (!%p2818_p11) }
 0x2a4   : > { %2444 = vst [vmem:[#allocation7] sm:$0xff] (!%p2818_p11), %v2441_v19 }
 0x2a6   : > { %2387 = vmatpush1.bf16.msra.mxu0 %v3242_v20  ;;  %v2442_v20 = vld [vmem:[#allocation3 + $0x8] sm:$0xff] (!%p2818_p11) }
 0x2a7   : > { %2388 = vmatprep.subr.bf16.mxu0 %v3247_v21  ;;  %2445 = vst [vmem:[#allocation7 + $0x8] sm:$0xff] (!%p2818_p11), %v2442_v20 }
 0x2aa   : > { %2389 = vmatpush1.bf16.msra.mxu0 %v3245_v23  ;;  %v2447_v23 = vld [vmem:[#allocation4] sm:$0xff] (!%p2818_p11) }
 0x2ab   : > { %2390 = vmatprep.subr.bf16.mxu0 %v3250_v24  ;;  %v2448_v24 = vld [vmem:[#allocation4 + $0x8] sm:$0xff] (!%p2818_p11)  ;;  %2450 = vst [vmem:[#allocation9] sm:$0xff] (!%p2818_p11), %v2447_v23 }
 0x2ac   : > { %2451 = vst [vmem:[#allocation9 + $0x8] sm:$0xff] (!%p2818_p11), %v2448_v24 }
 0x2ae   : > { %2391 = vmatpush1.bf16.msra.mxu0 %v3248_v25 }
 0x2af   : > { %2392 = vmatprep.subr.bf16.mxu0 %v3253_v26 }
 0x2b2   : > { %2393 = vmatpush1.bf16.msra.mxu0 %v3251_v27 }
 0x2b3   : > { %2394 = vmatprep.subr.bf16.mxu0 %v3256_v28 }
 0x2b6   : > { %2395 = vmatpush1.bf16.msra.mxu0 %v3254_v29 }
 0x36c   : > { %v2197_v33 = vpop.f32.mrb[8].mxu0  ;;  %v2238_v34 = vpop.f32.mrb[8].mxu1 }
 0x36d   : > { %v2198_v35 = vadd.f32 %v2197_v33, %v1826_v31  ;;  %v2199_v36 = vpop.f32.mrb[9].mxu0  ;;  %v2240_v37 = vpop.f32.mrb[9].mxu1  ;;  %v2239_v49 = vadd.f32 %v2238_v34, %v1834_v47 }
 0x36e   : > { %v2200_v38 = vadd.f32 %v2199_v36, %v1830_v32  ;;  %v2201_v39 = vpop.f32.mrb[10].mxu0  ;;  %v2242_v40 = vpop.f32.mrb[10].mxu1  ;;  %v2241_v46 = vadd.f32 %v2240_v37, %v1838_v45 }
 0x36f   : > { %v2797_v41 = vmul.f32 -1.442695, %v2198_v35  ;;  %v2202_v42 = vpop.f32.mrb[11].mxu0  ;;  %v2243_v43 = vpop.f32.mrb[11].mxu1 }
 0x370   : > { %v2798_v44 = vmul.f32 -1.442695, %v2200_v38  ;;  %v2799_v48 = vmul.f32 -1.442695, %v2241_v46 }
 0x371   : > { %3289 = vpow2.f32 %v2797_v41 }
 0x372   : > { %3291 = vpow2.f32 %v2798_v44 }
 0x373   : > { %3293 = vpow2.f32 %v2799_v48 }
 0x374   : > { %3295 = vtanh.f32 %v2239_v49 }
 0x37b   : > { %v3290_v50 = vpop.eup %3289 }
 0x37c   : > { %v3292_v51 = vpop.eup %3291  ;;  %v2248_v52 = vadd.f32 1.0, %v3290_v50 }
 0x37d   : > { %v2254_v53 = vadd.f32 1.0, %v3292_v51  ;;  %v3294_v55 = vpop.eup %3293 }
 0x37e   : > { %3297 = vrcp.f32 %v2248_v52  ;;  %v3296_v57 = vpop.eup %3295  ;;  %v2261_v62 = vadd.f32 1.0, %v3294_v55 }
 0x37f   : > { %3299 = vrcp.f32 %v2254_v53 }
 0x380   : > { %3301 = vrcp.f32 %v2261_v62 }
 0x388   : > { %v3298_v59 = vpop.eup %3297 }
 0x389   : > { %v3300_v61 = vpop.eup %3299  ;;  %v2265_v60 = vmul.f32 %v3298_v59, %v3296_v57 }
 0x38a   : > { %v2264_v63 = vmul.f32 %v3300_v61, %v1754_v58  ;;  %v3302_v9 = vpop.eup %3301 }
 0x38c   : > { %v2266_v0 = vadd.f32 %v2265_v60, %v2264_v63 }
 0x38e   : > { %3303 = vtanh.f32 %v2266_v0  ;;  %2270 = vst [vmem:[#allocation4 + $0x10] sm:$0xff] %v2266_v0 }
 0x395   : > { %v2449_v25 = vld [vmem:[#allocation4 + $0x10] sm:$0xff] (!%p2818_p11) }
 0x396   : > { %2452 = vst [vmem:[#allocation9 + $0x10] sm:$0xff] (!%p2818_p11), %v2449_v25 }
 0x398   : > { %v3304_v1 = vpop.eup %3303 }
 0x399   : > { %v2268_v2 = vmul.f32 %v3304_v1, %v3302_v9 }
 0x39b   : > { %2269 = vst [vmem:[#allocation3 + $0x10] sm:$0xff] %v2268_v2  ;;  %v2271_v3 = vpack.c.bf16 %v2268_v2, %v2268_v2 }
 0x39d   : > { %2413 = vmatmul.mubr.bf16.vlgmr.msra.gmra.mrb[12].mxu0 %v2271_v3 }
 0x3a2   : > { %v2443_v21 = vld [vmem:[#allocation3 + $0x10] sm:$0xff] (!%p2818_p11) }
 0x3a3   : > { %2446 = vst [vmem:[#allocation7 + $0x10] sm:$0xff] (!%p2818_p11), %v2443_v21 }
 0x470   : > { %v2414_v7 = vpop.f32.mrb[12].mxu0 }
 0x471   : > { %v2415_v8 = vadd.f32 %v2414_v7, %v2293_v5  ;;  %v2416_v10 = vpop.f32.mrb[13].mxu0 }
 0x472   : > { %v2417_v11 = vadd.f32 %v2416_v10, %v2297_v6  ;;  %v2418_v12 = vpop.f32.mrb[14].mxu0 }
 0x473   : > { %v2816_v13 = vmul.f32 -1.442695, %v2415_v8  ;;  %v2419_v14 = vpop.f32.mrb[15].mxu0 }
 0x474   : > { %v2817_v15 = vmul.f32 -1.442695, %v2417_v11 }
 0x475   : > { %3305 = vpow2.f32 %v2816_v13 }
 0x476   : > { %3307 = vpow2.f32 %v2817_v15 }
 0x47f   : > { %v3306_v16 = vpop.eup %3305 }
 0x480   : > { %v3308_v17 = vpop.eup %3307  ;;  %v2427_v22 = vadd.f32 1.0, %v3306_v16 }
 0x481   : > { %v2428_v18 = vadd.f32 1.0, %v3308_v17 }
 0x482   : > { %3309 = vrcp.f32 %v2427_v22 }
 0x483   : > { %3311 = vrcp.f32 %v2428_v18 }
 0x488   : > { %2440 = sbr.rel (%p2818_p11) target bundleno = 1167 (0x48f), region = 72 }
 0x48c   : > { %v3310_v54 = vpop.eup %3309 }
 0x48d   : > { %v3312_v56 = vpop.eup %3311  ;;  %2433 = vst [vmem:[%s3562_s22] sm:$0xff] %v3310_v54  ;;  %2435 = vst [vmem:[#allocation2] sm:$0xff] %v3310_v54 }
 0x48e   : > { %2434 = vst [vmem:[%s3562_s22 + $0x8] sm:$0xff] %v3312_v56  ;;  %2436 = vst [vmem:[#allocation2 + $0x8] sm:$0xff] %v3312_v56 }
 0x48f PF: > { %s3434_s15 = smov [#allocation7]  }
 0x490   : > { %s2478_s16 = sshll.u32 %s3434_s15, 4  ;;  %s2479_s16 = int_to_ptr.vmem [resolvable:$true] %s2478_s16 }
 0x491   : > { %s3313_s27 = scalar_lea.vmem %s2479_s16, 384  ;;  %p3320_p1 = scmp.lt.s32.totalorder %s2479_s16, %s2479_s16 }
 0x492   : > { %p3314_p12 = scmp.ne.s32.totalorder %s2479_s16, %s3313_s27  ;;  %p3321_p3 = scmp.lt.s32.totalorder %s3313_s27, %s3313_s27 }
 0x494   : > { %p3315_p13 = pnand %p3314_p12, %p277_p2  ;;  %p3322_p4 = por %p3321_p3, %p3320_p1 }
 0x496   : > { %p3316_p0 = pneg %p3315_p13 }
 0x498   : > { %p3323_p7 = pnand %p3322_p4, %p3316_p0 }
 0x49a   : > { %3326 = shalt.err (!%p3323_p7)
}
 0x49b   : > { %s3327_s21 = scalar_lea.hbm %s4450_s12, 384 }
 0x49c   : > { %p3328_p8 = scmp.ne.s32.totalorder %s4450_s12, %s3327_s21  ;;  %p3333_p11 = scmp.lt.u32.totalorder %s3327_s21, %s4450_s12 }
 0x49e   : > { %p3329_p9 = pnand %p3328_p8, %p277_p2 }
 0x4a0   : > { %p3330_p10 = pneg %p3329_p9 }
 0x4a2   : > { %p3335_p12 = pnand %p3333_p11, %p3330_p10 }
 0x4a4   : > { %3338 = shalt.err (!%p3335_p12)
}
 0x4a5   : > { %s3435_s15 = smov 128   ;;  %s3436_s27 = smov 8  }
 0x4a6   : > { %2843 = dma.vmem_to_hbm [thread:$0]  (%p277_p2), %s2479_s16, 384, %s4450_s12, [#allocation8], %s3435_s15, %s3435_s15, %s3436_s27  }
 0x4a7   : > { %s2828_s23 = sshll.u32 %s3530_s29, 8  ;;  %s2468_s24 = sshll.u32 %s3562_s22, 4  ;;  %s2469_s24 = int_to_ptr.vmem [resolvable:$true] %s2468_s24 }
 0x4a8   : > { %s4375_s30 = scalar_lea.hbm %s4449_s11, %s2828_s23  ;;  %s4471_s0 = sand.u32 1, %s3423_s26  }
 0x4a9   : > { %s2454_s1 = scalar_lea.sflag [#allocation6], %s4471_s0  ;;  %s3339_s2 = scalar_lea.vmem %s2469_s24, 256 }
 0x4aa   : > { %p3340_p13 = scmp.ne.s32.totalorder %s2469_s24, %s3339_s2  ;;  %s3437_s3 = smov [#allocation5]  }
 0x4ab   : > { %s3343_s4 = sshll.u32 %s3437_s3, 4  ;;  %s3344_s4 = int_to_ptr.vmem [resolvable:$false] %s3343_s4 }
 0x4ac   : > { %p3341_p0 = pnand %p3340_p13, %p3549_p5  ;;  %s3345_s14 = scalar_lea.vmem %s3344_s4, 512 }
 0x4ad   : > { %p3346_p3 = scmp.lt.s32.totalorder %s2469_s24, %s3344_s4  ;;  %p3347_p4 = scmp.lt.s32.totalorder %s3345_s14, %s3339_s2 }
 0x4ae   : > { %p3342_p1 = pneg %p3341_p0 }
 0x4af   : > { %p3348_p7 = por %p3347_p4, %p3346_p3 }
 0x4b1   : > { %p3349_p8 = pnand %p3348_p7, %p3342_p1 }
 0x4b3   : > { %3352 = shalt.err (!%p3349_p8)
}
 0x4b4   : > { %s3353_s0 = scalar_lea.hbm %s4375_s30, 256  ;;  %s3357_s3 = scalar_lea.hbm %s4449_s11, 1280 }
 0x4b5   : > { %p3354_p9 = scmp.ne.s32.totalorder %s4375_s30, %s3353_s0  ;;  %p3358_p12 = scmp.lt.u32.totalorder %s4375_s30, %s4449_s11 }
 0x4b6   : > { %p3359_p13 = scmp.lt.u32.totalorder %s3357_s3, %s3353_s0  ;;  %p3361_p1 = scmp.lt.u32.totalorder %s3353_s0, %s4375_s30 }
 0x4b7   : > { %p3355_p10 = pnand %p3354_p9, %p3549_p5 }
 0x4b8   : > { %p3360_p0 = por %p3359_p13, %p3358_p12 }
 0x4b9   : > { %p3356_p11 = pneg %p3355_p10 }
 0x4ba   : > { %p3362_p3 = por %p3361_p1, %p3360_p0 }
 0x4bc   : > { %p3363_p4 = pnand %p3362_p3, %p3356_p11 }
 0x4be   : > { %3366 = shalt.err (!%p3363_p4)
}
 0x4bf   : > { %2841 = dma.vmem_to_hbm [thread:$0]  (%p3549_p5), %s2469_s24, 256, %s4375_s30, %s2454_s1  }
 0x4c0   : > { %s3438_s2 = smov [#allocation9]  }
 0x4c1   : > { %s2491_s23 = sshll.u32 %s3438_s2, 4  ;;  %s2492_s23 = int_to_ptr.vmem [resolvable:$true] %s2491_s23 }
 0x4c2   : > { %s3367_s21 = scalar_lea.vmem %s2492_s23, 384  ;;  %p3374_p10 = scmp.lt.s32.totalorder %s2492_s23, %s2492_s23 }
 0x4c3   : > { %p3368_p7 = scmp.ne.s32.totalorder %s2492_s23, %s3367_s21  ;;  %p3375_p6 = scmp.lt.s32.totalorder %s3367_s21, %s3367_s21 }
 0x4c5   : > { %p3369_p8 = pnand %p3368_p7, %p277_p2  ;;  %p3376_p12 = por %p3375_p6, %p3374_p10 }
 0x4c7   : > { %p3370_p9 = pneg %p3369_p8 }
 0x4c9   : > { %p3377_p13 = pnand %p3376_p12, %p3370_p9 }
 0x4cb   : > { %3380 = shalt.err (!%p3377_p13)
}
 0x4cc   : > { %s3381_s18 = scalar_lea.hbm %s4451_s13, 384 }
 0x4cd   : > { %p3382_p5 = scmp.ne.s32.totalorder %s4451_s13, %s3381_s18  ;;  %p3387_p1 = scmp.lt.u32.totalorder %s3381_s18, %s4451_s13 }
 0x4cf   : > { %p3383_p11 = pnand %p3382_p5, %p277_p2 }
 0x4d1   : > { %p3384_p0 = pneg %p3383_p11 }
 0x4d3   : > { %p3389_p3 = pnand %p3387_p1, %p3384_p0 }
 0x4d5   : > { %3392 = shalt.err (!%p3389_p3)
}
 0x4d6   : > { %2845 = dma.vmem_to_hbm [thread:$0]  (%p277_p2), %s2492_s23, 384, %s4451_s13, [#allocation8], %s3435_s15, %s3435_s15, %s3436_s27  }
 0x4d7   : > { %3410 = dma.done.wait (%p277_p2), [#allocation8], 768  }
 0x4d8   : > { %3412 = vsyncadd (%p277_p2), [#allocation8], 4294966528 }
 0x4d9 PF: > { %p2859_p6 = scmp.ge.s32.totalorder %s3431_s28, 2  ;;  %s2514_s3 = sand.u32 1, %s3419_s25  }
 0x4da   : > { %p4472_p4 = scmp.ne.s32.totalorder %s4465_s19, 0  ;;  %s2515_s20 = scalar_lea.sflag [#allocation6], %s2514_s3 }
 0x4dc   : > { %p2852_p7 = pnand %p2859_p6, %p4472_p4 }
 0x4de   : > { %3414 = dma.done.wait (!%p2852_p7), %s2515_s20, 256  }
 0x4df   : > { %3416 = vsyncadd (!%p2852_p7), %s2515_s20, 4294967040  ;;  %s4473_s28 = sld [smem:[#allocation13_spill]]  ;;  %s4474_s4 = sld [smem:[#allocation12_spill]] }
 0x4e0   : > { %s4475_s27 = sld [smem:[#allocation14_spill]]  ;;  %s4476_s25 = smov %s3423_s26 }
 0x4e5   : > { %p25_p8 = scmp.ge.s32.totalorder %s4473_s28, 7   ;;  %s4477_s26 = smov %s4474_s4 }
 0x4e7   :  { %27 = sbr.rel (!%p25_p8) target bundleno = 10 (0xa), region = 124 }
 0x4ee   :  { %2520 = vsyncpa [#allocation6], 1 }
 0x4ef   :  { %2522 = vsyncpa [#allocation6 + $0x1], 1 }
 0x4f0   :  { %2523 = vsyncpa [#allocation8], 1 }

</bundles_post_ra>
